<compile_context>
chip_gen: v5e
topology: v5e:2x2
jax: 0.10.0
libtpu: 0.0.40
codegen_flags: <defaults>
</compile_context>

<pallas_src>
import functools

import jax
import jax.numpy as jnp
from jax.experimental import pallas as pl
from jax.experimental.pallas import tpu as pltpu


LANE = 128          # TPU lane width; channels are padded to a multiple of this
W_LEFT_HALO = 8     # left spatial halo: 8 => sublane-aligned interior store


# ----------------------------------------------------------------------------
# Kernel 1: per-image BN partial statistics (sum, sum of squares) over H, W.
#   grid=(N,), every step writes its own output block -> fully parallel
#   (megacore-safe on v7x); the tiny finalize happens in the wrapper.
# ----------------------------------------------------------------------------
def bn_partial_stats_kernel(x_ref, sum_ref, sq_ref):
    x = x_ref[...]                                       # (1, H, W, C) f32
    # single-pass per-channel sums (no reshape, x read exactly once)
    # TODO(synk): E[x^2]-E[x]^2 can cancel if |mean| >> std; use a shifted /
    # Welford accumulation if inputs are far from zero-mean.
    sum_ref[...] = jnp.sum(x, axis=(0, 1, 2))[None, None, :]
    sq_ref[...] = jnp.sum(x * x, axis=(0, 1, 2))[None, None, :]


# ----------------------------------------------------------------------------
# Kernel 2: fused BN-apply + depthwise 7x7 conv + ReLU + 1x1 conv + residual.
#   grid over batch; one image per grid step ("parallel" axis).
# ----------------------------------------------------------------------------
def resblock_main_kernel(x_ref, scale_ref, shift_ref, wdwb_ref, bdw_ref,
                         wpw_ref, bpw_ref, out_ref, ypad_ref, acc_ref,
                         *, rows_per_mm):
    H = x_ref.shape[1]
    W = x_ref.shape[2]
    C = x_ref.shape[3]
    Hp = H + 6                       # padded rows (3 top + 3 bottom halo)
    WL = W_LEFT_HALO                 # left halo = 8 -> aligned interior store
    Wp = W + WL + 3                  # padded cols (8 left + 3 right halo)

    # ---- BatchNorm as a folded per-channel affine (scale/shift from kernel 1)
    y = x_ref[0] * scale_ref[0] + shift_ref[0]           # (H, W, C) f32

    # ---- zero ONLY the halo strips; the interior is fully overwritten -------
    ypad_ref[0:3, :, :] = jnp.zeros((3, Wp, C), jnp.float32)
    ypad_ref[Hp - 3:Hp, :, :] = jnp.zeros((3, Wp, C), jnp.float32)
    ypad_ref[3:3 + H, 0:WL, :] = jnp.zeros((H, WL, C), jnp.float32)
    ypad_ref[3:3 + H, WL + W:Wp, :] = jnp.zeros((H, 3, C), jnp.float32)
    # interior store at sublane offset 8 and width W -> unmasked vst
    ypad_ref[3:3 + H, WL:WL + W, :] = y

    # ---- depthwise 7x7 conv: input-row-major accumulation -------------------
    # acc_ref has 6 junk rows on each side so every (p, kh) pair writes a valid
    # row index without conditionals; true output row h lives at acc_ref[h+6].
    acc_ref[...] = jnp.zeros(acc_ref.shape, jnp.float32)

    @pl.loop(0, Hp)
    def _input_row(p):
        row = ypad_ref[p]                                 # (Wp, C): 1 load/row
        # 7 kw-shifted variants computed once and reused across the 7 kh taps
        # (7 sublane shifts per input row instead of 49 per output row).
        shifted = [row[WL - 3 + kw: WL - 3 + kw + W, :] for kw in range(7)]
        for kh in range(7):
            # wdwb_ref holds the tap weights pre-broadcast along W, so this is
            # a plain VMEM load (vld slots), not a per-tap broadcast op.
            contrib = shifted[0] * wdwb_ref[kh * 7 + 0]
            for kw in range(1, 7):
                contrib = contrib + shifted[kw] * wdwb_ref[kh * 7 + kw]
            idx = p + (6 - kh)                            # output row h + 6
            acc_ref[idx] = acc_ref[idx] + contrib

    # ---- bias + ReLU + 1x1 conv (MXU, bf16 in / f32 acc) + residual ---------
    # Done in row blocks straight from the f32 accumulator: bounds the f32
    # matmul intermediate and lets MXU/store work overlap the VPU tail.
    bdw = bdw_ref[0]                                      # (C,)
    wpw = wpw_ref[...]                                    # (C, C) bf16
    bpw = bpw_ref[...]                                    # (1, C) f32
    n_blocks = H // rows_per_mm

    @pl.loop(0, n_blocks)
    def _mm_block(b):
        r0 = pl.multiple_of(b * rows_per_mm, rows_per_mm)
        a = jnp.maximum(acc_ref[pl.ds(6 + r0, rows_per_mm)] + bdw, 0.0)
        a = a.reshape(rows_per_mm * W, C).astype(jnp.bfloat16)
        z = jnp.dot(a, wpw, preferred_element_type=jnp.float32) + bpw
        out_ref[0, pl.ds(r0, rows_per_mm), :, :] = (
            x_ref[0, pl.ds(r0, rows_per_mm), :, :]
            + z.reshape(rows_per_mm, W, C))


# ----------------------------------------------------------------------------
# Wrapper helpers
# ----------------------------------------------------------------------------
def _pad_last(a, target):
    pad = target - a.shape[-1]
    if pad == 0:
        return a
    return jnp.pad(a, [(0, 0)] * (a.ndim - 1) + [(0, pad)])


def _pick_rows_per_mm(H, W):
    # rows per 1x1-matmul block: divisor of H with rows*W <= 1024 (bounds the
    # f32 intermediate while keeping the MXU matmul reasonably tall).
    for d in (32, 16, 8, 4, 2, 1):
        if H % d == 0 and d * W <= 1024:
            return d
    return 1


# ----------------------------------------------------------------------------
# NHWC-native core (no layout plumbing inside; C already padded to 128).
# ----------------------------------------------------------------------------
@functools.partial(jax.jit, static_argnames=("eps",))
def resblock_pallas_nhwc(x, gamma, beta, w_dw, b_dw, w_pw, b_pw, eps=1e-5):
    N, H, W, C_pad = x.shape
    assert C_pad % LANE == 0
    C = gamma.shape[0]

    # ---- tiny parameter prep (negligible vs. activation traffic) -----------
    gamma_p = _pad_last(gamma.astype(jnp.float32), C_pad)
    beta_p = _pad_last(beta.astype(jnp.float32), C_pad)
    # depthwise weight (C, 1, 7, 7) -> (49, W, C_pad): pre-broadcast along the
    # sublane (W) axis once so the kernel never re-issues tap broadcasts.
    w_dw_hwc = _pad_last(
        jnp.transpose(w_dw[:, 0, :, :], (1, 2, 0)).astype(jnp.float32), C_pad)
    wdwb = jnp.broadcast_to(w_dw_hwc.reshape(49, 1, C_pad), (49, W, C_pad))
    b_dw_p = _pad_last(b_dw.astype(jnp.float32), C_pad).reshape(1, C_pad)
    # pointwise weight (C_out, C_in, 1, 1) -> (C_in_pad, C_out_pad) bf16 (MXU)
    w_pw_io = jnp.transpose(w_pw[:, :, 0, 0], (1, 0)).astype(jnp.float32)
    w_pw_io = jnp.pad(_pad_last(w_pw_io, C_pad), ((0, C_pad - C), (0, 0)))
    w_pw_io = w_pw_io.astype(jnp.bfloat16)
    b_pw_p = _pad_last(b_pw.astype(jnp.float32), C_pad).reshape(1, C_pad)

    # ---- kernel 1: per-image BN partial sums (fully parallel grid) ---------
    psum, psq = pl.pallas_call(
        bn_partial_stats_kernel,
        out_shape=(jax.ShapeDtypeStruct((N, 1, C_pad), jnp.float32),
                   jax.ShapeDtypeStruct((N, 1, C_pad), jnp.float32)),
        grid=(N,),
        in_specs=[pl.BlockSpec((1, H, W, C_pad), lambda n: (n, 0, 0, 0))],
        out_specs=(pl.BlockSpec((1, 1, C_pad), lambda n: (n, 0, 0)),
                   pl.BlockSpec((1, 1, C_pad), lambda n: (n, 0, 0))),
        compiler_params=pltpu.CompilerParams(
            dimension_semantics=("parallel",),
            vmem_limit_bytes=64 * 1024 * 1024),
    )(x)

    # ---- tiny BN finalize in the wrapper (training-mode: biased variance) --
    inv_count = 1.0 / float(N * H * W)
    mean = jnp.sum(psum[:, 0, :], axis=0) * inv_count
    var = jnp.sum(psq[:, 0, :], axis=0) * inv_count - mean * mean
    inv_std = jax.lax.rsqrt(var + eps)
    scale = (gamma_p * inv_std).reshape(1, C_pad)
    shift = (beta_p - mean * gamma_p * inv_std).reshape(1, C_pad)

    rows_per_mm = _pick_rows_per_mm(H, W)

    # ---- kernel 2: fused resblock body, one image per grid step ------------
    out = pl.pallas_call(
        functools.partial(resblock_main_kernel, rows_per_mm=rows_per_mm),
        out_shape=jax.ShapeDtypeStruct((N, H, W, C_pad), jnp.float32),
        grid=(N,),
        in_specs=[
            pl.BlockSpec((1, H, W, C_pad), lambda n: (n, 0, 0, 0)),   # x
            pl.BlockSpec((1, C_pad), lambda n: (0, 0)),               # scale
            pl.BlockSpec((1, C_pad), lambda n: (0, 0)),               # shift
            pl.BlockSpec((49, W, C_pad), lambda n: (0, 0, 0)),        # dw w (pre-bcast)
            pl.BlockSpec((1, C_pad), lambda n: (0, 0)),               # dw bias
            pl.BlockSpec((C_pad, C_pad), lambda n: (0, 0)),           # pw weight
            pl.BlockSpec((1, C_pad), lambda n: (0, 0)),               # pw bias
        ],
        out_specs=pl.BlockSpec((1, H, W, C_pad), lambda n: (n, 0, 0, 0)),
        scratch_shapes=[
            pltpu.VMEM((H + 6, W + W_LEFT_HALO + 3, C_pad), jnp.float32),  # ypad
            pltpu.VMEM((H + 12, W, C_pad), jnp.float32),                   # dw acc
        ],
        input_output_aliases={0: 0},   # x is dead after this call: write in place
        compiler_params=pltpu.CompilerParams(
            dimension_semantics=("parallel",),
            vmem_limit_bytes=64 * 1024 * 1024),
    )(x, scale, shift, wdwb, b_dw_p, w_pw_io, b_pw_p)
    return out


# ----------------------------------------------------------------------------
# NCHW adapter matching the PyTorch module's interface.
# NOTE (perf): the transpose + channel-pad below are pure layout plumbing (one
# extra HBM pass each way).  A real pipeline should keep activations NHWC with
# C % 128 == 0 end-to-end and call resblock_pallas_nhwc directly.
# ----------------------------------------------------------------------------
@functools.partial(jax.jit, static_argnames=("eps",))
def resblock_pallas(x_nchw, gamma, beta, w_dw, b_dw, w_pw, b_pw, eps=1e-5):
    N, C, H, W = x_nchw.shape
    C_pad = ((C + LANE - 1) // LANE) * LANE
    x = _pad_last(jnp.transpose(x_nchw, (0, 2, 3, 1)).astype(jnp.float32), C_pad)
    out = resblock_pallas_nhwc(x, gamma, beta, w_dw, b_dw, w_pw, b_pw, eps=eps)
    return jnp.transpose(out[..., :C], (0, 3, 1, 2))


# ----------------------------------------------------------------------------
# Pure-JAX reference (mirrors the PyTorch forward in training mode)
# ----------------------------------------------------------------------------
def resblock_reference(x, gamma, beta, w_dw, b_dw, w_pw, b_pw, eps=1e-5):
    C = x.shape[1]
    mean = jnp.mean(x, axis=(0, 2, 3), keepdims=True)
    var = jnp.mean((x - mean) ** 2, axis=(0, 2, 3), keepdims=True)   # biased
    y = (x - mean) * jax.lax.rsqrt(var + eps)
    y = y * gamma[None, :, None, None] + beta[None, :, None, None]
    y = jax.lax.conv_general_dilated(
        y, w_dw, window_strides=(1, 1), padding=((3, 3), (3, 3)),
        dimension_numbers=("NCHW", "OIHW", "NCHW"), feature_group_count=C)
    y = y + b_dw[None, :, None, None]
    y = jnp.maximum(y, 0.0)
    y = jax.lax.conv_general_dilated(
        y, w_pw, window_strides=(1, 1), padding=((0, 0), (0, 0)),
        dimension_numbers=("NCHW", "OIHW", "NCHW"))
    y = y + b_pw[None, :, None, None]
    return x + y


if __name__ == "__main__":
    N, C, H, W = 2, 4, 16, 16
    key = jax.random.PRNGKey(0)
    kx, k1, k2, k3, k4 = jax.random.split(key, 5)

    x = jax.random.normal(kx, (N, C, H, W), dtype=jnp.float32)

    # deterministic parameter init (PyTorch-default BN affine: gamma=1, beta=0)
    gamma = jnp.ones((C,), jnp.float32)
    beta = jnp.zeros((C,), jnp.float32)
    w_dw = jax.random.normal(k1, (C, 1, 7, 7), dtype=jnp.float32) * 0.1
    b_dw = jax.random.normal(k2, (C,), dtype=jnp.float32) * 0.1
    w_pw = jax.random.normal(k3, (C, C, 1, 1), dtype=jnp.float32) * 0.1
    b_pw = jax.random.normal(k4, (C,), dtype=jnp.float32) * 0.1

    out = resblock_pallas(x, gamma, beta, w_dw, b_dw, w_pw, b_pw)
    out = jax.block_until_ready(out)

    ref = resblock_reference(x, gamma, beta, w_dw, b_dw, w_pw, b_pw)
    ref = jax.block_until_ready(ref)

    assert out.shape == (N, C, H, W)
    # The 1x1 conv runs in bf16 on the MXU (intentional precision relaxation),
    # so allow ~1e-3-level deviations vs the all-f32 reference.
    assert jnp.allclose(out, ref, rtol=1e-2, atol=1e-2), (
        "mismatch vs reference: max abs err = "
        f"{float(jnp.max(jnp.abs(out - ref)))}")

    print("KERNEL_OK")
</pallas_src>

<mosaic_0001>
module attributes {stable_mosaic.version = 11 : i64} {
  func.func @bn_partial_stats_kernel(%arg0: i32, %arg1: memref<1x16x16x128xf32, #tpu.memory_space<vmem>>, %arg2: memref<1x1x128xf32, #tpu.memory_space<vmem>>, %arg3: memref<1x1x128xf32, #tpu.memory_space<vmem>>) attributes {dimension_semantics = [#tpu.dimension_semantics<parallel>], iteration_bounds = array<i64: 2>, scalar_prefetch = 0 : i64, scratch_operands = 0 : i64, tpu.core_type = #tpu.core_type<tc>, window_params = [{transform_indices = @transform_0, window_bounds = array<i64: 1, 16, 16, 128>}, {transform_indices = @transform_1, window_bounds = array<i64: 1, 1, 128>}, {transform_indices = @transform_2, window_bounds = array<i64: 1, 1, 128>}]} {
    %c0 = arith.constant 0 : index
    %c0_0 = arith.constant 0 : index
    %c0_1 = arith.constant 0 : index
    %c0_2 = arith.constant 0 : index
    %0 = vector.load %arg1[%c0, %c0_0, %c0_1, %c0_2] : memref<1x16x16x128xf32, #tpu.memory_space<vmem>>, vector<1x16x16x128xf32>
    %cst = arith.constant dense<0.000000e+00> : vector<128xf32>
    %1 = vector.multi_reduction <add>, %0, %cst [0, 1, 2] : vector<1x16x16x128xf32> to vector<128xf32>
    %2 = vector.shape_cast %1 : vector<128xf32> to vector<1x1x128xf32>
    %c0_3 = arith.constant 0 : index
    %c0_4 = arith.constant 0 : index
    %c0_5 = arith.constant 0 : index
    %3 = vector.load %arg2[%c0_3, %c0_4, %c0_5] : memref<1x1x128xf32, #tpu.memory_space<vmem>>, vector<1x1x128xf32>
    tpu.vector_store %arg2[%c0_3, %c0_4, %c0_5], %2 {strides = array<i32>} : memref<1x1x128xf32, #tpu.memory_space<vmem>>, vector<1x1x128xf32>,
    %4 = arith.mulf %0, %0 : vector<1x16x16x128xf32>
    %cst_6 = arith.constant dense<0.000000e+00> : vector<128xf32>
    %5 = vector.multi_reduction <add>, %4, %cst_6 [0, 1, 2] : vector<1x16x16x128xf32> to vector<128xf32>
    %6 = vector.shape_cast %5 : vector<128xf32> to vector<1x1x128xf32>
    %c0_7 = arith.constant 0 : index
    %c0_8 = arith.constant 0 : index
    %c0_9 = arith.constant 0 : index
    %7 = vector.load %arg3[%c0_7, %c0_8, %c0_9] : memref<1x1x128xf32, #tpu.memory_space<vmem>>, vector<1x1x128xf32>
    tpu.vector_store %arg3[%c0_7, %c0_8, %c0_9], %6 {strides = array<i32>} : memref<1x1x128xf32, #tpu.memory_space<vmem>>, vector<1x1x128xf32>,
    return
  }
  func.func @transform_0(%arg0: i32) -> (i32, i32, i32, i32) {
    %c0_i32 = arith.constant 0 : i32
    %c0_i32_0 = arith.constant 0 : i32
    %c0_i32_1 = arith.constant 0 : i32
    %c0_i32_2 = arith.constant 0 : i32
    return %arg0, %c0_i32, %c0_i32_0, %c0_i32_1 : i32, i32, i32, i32
  }
  func.func @transform_1(%arg0: i32) -> (i32, i32, i32) {
    %c0_i32 = arith.constant 0 : i32
    %c0_i32_0 = arith.constant 0 : i32
    %c0_i32_1 = arith.constant 0 : i32
    return %arg0, %c0_i32, %c0_i32_0 : i32, i32, i32
  }
  func.func @transform_2(%arg0: i32) -> (i32, i32, i32) {
    %c0_i32 = arith.constant 0 : i32
    %c0_i32_0 = arith.constant 0 : i32
    %c0_i32_1 = arith.constant 0 : i32
    return %arg0, %c0_i32, %c0_i32_0 : i32, i32, i32
  }
}

module attributes {stable_mosaic.version = 11 : i64} {
  func.func @resblock_main_kernel(%arg0: i32, %arg1: memref<1x16x16x128xf32, #tpu.memory_space<vmem>>, %arg2: memref<1x128xf32, #tpu.memory_space<vmem>>, %arg3: memref<1x128xf32, #tpu.memory_space<vmem>>, %arg4: memref<49x16x128xf32, #tpu.memory_space<vmem>>, %arg5: memref<1x128xf32, #tpu.memory_space<vmem>>, %arg6: memref<128x128xbf16, #tpu.memory_space<vmem>>, %arg7: memref<1x128xf32, #tpu.memory_space<vmem>>, %arg8: memref<1x16x16x128xf32, #tpu.memory_space<vmem>>, %arg9: memref<22x27x128xf32, #tpu.memory_space<vmem>>, %arg10: memref<28x16x128xf32, #tpu.memory_space<vmem>>) attributes {dimension_semantics = [#tpu.dimension_semantics<parallel>], iteration_bounds = array<i64: 2>, scalar_prefetch = 0 : i64, scratch_operands = 2 : i64, tpu.core_type = #tpu.core_type<tc>, window_params = [{transform_indices = @transform_0, window_bounds = array<i64: 1, 16, 16, 128>}, {pipeline_mode = #tpu.pipeline_mode<synchronous>, transform_indices = @transform_1, window_bounds = array<i64: 1, 128>}, {pipeline_mode = #tpu.pipeline_mode<synchronous>, transform_indices = @transform_2, window_bounds = array<i64: 1, 128>}, {pipeline_mode = #tpu.pipeline_mode<synchronous>, transform_indices = @transform_3, window_bounds = array<i64: 49, 16, 128>}, {pipeline_mode = #tpu.pipeline_mode<synchronous>, transform_indices = @transform_4, window_bounds = array<i64: 1, 128>}, {pipeline_mode = #tpu.pipeline_mode<synchronous>, transform_indices = @transform_5, window_bounds = array<i64: 128, 128>}, {pipeline_mode = #tpu.pipeline_mode<synchronous>, transform_indices = @transform_6, window_bounds = array<i64: 1, 128>}, {transform_indices = @transform_7, window_bounds = array<i64: 1, 16, 16, 128>}]} {
    %c0 = arith.constant 0 : index
    %c0_0 = arith.constant 0 : index
    %c0_1 = arith.constant 0 : index
    %c0_2 = arith.constant 0 : index
    %0 = vector.load %arg1[%c0, %c0_0, %c0_1, %c0_2] : memref<1x16x16x128xf32, #tpu.memory_space<vmem>>, vector<1x16x16x128xf32>
    %1 = vector.shape_cast %0 : vector<1x16x16x128xf32> to vector<16x16x128xf32>
    %c0_3 = arith.constant 0 : index
    %c0_4 = arith.constant 0 : index
    %2 = vector.load %arg2[%c0_3, %c0_4] : memref<1x128xf32, #tpu.memory_space<vmem>>, vector<1x128xf32>
    %3 = vector.shape_cast %2 : vector<1x128xf32> to vector<128xf32>
    %4 = vector.shape_cast %3 : vector<128xf32> to vector<1x1x128xf32>
    %5 = vector.broadcast %4 : vector<1x1x128xf32> to vector<16x16x128xf32>
    %6 = arith.mulf %1, %5 : vector<16x16x128xf32>
    %c0_5 = arith.constant 0 : index
    %c0_6 = arith.constant 0 : index
    %7 = vector.load %arg3[%c0_5, %c0_6] : memref<1x128xf32, #tpu.memory_space<vmem>>, vector<1x128xf32>
    %8 = vector.shape_cast %7 : vector<1x128xf32> to vector<128xf32>
    %9 = vector.shape_cast %8 : vector<128xf32> to vector<1x1x128xf32>
    %10 = vector.broadcast %9 : vector<1x1x128xf32> to vector<16x16x128xf32>
    %11 = arith.addf %6, %10 : vector<16x16x128xf32>
    %cst = arith.constant 0.000000e+00 : f32
    %12 = vector.broadcast %cst : f32 to vector<3x27x128xf32>
    %c0_7 = arith.constant 0 : index
    %c0_8 = arith.constant 0 : index
    %c0_9 = arith.constant 0 : index
    %13 = vector.load %arg9[%c0_7, %c0_8, %c0_9] : memref<22x27x128xf32, #tpu.memory_space<vmem>>, vector<3x27x128xf32>
    tpu.vector_store %arg9[%c0_7, %c0_8, %c0_9], %12 {strides = array<i32>} : memref<22x27x128xf32, #tpu.memory_space<vmem>>, vector<3x27x128xf32>,
    %cst_10 = arith.constant 0.000000e+00 : f32
    %14 = vector.broadcast %cst_10 : f32 to vector<3x27x128xf32>
    %c19 = arith.constant 19 : index
    %c0_11 = arith.constant 0 : index
    %c0_12 = arith.constant 0 : index
    %15 = vector.load %arg9[%c19, %c0_11, %c0_12] : memref<22x27x128xf32, #tpu.memory_space<vmem>>, vector<3x27x128xf32>
    tpu.vector_store %arg9[%c19, %c0_11, %c0_12], %14 {strides = array<i32>} : memref<22x27x128xf32, #tpu.memory_space<vmem>>, vector<3x27x128xf32>,
    %cst_13 = arith.constant 0.000000e+00 : f32
    %16 = vector.broadcast %cst_13 : f32 to vector<16x8x128xf32>
    %c3 = arith.constant 3 : index
    %c0_14 = arith.constant 0 : index
    %c0_15 = arith.constant 0 : index
    %17 = vector.load %arg9[%c3, %c0_14, %c0_15] : memref<22x27x128xf32, #tpu.memory_space<vmem>>, vector<16x8x128xf32>
    tpu.vector_store %arg9[%c3, %c0_14, %c0_15], %16 {strides = array<i32>} : memref<22x27x128xf32, #tpu.memory_space<vmem>>, vector<16x8x128xf32>,
    %cst_16 = arith.constant 0.000000e+00 : f32
    %18 = vector.broadcast %cst_16 : f32 to vector<16x3x128xf32>
    %c3_17 = arith.constant 3 : index
    %c24 = arith.constant 24 : index
    %c0_18 = arith.constant 0 : index
    %19 = vector.load %arg9[%c3_17, %c24, %c0_18] : memref<22x27x128xf32, #tpu.memory_space<vmem>>, vector<16x3x128xf32>
    tpu.vector_store %arg9[%c3_17, %c24, %c0_18], %18 {strides = array<i32>} : memref<22x27x128xf32, #tpu.memory_space<vmem>>, vector<16x3x128xf32>,
    %c3_19 = arith.constant 3 : index
    %c8 = arith.constant 8 : index
    %c0_20 = arith.constant 0 : index
    %20 = vector.load %arg9[%c3_19, %c8, %c0_20] : memref<22x27x128xf32, #tpu.memory_space<vmem>>, vector<16x16x128xf32>
    tpu.vector_store %arg9[%c3_19, %c8, %c0_20], %11 {strides = array<i32>} : memref<22x27x128xf32, #tpu.memory_space<vmem>>, vector<16x16x128xf32>,
    %cst_21 = arith.constant 0.000000e+00 : f32
    %21 = vector.broadcast %cst_21 : f32 to vector<28x16x128xf32>
    %c0_22 = arith.constant 0 : index
    %c0_23 = arith.constant 0 : index
    %c0_24 = arith.constant 0 : index
    %22 = vector.load %arg10[%c0_22, %c0_23, %c0_24] : memref<28x16x128xf32, #tpu.memory_space<vmem>>, vector<28x16x128xf32>
    tpu.vector_store %arg10[%c0_22, %c0_23, %c0_24], %21 {strides = array<i32>} : memref<28x16x128xf32, #tpu.memory_space<vmem>>, vector<28x16x128xf32>,
    %c0_i32 = arith.constant 0 : i32
    %c22_i32 = arith.constant 22 : i32
    %23 = arith.addi %c0_i32, %c22_i32 : i32
    %c1_i32 = arith.constant 1 : i32
    scf.for %arg11 = %c0_i32 to %23 step %c1_i32  : i32 {
      %c1_i32_46 = arith.constant 1 : i32
      %54 = arith.muli %arg11, %c1_i32_46 : i32
      %c0_i32_47 = arith.constant 0 : i32
      %55 = arith.addi %c0_i32_47, %54 : i32
      %56 = arith.index_cast %55 : i32 to index
      %c0_48 = arith.constant 0 : index
      %c0_49 = arith.constant 0 : index
      %57 = vector.load %arg9[%56, %c0_48, %c0_49] : memref<22x27x128xf32, #tpu.memory_space<vmem>>, vector<1x27x128xf32>
      %58 = vector.shape_cast %57 : vector<1x27x128xf32> to vector<27x128xf32>
      %59 = vector.extract_strided_slice %58 {offsets = [5, 0], sizes = [16, 128], strides = [1, 1]} : vector<27x128xf32> to vector<16x128xf32>
      %60 = vector.extract_strided_slice %58 {offsets = [6, 0], sizes = [16, 128], strides = [1, 1]} : vector<27x128xf32> to vector<16x128xf32>
      %61 = vector.extract_strided_slice %58 {offsets = [7, 0], sizes = [16, 128], strides = [1, 1]} : vector<27x128xf32> to vector<16x128xf32>
      %62 = vector.extract_strided_slice %58 {offsets = [8, 0], sizes = [16, 128], strides = [1, 1]} : vector<27x128xf32> to vector<16x128xf32>
      %63 = vector.extract_strided_slice %58 {offsets = [9, 0], sizes = [16, 128], strides = [1, 1]} : vector<27x128xf32> to vector<16x128xf32>
      %64 = vector.extract_strided_slice %58 {offsets = [10, 0], sizes = [16, 128], strides = [1, 1]} : vector<27x128xf32> to vector<16x128xf32>
      %65 = vector.extract_strided_slice %58 {offsets = [11, 0], sizes = [16, 128], strides = [1, 1]} : vector<27x128xf32> to vector<16x128xf32>
      %c0_50 = arith.constant 0 : index
      %c0_51 = arith.constant 0 : index
      %c0_52 = arith.constant 0 : index
      %66 = vector.load %arg4[%c0_50, %c0_51, %c0_52] : memref<49x16x128xf32, #tpu.memory_space<vmem>>, vector<1x16x128xf32>
      %67 = vector.shape_cast %66 : vector<1x16x128xf32> to vector<16x128xf32>
      %68 = arith.mulf %59, %67 : vector<16x128xf32>
      %c1 = arith.constant 1 : index
      %c0_53 = arith.constant 0 : index
      %c0_54 = arith.constant 0 : index
      %69 = vector.load %arg4[%c1, %c0_53, %c0_54] : memref<49x16x128xf32, #tpu.memory_space<vmem>>, vector<1x16x128xf32>
      %70 = vector.shape_cast %69 : vector<1x16x128xf32> to vector<16x128xf32>
      %71 = arith.mulf %60, %70 : vector<16x128xf32>
      %72 = arith.addf %68, %71 : vector<16x128xf32>
      %c2 = arith.constant 2 : index
      %c0_55 = arith.constant 0 : index
      %c0_56 = arith.constant 0 : index
      %73 = vector.load %arg4[%c2, %c0_55, %c0_56] : memref<49x16x128xf32, #tpu.memory_space<vmem>>, vector<1x16x128xf32>
      %74 = vector.shape_cast %73 : vector<1x16x128xf32> to vector<16x128xf32>
      %75 = arith.mulf %61, %74 : vector<16x128xf32>
      %76 = arith.addf %72, %75 : vector<16x128xf32>
      %c3_57 = arith.constant 3 : index
      %c0_58 = arith.constant 0 : index
      %c0_59 = arith.constant 0 : index
      %77 = vector.load %arg4[%c3_57, %c0_58, %c0_59] : memref<49x16x128xf32, #tpu.memory_space<vmem>>, vector<1x16x128xf32>
      %78 = vector.shape_cast %77 : vector<1x16x128xf32> to vector<16x128xf32>
      %79 = arith.mulf %62, %78 : vector<16x128xf32>
      %80 = arith.addf %76, %79 : vector<16x128xf32>
      %c4 = arith.constant 4 : index
      %c0_60 = arith.constant 0 : index
      %c0_61 = arith.constant 0 : index
      %81 = vector.load %arg4[%c4, %c0_60, %c0_61] : memref<49x16x128xf32, #tpu.memory_space<vmem>>, vector<1x16x128xf32>
      %82 = vector.shape_cast %81 : vector<1x16x128xf32> to vector<16x128xf32>
      %83 = arith.mulf %63, %82 : vector<16x128xf32>
      %84 = arith.addf %80, %83 : vector<16x128xf32>
      %c5 = arith.constant 5 : index
      %c0_62 = arith.constant 0 : index
      %c0_63 = arith.constant 0 : index
      %85 = vector.load %arg4[%c5, %c0_62, %c0_63] : memref<49x16x128xf32, #tpu.memory_space<vmem>>, vector<1x16x128xf32>
      %86 = vector.shape_cast %85 : vector<1x16x128xf32> to vector<16x128xf32>
      %87 = arith.mulf %64, %86 : vector<16x128xf32>
      %88 = arith.addf %84, %87 : vector<16x128xf32>
      %c6 = arith.constant 6 : index
      %c0_64 = arith.constant 0 : index
      %c0_65 = arith.constant 0 : index
      %89 = vector.load %arg4[%c6, %c0_64, %c0_65] : memref<49x16x128xf32, #tpu.memory_space<vmem>>, vector<1x16x128xf32>
      %90 = vector.shape_cast %89 : vector<1x16x128xf32> to vector<16x128xf32>
      %91 = arith.mulf %65, %90 : vector<16x128xf32>
      %92 = arith.addf %88, %91 : vector<16x128xf32>
      %c6_i32_66 = arith.constant 6 : i32
      %93 = arith.addi %55, %c6_i32_66 : i32
      %94 = arith.index_cast %93 : i32 to index
      %c0_67 = arith.constant 0 : index
      %c0_68 = arith.constant 0 : index
      %95 = vector.load %arg10[%94, %c0_67, %c0_68] : memref<28x16x128xf32, #tpu.memory_space<vmem>>, vector<1x16x128xf32>
      %96 = vector.shape_cast %95 : vector<1x16x128xf32> to vector<16x128xf32>
      %97 = arith.addf %96, %92 : vector<16x128xf32>
      %98 = arith.index_cast %93 : i32 to index
      %c0_69 = arith.constant 0 : index
      %c0_70 = arith.constant 0 : index
      %99 = vector.load %arg10[%98, %c0_69, %c0_70] : memref<28x16x128xf32, #tpu.memory_space<vmem>>, vector<1x16x128xf32>
      %100 = vector.shape_cast %99 : vector<1x16x128xf32> to vector<16x128xf32>
      %101 = vector.shape_cast %97 : vector<16x128xf32> to vector<1x16x128xf32>
      tpu.vector_store %arg10[%98, %c0_69, %c0_70], %101 {strides = array<i32>} : memref<28x16x128xf32, #tpu.memory_space<vmem>>, vector<1x16x128xf32>,
      %c7 = arith.constant 7 : index
      %c0_71 = arith.constant 0 : index
      %c0_72 = arith.constant 0 : index
      %102 = vector.load %arg4[%c7, %c0_71, %c0_72] : memref<49x16x128xf32, #tpu.memory_space<vmem>>, vector<1x16x128xf32>
      %103 = vector.shape_cast %102 : vector<1x16x128xf32> to vector<16x128xf32>
      %104 = arith.mulf %59, %103 : vector<16x128xf32>
      %c8_73 = arith.constant 8 : index
      %c0_74 = arith.constant 0 : index
      %c0_75 = arith.constant 0 : index
      %105 = vector.load %arg4[%c8_73, %c0_74, %c0_75] : memref<49x16x128xf32, #tpu.memory_space<vmem>>, vector<1x16x128xf32>
      %106 = vector.shape_cast %105 : vector<1x16x128xf32> to vector<16x128xf32>
      %107 = arith.mulf %60, %106 : vector<16x128xf32>
      %108 = arith.addf %104, %107 : vector<16x128xf32>
      %c9 = arith.constant 9 : index
      %c0_76 = arith.constant 0 : index
      %c0_77 = arith.constant 0 : index
      %109 = vector.load %arg4[%c9, %c0_76, %c0_77] : memref<49x16x128xf32, #tpu.memory_space<vmem>>, vector<1x16x128xf32>
      %110 = vector.shape_cast %109 : vector<1x16x128xf32> to vector<16x128xf32>
      %111 = arith.mulf %61, %110 : vector<16x128xf32>
      %112 = arith.addf %108, %111 : vector<16x128xf32>
      %c10 = arith.constant 10 : index
      %c0_78 = arith.constant 0 : index
      %c0_79 = arith.constant 0 : index
      %113 = vector.load %arg4[%c10, %c0_78, %c0_79] : memref<49x16x128xf32, #tpu.memory_space<vmem>>, vector<1x16x128xf32>
      %114 = vector.shape_cast %113 : vector<1x16x128xf32> to vector<16x128xf32>
      %115 = arith.mulf %62, %114 : vector<16x128xf32>
      %116 = arith.addf %112, %115 : vector<16x128xf32>
      %c11 = arith.constant 11 : index
      %c0_80 = arith.constant 0 : index
      %c0_81 = arith.constant 0 : index
      %117 = vector.load %arg4[%c11, %c0_80, %c0_81] : memref<49x16x128xf32, #tpu.memory_space<vmem>>, vector<1x16x128xf32>
      %118 = vector.shape_cast %117 : vector<1x16x128xf32> to vector<16x128xf32>
      %119 = arith.mulf %63, %118 : vector<16x128xf32>
      %120 = arith.addf %116, %119 : vector<16x128xf32>
      %c12 = arith.constant 12 : index
      %c0_82 = arith.constant 0 : index
      %c0_83 = arith.constant 0 : index
      %121 = vector.load %arg4[%c12, %c0_82, %c0_83] : memref<49x16x128xf32, #tpu.memory_space<vmem>>, vector<1x16x128xf32>
      %122 = vector.shape_cast %121 : vector<1x16x128xf32> to vector<16x128xf32>
      %123 = arith.mulf %64, %122 : vector<16x128xf32>
      %124 = arith.addf %120, %123 : vector<16x128xf32>
      %c13 = arith.constant 13 : index
      %c0_84 = arith.constant 0 : index
      %c0_85 = arith.constant 0 : index
      %125 = vector.load %arg4[%c13, %c0_84, %c0_85] : memref<49x16x128xf32, #tpu.memory_space<vmem>>, vector<1x16x128xf32>
      %126 = vector.shape_cast %125 : vector<1x16x128xf32> to vector<16x128xf32>
      %127 = arith.mulf %65, %126 : vector<16x128xf32>
      %128 = arith.addf %124, %127 : vector<16x128xf32>
      %c5_i32 = arith.constant 5 : i32
      %129 = arith.addi %55, %c5_i32 : i32
      %130 = arith.index_cast %129 : i32 to index
      %c0_86 = arith.constant 0 : index
      %c0_87 = arith.constant 0 : index
      %131 = vector.load %arg10[%130, %c0_86, %c0_87] : memref<28x16x128xf32, #tpu.memory_space<vmem>>, vector<1x16x128xf32>
      %132 = vector.shape_cast %131 : vector<1x16x128xf32> to vector<16x128xf32>
      %133 = arith.addf %132, %128 : vector<16x128xf32>
      %134 = arith.index_cast %129 : i32 to index
      %c0_88 = arith.constant 0 : index
      %c0_89 = arith.constant 0 : index
      %135 = vector.load %arg10[%134, %c0_88, %c0_89] : memref<28x16x128xf32, #tpu.memory_space<vmem>>, vector<1x16x128xf32>
      %136 = vector.shape_cast %135 : vector<1x16x128xf32> to vector<16x128xf32>
      %137 = vector.shape_cast %133 : vector<16x128xf32> to vector<1x16x128xf32>
      tpu.vector_store %arg10[%134, %c0_88, %c0_89], %137 {strides = array<i32>} : memref<28x16x128xf32, #tpu.memory_space<vmem>>, vector<1x16x128xf32>,
      %c14 = arith.constant 14 : index
      %c0_90 = arith.constant 0 : index
      %c0_91 = arith.constant 0 : index
      %138 = vector.load %arg4[%c14, %c0_90, %c0_91] : memref<49x16x128xf32, #tpu.memory_space<vmem>>, vector<1x16x128xf32>
      %139 = vector.shape_cast %138 : vector<1x16x128xf32> to vector<16x128xf32>
      %140 = arith.mulf %59, %139 : vector<16x128xf32>
      %c15 = arith.constant 15 : index
      %c0_92 = arith.constant 0 : index
      %c0_93 = arith.constant 0 : index
      %141 = vector.load %arg4[%c15, %c0_92, %c0_93] : memref<49x16x128xf32, #tpu.memory_space<vmem>>, vector<1x16x128xf32>
      %142 = vector.shape_cast %141 : vector<1x16x128xf32> to vector<16x128xf32>
      %143 = arith.mulf %60, %142 : vector<16x128xf32>
      %144 = arith.addf %140, %143 : vector<16x128xf32>
      %c16 = arith.constant 16 : index
      %c0_94 = arith.constant 0 : index
      %c0_95 = arith.constant 0 : index
      %145 = vector.load %arg4[%c16, %c0_94, %c0_95] : memref<49x16x128xf32, #tpu.memory_space<vmem>>, vector<1x16x128xf32>
      %146 = vector.shape_cast %145 : vector<1x16x128xf32> to vector<16x128xf32>
      %147 = arith.mulf %61, %146 : vector<16x128xf32>
      %148 = arith.addf %144, %147 : vector<16x128xf32>
      %c17 = arith.constant 17 : index
      %c0_96 = arith.constant 0 : index
      %c0_97 = arith.constant 0 : index
      %149 = vector.load %arg4[%c17, %c0_96, %c0_97] : memref<49x16x128xf32, #tpu.memory_space<vmem>>, vector<1x16x128xf32>
      %150 = vector.shape_cast %149 : vector<1x16x128xf32> to vector<16x128xf32>
      %151 = arith.mulf %62, %150 : vector<16x128xf32>
      %152 = arith.addf %148, %151 : vector<16x128xf32>
      %c18 = arith.constant 18 : index
      %c0_98 = arith.constant 0 : index
      %c0_99 = arith.constant 0 : index
      %153 = vector.load %arg4[%c18, %c0_98, %c0_99] : memref<49x16x128xf32, #tpu.memory_space<vmem>>, vector<1x16x128xf32>
      %154 = vector.shape_cast %153 : vector<1x16x128xf32> to vector<16x128xf32>
      %155 = arith.mulf %63, %154 : vector<16x128xf32>
      %156 = arith.addf %152, %155 : vector<16x128xf32>
      %c19_100 = arith.constant 19 : index
      %c0_101 = arith.constant 0 : index
      %c0_102 = arith.constant 0 : index
      %157 = vector.load %arg4[%c19_100, %c0_101, %c0_102] : memref<49x16x128xf32, #tpu.memory_space<vmem>>, vector<1x16x128xf32>
      %158 = vector.shape_cast %157 : vector<1x16x128xf32> to vector<16x128xf32>
      %159 = arith.mulf %64, %158 : vector<16x128xf32>
      %160 = arith.addf %156, %159 : vector<16x128xf32>
      %c20 = arith.constant 20 : index
      %c0_103 = arith.constant 0 : index
      %c0_104 = arith.constant 0 : index
      %161 = vector.load %arg4[%c20, %c0_103, %c0_104] : memref<49x16x128xf32, #tpu.memory_space<vmem>>, vector<1x16x128xf32>
      %162 = vector.shape_cast %161 : vector<1x16x128xf32> to vector<16x128xf32>
      %163 = arith.mulf %65, %162 : vector<16x128xf32>
      %164 = arith.addf %160, %163 : vector<16x128xf32>
      %c4_i32 = arith.constant 4 : i32
      %165 = arith.addi %55, %c4_i32 : i32
      %166 = arith.index_cast %165 : i32 to index
      %c0_105 = arith.constant 0 : index
      %c0_106 = arith.constant 0 : index
      %167 = vector.load %arg10[%166, %c0_105, %c0_106] : memref<28x16x128xf32, #tpu.memory_space<vmem>>, vector<1x16x128xf32>
      %168 = vector.shape_cast %167 : vector<1x16x128xf32> to vector<16x128xf32>
      %169 = arith.addf %168, %164 : vector<16x128xf32>
      %170 = arith.index_cast %165 : i32 to index
      %c0_107 = arith.constant 0 : index
      %c0_108 = arith.constant 0 : index
      %171 = vector.load %arg10[%170, %c0_107, %c0_108] : memref<28x16x128xf32, #tpu.memory_space<vmem>>, vector<1x16x128xf32>
      %172 = vector.shape_cast %171 : vector<1x16x128xf32> to vector<16x128xf32>
      %173 = vector.shape_cast %169 : vector<16x128xf32> to vector<1x16x128xf32>
      tpu.vector_store %arg10[%170, %c0_107, %c0_108], %173 {strides = array<i32>} : memref<28x16x128xf32, #tpu.memory_space<vmem>>, vector<1x16x128xf32>,
      %c21 = arith.constant 21 : index
      %c0_109 = arith.constant 0 : index
      %c0_110 = arith.constant 0 : index
      %174 = vector.load %arg4[%c21, %c0_109, %c0_110] : memref<49x16x128xf32, #tpu.memory_space<vmem>>, vector<1x16x128xf32>
      %175 = vector.shape_cast %174 : vector<1x16x128xf32> to vector<16x128xf32>
      %176 = arith.mulf %59, %175 : vector<16x128xf32>
      %c22 = arith.constant 22 : index
      %c0_111 = arith.constant 0 : index
      %c0_112 = arith.constant 0 : index
      %177 = vector.load %arg4[%c22, %c0_111, %c0_112] : memref<49x16x128xf32, #tpu.memory_space<vmem>>, vector<1x16x128xf32>
      %178 = vector.shape_cast %177 : vector<1x16x128xf32> to vector<16x128xf32>
      %179 = arith.mulf %60, %178 : vector<16x128xf32>
      %180 = arith.addf %176, %179 : vector<16x128xf32>
      %c23 = arith.constant 23 : index
      %c0_113 = arith.constant 0 : index
      %c0_114 = arith.constant 0 : index
      %181 = vector.load %arg4[%c23, %c0_113, %c0_114] : memref<49x16x128xf32, #tpu.memory_space<vmem>>, vector<1x16x128xf32>
      %182 = vector.shape_cast %181 : vector<1x16x128xf32> to vector<16x128xf32>
      %183 = arith.mulf %61, %182 : vector<16x128xf32>
      %184 = arith.addf %180, %183 : vector<16x128xf32>
      %c24_115 = arith.constant 24 : index
      %c0_116 = arith.constant 0 : index
      %c0_117 = arith.constant 0 : index
      %185 = vector.load %arg4[%c24_115, %c0_116, %c0_117] : memref<49x16x128xf32, #tpu.memory_space<vmem>>, vector<1x16x128xf32>
      %186 = vector.shape_cast %185 : vector<1x16x128xf32> to vector<16x128xf32>
      %187 = arith.mulf %62, %186 : vector<16x128xf32>
      %188 = arith.addf %184, %187 : vector<16x128xf32>
      %c25 = arith.constant 25 : index
      %c0_118 = arith.constant 0 : index
      %c0_119 = arith.constant 0 : index
      %189 = vector.load %arg4[%c25, %c0_118, %c0_119] : memref<49x16x128xf32, #tpu.memory_space<vmem>>, vector<1x16x128xf32>
      %190 = vector.shape_cast %189 : vector<1x16x128xf32> to vector<16x128xf32>
      %191 = arith.mulf %63, %190 : vector<16x128xf32>
      %192 = arith.addf %188, %191 : vector<16x128xf32>
      %c26 = arith.constant 26 : index
      %c0_120 = arith.constant 0 : index
      %c0_121 = arith.constant 0 : index
      %193 = vector.load %arg4[%c26, %c0_120, %c0_121] : memref<49x16x128xf32, #tpu.memory_space<vmem>>, vector<1x16x128xf32>
      %194 = vector.shape_cast %193 : vector<1x16x128xf32> to vector<16x128xf32>
      %195 = arith.mulf %64, %194 : vector<16x128xf32>
      %196 = arith.addf %192, %195 : vector<16x128xf32>
      %c27 = arith.constant 27 : index
      %c0_122 = arith.constant 0 : index
      %c0_123 = arith.constant 0 : index
      %197 = vector.load %arg4[%c27, %c0_122, %c0_123] : memref<49x16x128xf32, #tpu.memory_space<vmem>>, vector<1x16x128xf32>
      %198 = vector.shape_cast %197 : vector<1x16x128xf32> to vector<16x128xf32>
      %199 = arith.mulf %65, %198 : vector<16x128xf32>
      %200 = arith.addf %196, %199 : vector<16x128xf32>
      %c3_i32 = arith.constant 3 : i32
      %201 = arith.addi %55, %c3_i32 : i32
      %202 = arith.index_cast %201 : i32 to index
      %c0_124 = arith.constant 0 : index
      %c0_125 = arith.constant 0 : index
      %203 = vector.load %arg10[%202, %c0_124, %c0_125] : memref<28x16x128xf32, #tpu.memory_space<vmem>>, vector<1x16x128xf32>
      %204 = vector.shape_cast %203 : vector<1x16x128xf32> to vector<16x128xf32>
      %205 = arith.addf %204, %200 : vector<16x128xf32>
      %206 = arith.index_cast %201 : i32 to index
      %c0_126 = arith.constant 0 : index
      %c0_127 = arith.constant 0 : index
      %207 = vector.load %arg10[%206, %c0_126, %c0_127] : memref<28x16x128xf32, #tpu.memory_space<vmem>>, vector<1x16x128xf32>
      %208 = vector.shape_cast %207 : vector<1x16x128xf32> to vector<16x128xf32>
      %209 = vector.shape_cast %205 : vector<16x128xf32> to vector<1x16x128xf32>
      tpu.vector_store %arg10[%206, %c0_126, %c0_127], %209 {strides = array<i32>} : memref<28x16x128xf32, #tpu.memory_space<vmem>>, vector<1x16x128xf32>,
      %c28 = arith.constant 28 : index
      %c0_128 = arith.constant 0 : index
      %c0_129 = arith.constant 0 : index
      %210 = vector.load %arg4[%c28, %c0_128, %c0_129] : memref<49x16x128xf32, #tpu.memory_space<vmem>>, vector<1x16x128xf32>
      %211 = vector.shape_cast %210 : vector<1x16x128xf32> to vector<16x128xf32>
      %212 = arith.mulf %59, %211 : vector<16x128xf32>
      %c29 = arith.constant 29 : index
      %c0_130 = arith.constant 0 : index
      %c0_131 = arith.constant 0 : index
      %213 = vector.load %arg4[%c29, %c0_130, %c0_131] : memref<49x16x128xf32, #tpu.memory_space<vmem>>, vector<1x16x128xf32>
      %214 = vector.shape_cast %213 : vector<1x16x128xf32> to vector<16x128xf32>
      %215 = arith.mulf %60, %214 : vector<16x128xf32>
      %216 = arith.addf %212, %215 : vector<16x128xf32>
      %c30 = arith.constant 30 : index
      %c0_132 = arith.constant 0 : index
      %c0_133 = arith.constant 0 : index
      %217 = vector.load %arg4[%c30, %c0_132, %c0_133] : memref<49x16x128xf32, #tpu.memory_space<vmem>>, vector<1x16x128xf32>
      %218 = vector.shape_cast %217 : vector<1x16x128xf32> to vector<16x128xf32>
      %219 = arith.mulf %61, %218 : vector<16x128xf32>
      %220 = arith.addf %216, %219 : vector<16x128xf32>
      %c31 = arith.constant 31 : index
      %c0_134 = arith.constant 0 : index
      %c0_135 = arith.constant 0 : index
      %221 = vector.load %arg4[%c31, %c0_134, %c0_135] : memref<49x16x128xf32, #tpu.memory_space<vmem>>, vector<1x16x128xf32>
      %222 = vector.shape_cast %221 : vector<1x16x128xf32> to vector<16x128xf32>
      %223 = arith.mulf %62, %222 : vector<16x128xf32>
      %224 = arith.addf %220, %223 : vector<16x128xf32>
      %c32 = arith.constant 32 : index
      %c0_136 = arith.constant 0 : index
      %c0_137 = arith.constant 0 : index
      %225 = vector.load %arg4[%c32, %c0_136, %c0_137] : memref<49x16x128xf32, #tpu.memory_space<vmem>>, vector<1x16x128xf32>
      %226 = vector.shape_cast %225 : vector<1x16x128xf32> to vector<16x128xf32>
      %227 = arith.mulf %63, %226 : vector<16x128xf32>
      %228 = arith.addf %224, %227 : vector<16x128xf32>
      %c33 = arith.constant 33 : index
      %c0_138 = arith.constant 0 : index
      %c0_139 = arith.constant 0 : index
      %229 = vector.load %arg4[%c33, %c0_138, %c0_139] : memref<49x16x128xf32, #tpu.memory_space<vmem>>, vector<1x16x128xf32>
      %230 = vector.shape_cast %229 : vector<1x16x128xf32> to vector<16x128xf32>
      %231 = arith.mulf %64, %230 : vector<16x128xf32>
      %232 = arith.addf %228, %231 : vector<16x128xf32>
      %c34 = arith.constant 34 : index
      %c0_140 = arith.constant 0 : index
      %c0_141 = arith.constant 0 : index
      %233 = vector.load %arg4[%c34, %c0_140, %c0_141] : memref<49x16x128xf32, #tpu.memory_space<vmem>>, vector<1x16x128xf32>
      %234 = vector.shape_cast %233 : vector<1x16x128xf32> to vector<16x128xf32>
      %235 = arith.mulf %65, %234 : vector<16x128xf32>
      %236 = arith.addf %232, %235 : vector<16x128xf32>
      %c2_i32 = arith.constant 2 : i32
      %237 = arith.addi %55, %c2_i32 : i32
      %238 = arith.index_cast %237 : i32 to index
      %c0_142 = arith.constant 0 : index
      %c0_143 = arith.constant 0 : index
      %239 = vector.load %arg10[%238, %c0_142, %c0_143] : memref<28x16x128xf32, #tpu.memory_space<vmem>>, vector<1x16x128xf32>
      %240 = vector.shape_cast %239 : vector<1x16x128xf32> to vector<16x128xf32>
      %241 = arith.addf %240, %236 : vector<16x128xf32>
      %242 = arith.index_cast %237 : i32 to index
      %c0_144 = arith.constant 0 : index
      %c0_145 = arith.constant 0 : index
      %243 = vector.load %arg10[%242, %c0_144, %c0_145] : memref<28x16x128xf32, #tpu.memory_space<vmem>>, vector<1x16x128xf32>
      %244 = vector.shape_cast %243 : vector<1x16x128xf32> to vector<16x128xf32>
      %245 = vector.shape_cast %241 : vector<16x128xf32> to vector<1x16x128xf32>
      tpu.vector_store %arg10[%242, %c0_144, %c0_145], %245 {strides = array<i32>} : memref<28x16x128xf32, #tpu.memory_space<vmem>>, vector<1x16x128xf32>,
      %c35 = arith.constant 35 : index
      %c0_146 = arith.constant 0 : index
      %c0_147 = arith.constant 0 : index
      %246 = vector.load %arg4[%c35, %c0_146, %c0_147] : memref<49x16x128xf32, #tpu.memory_space<vmem>>, vector<1x16x128xf32>
      %247 = vector.shape_cast %246 : vector<1x16x128xf32> to vector<16x128xf32>
      %248 = arith.mulf %59, %247 : vector<16x128xf32>
      %c36 = arith.constant 36 : index
      %c0_148 = arith.constant 0 : index
      %c0_149 = arith.constant 0 : index
      %249 = vector.load %arg4[%c36, %c0_148, %c0_149] : memref<49x16x128xf32, #tpu.memory_space<vmem>>, vector<1x16x128xf32>
      %250 = vector.shape_cast %249 : vector<1x16x128xf32> to vector<16x128xf32>
      %251 = arith.mulf %60, %250 : vector<16x128xf32>
      %252 = arith.addf %248, %251 : vector<16x128xf32>
      %c37 = arith.constant 37 : index
      %c0_150 = arith.constant 0 : index
      %c0_151 = arith.constant 0 : index
      %253 = vector.load %arg4[%c37, %c0_150, %c0_151] : memref<49x16x128xf32, #tpu.memory_space<vmem>>, vector<1x16x128xf32>
      %254 = vector.shape_cast %253 : vector<1x16x128xf32> to vector<16x128xf32>
      %255 = arith.mulf %61, %254 : vector<16x128xf32>
      %256 = arith.addf %252, %255 : vector<16x128xf32>
      %c38 = arith.constant 38 : index
      %c0_152 = arith.constant 0 : index
      %c0_153 = arith.constant 0 : index
      %257 = vector.load %arg4[%c38, %c0_152, %c0_153] : memref<49x16x128xf32, #tpu.memory_space<vmem>>, vector<1x16x128xf32>
      %258 = vector.shape_cast %257 : vector<1x16x128xf32> to vector<16x128xf32>
      %259 = arith.mulf %62, %258 : vector<16x128xf32>
      %260 = arith.addf %256, %259 : vector<16x128xf32>
      %c39 = arith.constant 39 : index
      %c0_154 = arith.constant 0 : index
      %c0_155 = arith.constant 0 : index
      %261 = vector.load %arg4[%c39, %c0_154, %c0_155] : memref<49x16x128xf32, #tpu.memory_space<vmem>>, vector<1x16x128xf32>
      %262 = vector.shape_cast %261 : vector<1x16x128xf32> to vector<16x128xf32>
      %263 = arith.mulf %63, %262 : vector<16x128xf32>
      %264 = arith.addf %260, %263 : vector<16x128xf32>
      %c40 = arith.constant 40 : index
      %c0_156 = arith.constant 0 : index
      %c0_157 = arith.constant 0 : index
      %265 = vector.load %arg4[%c40, %c0_156, %c0_157] : memref<49x16x128xf32, #tpu.memory_space<vmem>>, vector<1x16x128xf32>
      %266 = vector.shape_cast %265 : vector<1x16x128xf32> to vector<16x128xf32>
      %267 = arith.mulf %64, %266 : vector<16x128xf32>
      %268 = arith.addf %264, %267 : vector<16x128xf32>
      %c41 = arith.constant 41 : index
      %c0_158 = arith.constant 0 : index
      %c0_159 = arith.constant 0 : index
      %269 = vector.load %arg4[%c41, %c0_158, %c0_159] : memref<49x16x128xf32, #tpu.memory_space<vmem>>, vector<1x16x128xf32>
      %270 = vector.shape_cast %269 : vector<1x16x128xf32> to vector<16x128xf32>
      %271 = arith.mulf %65, %270 : vector<16x128xf32>
      %272 = arith.addf %268, %271 : vector<16x128xf32>
      %c1_i32_160 = arith.constant 1 : i32
      %273 = arith.addi %55, %c1_i32_160 : i32
      %274 = arith.index_cast %273 : i32 to index
      %c0_161 = arith.constant 0 : index
      %c0_162 = arith.constant 0 : index
      %275 = vector.load %arg10[%274, %c0_161, %c0_162] : memref<28x16x128xf32, #tpu.memory_space<vmem>>, vector<1x16x128xf32>
      %276 = vector.shape_cast %275 : vector<1x16x128xf32> to vector<16x128xf32>
      %277 = arith.addf %276, %272 : vector<16x128xf32>
      %278 = arith.index_cast %273 : i32 to index
      %c0_163 = arith.constant 0 : index
      %c0_164 = arith.constant 0 : index
      %279 = vector.load %arg10[%278, %c0_163, %c0_164] : memref<28x16x128xf32, #tpu.memory_space<vmem>>, vector<1x16x128xf32>
      %280 = vector.shape_cast %279 : vector<1x16x128xf32> to vector<16x128xf32>
      %281 = vector.shape_cast %277 : vector<16x128xf32> to vector<1x16x128xf32>
      tpu.vector_store %arg10[%278, %c0_163, %c0_164], %281 {strides = array<i32>} : memref<28x16x128xf32, #tpu.memory_space<vmem>>, vector<1x16x128xf32>,
      %c42 = arith.constant 42 : index
      %c0_165 = arith.constant 0 : index
      %c0_166 = arith.constant 0 : index
      %282 = vector.load %arg4[%c42, %c0_165, %c0_166] : memref<49x16x128xf32, #tpu.memory_space<vmem>>, vector<1x16x128xf32>
      %283 = vector.shape_cast %282 : vector<1x16x128xf32> to vector<16x128xf32>
      %284 = arith.mulf %59, %283 : vector<16x128xf32>
      %c43 = arith.constant 43 : index
      %c0_167 = arith.constant 0 : index
      %c0_168 = arith.constant 0 : index
      %285 = vector.load %arg4[%c43, %c0_167, %c0_168] : memref<49x16x128xf32, #tpu.memory_space<vmem>>, vector<1x16x128xf32>
      %286 = vector.shape_cast %285 : vector<1x16x128xf32> to vector<16x128xf32>
      %287 = arith.mulf %60, %286 : vector<16x128xf32>
      %288 = arith.addf %284, %287 : vector<16x128xf32>
      %c44 = arith.constant 44 : index
      %c0_169 = arith.constant 0 : index
      %c0_170 = arith.constant 0 : index
      %289 = vector.load %arg4[%c44, %c0_169, %c0_170] : memref<49x16x128xf32, #tpu.memory_space<vmem>>, vector<1x16x128xf32>
      %290 = vector.shape_cast %289 : vector<1x16x128xf32> to vector<16x128xf32>
      %291 = arith.mulf %61, %290 : vector<16x128xf32>
      %292 = arith.addf %288, %291 : vector<16x128xf32>
      %c45 = arith.constant 45 : index
      %c0_171 = arith.constant 0 : index
      %c0_172 = arith.constant 0 : index
      %293 = vector.load %arg4[%c45, %c0_171, %c0_172] : memref<49x16x128xf32, #tpu.memory_space<vmem>>, vector<1x16x128xf32>
      %294 = vector.shape_cast %293 : vector<1x16x128xf32> to vector<16x128xf32>
      %295 = arith.mulf %62, %294 : vector<16x128xf32>
      %296 = arith.addf %292, %295 : vector<16x128xf32>
      %c46 = arith.constant 46 : index
      %c0_173 = arith.constant 0 : index
      %c0_174 = arith.constant 0 : index
      %297 = vector.load %arg4[%c46, %c0_173, %c0_174] : memref<49x16x128xf32, #tpu.memory_space<vmem>>, vector<1x16x128xf32>
      %298 = vector.shape_cast %297 : vector<1x16x128xf32> to vector<16x128xf32>
      %299 = arith.mulf %63, %298 : vector<16x128xf32>
      %300 = arith.addf %296, %299 : vector<16x128xf32>
      %c47 = arith.constant 47 : index
      %c0_175 = arith.constant 0 : index
      %c0_176 = arith.constant 0 : index
      %301 = vector.load %arg4[%c47, %c0_175, %c0_176] : memref<49x16x128xf32, #tpu.memory_space<vmem>>, vector<1x16x128xf32>
      %302 = vector.shape_cast %301 : vector<1x16x128xf32> to vector<16x128xf32>
      %303 = arith.mulf %64, %302 : vector<16x128xf32>
      %304 = arith.addf %300, %303 : vector<16x128xf32>
      %c48 = arith.constant 48 : index
      %c0_177 = arith.constant 0 : index
      %c0_178 = arith.constant 0 : index
      %305 = vector.load %arg4[%c48, %c0_177, %c0_178] : memref<49x16x128xf32, #tpu.memory_space<vmem>>, vector<1x16x128xf32>
      %306 = vector.shape_cast %305 : vector<1x16x128xf32> to vector<16x128xf32>
      %307 = arith.mulf %65, %306 : vector<16x128xf32>
      %308 = arith.addf %304, %307 : vector<16x128xf32>
      %c0_i32_179 = arith.constant 0 : i32
      %309 = arith.addi %55, %c0_i32_179 : i32
      %310 = arith.index_cast %309 : i32 to index
      %c0_180 = arith.constant 0 : index
      %c0_181 = arith.constant 0 : index
      %311 = vector.load %arg10[%310, %c0_180, %c0_181] : memref<28x16x128xf32, #tpu.memory_space<vmem>>, vector<1x16x128xf32>
      %312 = vector.shape_cast %311 : vector<1x16x128xf32> to vector<16x128xf32>
      %313 = arith.addf %312, %308 : vector<16x128xf32>
      %314 = arith.index_cast %309 : i32 to index
      %c0_182 = arith.constant 0 : index
      %c0_183 = arith.constant 0 : index
      %315 = vector.load %arg10[%314, %c0_182, %c0_183] : memref<28x16x128xf32, #tpu.memory_space<vmem>>, vector<1x16x128xf32>
      %316 = vector.shape_cast %315 : vector<1x16x128xf32> to vector<16x128xf32>
      %317 = vector.shape_cast %313 : vector<16x128xf32> to vector<1x16x128xf32>
      tpu.vector_store %arg10[%314, %c0_182, %c0_183], %317 {strides = array<i32>} : memref<28x16x128xf32, #tpu.memory_space<vmem>>, vector<1x16x128xf32>,
    }
    %c22_i32_25 = arith.constant 22 : i32
    %c0_26 = arith.constant 0 : index
    %c0_27 = arith.constant 0 : index
    %24 = vector.load %arg5[%c0_26, %c0_27] : memref<1x128xf32, #tpu.memory_space<vmem>>, vector<1x128xf32>
    %25 = vector.shape_cast %24 : vector<1x128xf32> to vector<128xf32>
    %c0_28 = arith.constant 0 : index
    %c0_29 = arith.constant 0 : index
    %26 = vector.load %arg6[%c0_28, %c0_29] : memref<128x128xbf16, #tpu.memory_space<vmem>>, vector<128x128xbf16>
    %c0_30 = arith.constant 0 : index
    %c0_31 = arith.constant 0 : index
    %27 = vector.load %arg7[%c0_30, %c0_31] : memref<1x128xf32, #tpu.memory_space<vmem>>, vector<1x128xf32>
    %c0_i32_32 = arith.constant 0 : i32
    %c1_i32_33 = arith.constant 1 : i32
    %28 = arith.muli %c0_i32_32, %c1_i32_33 : i32
    %c0_i32_34 = arith.constant 0 : i32
    %29 = arith.addi %c0_i32_34, %28 : i32
    %c16_i32 = arith.constant 16 : i32
    %30 = arith.muli %29, %c16_i32 : i32
    %31 = tpu.assume_multiple %30, 16 : i32
    %c6_i32 = arith.constant 6 : i32
    %32 = arith.addi %c6_i32, %31 : i32
    %33 = arith.index_cast %32 : i32 to index
    %c0_35 = arith.constant 0 : index
    %c0_36 = arith.constant 0 : index
    %34 = vector.load %arg10[%33, %c0_35, %c0_36] : memref<28x16x128xf32, #tpu.memory_space<vmem>>, vector<16x16x128xf32>
    %35 = vector.shape_cast %25 : vector<128xf32> to vector<1x1x128xf32>
    %36 = vector.broadcast %35 : vector<1x1x128xf32> to vector<16x16x128xf32>
    %37 = arith.addf %34, %36 : vector<16x16x128xf32>
    %cst_37 = arith.constant 0.000000e+00 : f32
    %38 = vector.broadcast %cst_37 : f32 to vector<16x16x128xf32>
    %39 = arith.maximumf %37, %38 : vector<16x16x128xf32>
    %40 = vector.shape_cast %39 : vector<16x16x128xf32> to vector<256x128xf32>
    %41 = arith.truncf %40 : vector<256x128xf32> to vector<256x128xbf16>
    %cst_38 = arith.constant dense<0.000000e+00> : vector<256x128xf32>
    %42 = tpu.matmul %41, %26, %cst_38 {dimension_numbers = #tpu.dot_dimension_numbers<[1], [0], [0], [1], [0, 0, 1, 1], [], []>} : vector<256x128xbf16>, vector<128x128xbf16>, vector<256x128xf32> -> vector<256x128xf32>
    %43 = vector.broadcast %27 : vector<1x128xf32> to vector<256x128xf32>
    %44 = arith.addf %42, %43 : vector<256x128xf32>
    %c0_39 = arith.constant 0 : index
    %45 = arith.index_cast %31 : i32 to index
    %c0_40 = arith.constant 0 : index
    %c0_41 = arith.constant 0 : index
    %46 = vector.load %arg1[%c0_39, %45, %c0_40, %c0_41] : memref<1x16x16x128xf32, #tpu.memory_space<vmem>>, vector<1x16x16x128xf32>
    %47 = vector.shape_cast %46 : vector<1x16x16x128xf32> to vector<16x16x128xf32>
    %48 = vector.shape_cast %44 : vector<256x128xf32> to vector<16x16x128xf32>
    %49 = arith.addf %47, %48 : vector<16x16x128xf32>
    %c0_42 = arith.constant 0 : index
    %50 = arith.index_cast %31 : i32 to index
    %c0_43 = arith.constant 0 : index
    %c0_44 = arith.constant 0 : index
    %51 = vector.load %arg8[%c0_42, %50, %c0_43, %c0_44] : memref<1x16x16x128xf32, #tpu.memory_space<vmem>>, vector<1x16x16x128xf32>
    %52 = vector.shape_cast %51 : vector<1x16x16x128xf32> to vector<16x16x128xf32>
    %53 = vector.shape_cast %49 : vector<16x16x128xf32> to vector<1x16x16x128xf32>
    tpu.vector_store %arg8[%c0_42, %50, %c0_43, %c0_44], %53 {strides = array<i32>} : memref<1x16x16x128xf32, #tpu.memory_space<vmem>>, vector<1x16x16x128xf32>,
    %c1_i32_45 = arith.constant 1 : i32
    return
  }
  func.func @transform_0(%arg0: i32) -> (i32, i32, i32, i32) {
    %c0_i32 = arith.constant 0 : i32
    %c0_i32_0 = arith.constant 0 : i32
    %c0_i32_1 = arith.constant 0 : i32
    %c0_i32_2 = arith.constant 0 : i32
    return %arg0, %c0_i32, %c0_i32_0, %c0_i32_1 : i32, i32, i32, i32
  }
  func.func @transform_1(%arg0: i32) -> (i32, i32) {
    %c0_i32 = arith.constant 0 : i32
    %c0_i32_0 = arith.constant 0 : i32
    %c0_i32_1 = arith.constant 0 : i32
    return %c0_i32, %c0_i32_0 : i32, i32
  }
  func.func @transform_2(%arg0: i32) -> (i32, i32) {
    %c0_i32 = arith.constant 0 : i32
    %c0_i32_0 = arith.constant 0 : i32
    %c0_i32_1 = arith.constant 0 : i32
    return %c0_i32, %c0_i32_0 : i32, i32
  }
  func.func @transform_3(%arg0: i32) -> (i32, i32, i32) {
    %c0_i32 = arith.constant 0 : i32
    %c0_i32_0 = arith.constant 0 : i32
    %c0_i32_1 = arith.constant 0 : i32
    %c0_i32_2 = arith.constant 0 : i32
    return %c0_i32, %c0_i32_0, %c0_i32_1 : i32, i32, i32
  }
  func.func @transform_4(%arg0: i32) -> (i32, i32) {
    %c0_i32 = arith.constant 0 : i32
    %c0_i32_0 = arith.constant 0 : i32
    %c0_i32_1 = arith.constant 0 : i32
    return %c0_i32, %c0_i32_0 : i32, i32
  }
  func.func @transform_5(%arg0: i32) -> (i32, i32) {
    %c0_i32 = arith.constant 0 : i32
    %c0_i32_0 = arith.constant 0 : i32
    %c0_i32_1 = arith.constant 0 : i32
    return %c0_i32, %c0_i32_0 : i32, i32
  }
  func.func @transform_6(%arg0: i32) -> (i32, i32) {
    %c0_i32 = arith.constant 0 : i32
    %c0_i32_0 = arith.constant 0 : i32
    %c0_i32_1 = arith.constant 0 : i32
    return %c0_i32, %c0_i32_0 : i32, i32
  }
  func.func @transform_7(%arg0: i32) -> (i32, i32, i32, i32) {
    %c0_i32 = arith.constant 0 : i32
    %c0_i32_0 = arith.constant 0 : i32
    %c0_i32_1 = arith.constant 0 : i32
    %c0_i32_2 = arith.constant 0 : i32
    return %arg0, %c0_i32, %c0_i32_0, %c0_i32_1 : i32, i32, i32, i32
  }
}

</mosaic_0001>

<bundles_post_ra>
// kernel: resblock_pallas_nhwc.2
= control target key start
LH: loop header
LB: loop body
LE: loop exit
PB: predicated region body
PF: predicated region fallthrough
CT: control target
= control target key end

     0   :  { %s402_s9 = smov 0   ;;  %s461_s0 = inlined_call_operand.vmem [shape: f32[2,16,16,128], index: 0, kind: input, shape index: {}]   ;;  %s462_s1 = inlined_call_operand.vmem [shape: f32[2,1,128], index: 1, kind: output, shape index: {0}]   ;;  %s463_s2 = inlined_call_operand.vmem [shape: f32[2,1,128], index: 2, kind: output, shape index: {1}]  }
   0x1 LB: > { %s361_s10 = sadd.s32 4294967295, %s385_s9   ;;  %p365_p0 = scmp.ge.s32.totalorder %s385_s9, 1  ;;  %s385_s9 = sphi %s402_s9, %s13_s9  }
   0x2   : > { %p115_p1 = scmp.lt.s32.totalorder %s385_s9, 3 }
   0x4   : > { %p116_p2 = pnand %p365_p0, %p115_p1 }
   0x5   : > { %p138_p3 = scmp.lt.s32.totalorder (!%p116_p2), %s361_s10, 1 }
   0x6   : > { %119 = sbr.rel (%p116_p2) target bundleno = 92 (0x5c), region = 24 }
   0xb   : > { %s465_s10 = smov (!%p138_p3, %s361_s10), 1 }
   0xc   : > { %s370_s11 = sshll.u32 %s465_s10, 8  ;;  %s145_s17 = scalar_lea.vmem %s462_s1, %s465_s10 }
   0xd   : > { %s416_s14 = scalar_lea.vmem %s461_s0, %s370_s11  ;;  %s148_s20 = scalar_lea.vmem %s463_s2, %s465_s10 }
   0xe   : > { %v149_v0 = vld [vmem:[%s416_s14] sm:$0xff]  ;;  %v150_v1 = vld [vmem:[%s416_s14 + $0x8] sm:$0xff]  ;;  %v151_v2 = vld [vmem:[%s416_s14 + $0x10] sm:$0xff] }
   0xf   : > { %v152_v3 = vld [vmem:[%s416_s14 + $0x18] sm:$0xff]  ;;  %v181_v4 = vadd.f32 %v150_v1, %v149_v0  ;;  %v219_v5 = vmul.f32 %v149_v0, %v149_v0  ;;  %v220_v6 = vmul.f32 %v150_v1, %v150_v1  ;;  %v221_v7 = vmul.f32 %v151_v2, %v151_v2  ;;  %v153_v8 = vld [vmem:[%s416_s14 + $0x20] sm:$0xff]  ;;  %v154_v12 = vld [vmem:[%s416_s14 + $0x28] sm:$0xff] }
  0x10   : > { %v222_v10 = vmul.f32 %v152_v3, %v152_v3  ;;  %v223_v14 = vmul.f32 %v153_v8, %v153_v8  ;;  %v155_v16 = vld [vmem:[%s416_s14 + $0x30] sm:$0xff]  ;;  %v224_v18 = vmul.f32 %v154_v12, %v154_v12  ;;  %v156_v20 = vld [vmem:[%s416_s14 + $0x38] sm:$0xff]  ;;  %v157_v24 = vld [vmem:[%s416_s14 + $0x40] sm:$0xff] }
  0x11   : > { %v182_v9 = vadd.f32 %v181_v4, %v151_v2  ;;  %v251_v11 = vadd.f32 %v220_v6, %v219_v5  ;;  %v225_v22 = vmul.f32 %v155_v16, %v155_v16  ;;  %v226_v26 = vmul.f32 %v156_v20, %v156_v20  ;;  %v158_v28 = vld [vmem:[%s416_s14 + $0x48] sm:$0xff]  ;;  %v159_v32 = vld [vmem:[%s416_s14 + $0x50] sm:$0xff]  ;;  %v160_v36 = vld [vmem:[%s416_s14 + $0x58] sm:$0xff] }
  0x12   : > { %v227_v30 = vmul.f32 %v157_v24, %v157_v24  ;;  %v228_v34 = vmul.f32 %v158_v28, %v158_v28  ;;  %v229_v38 = vmul.f32 %v159_v32, %v159_v32  ;;  %v161_v40 = vld [vmem:[%s416_s14 + $0x60] sm:$0xff]  ;;  %v230_v42 = vmul.f32 %v160_v36, %v160_v36  ;;  %v162_v44 = vld [vmem:[%s416_s14 + $0x68] sm:$0xff]  ;;  %v163_v48 = vld [vmem:[%s416_s14 + $0x70] sm:$0xff] }
  0x13   : > { %v183_v13 = vadd.f32 %v182_v9, %v152_v3  ;;  %v252_v15 = vadd.f32 %v251_v11, %v221_v7  ;;  %v231_v46 = vmul.f32 %v161_v40, %v161_v40  ;;  %v232_v50 = vmul.f32 %v162_v44, %v162_v44  ;;  %v164_v52 = vld [vmem:[%s416_s14 + $0x78] sm:$0xff]  ;;  %v165_v56 = vld [vmem:[%s416_s14 + $0x80] sm:$0xff]  ;;  %v166_v60 = vld [vmem:[%s416_s14 + $0x88] sm:$0xff] }
  0x14   : > { %v233_v54 = vmul.f32 %v163_v48, %v163_v48  ;;  %v234_v58 = vmul.f32 %v164_v52, %v164_v52  ;;  %v235_v62 = vmul.f32 %v165_v56, %v165_v56  ;;  %v167_v0 = vld [vmem:[%s416_s14 + $0x90] sm:$0xff]  ;;  %v236_v2 = vmul.f32 %v166_v60, %v166_v60  ;;  %v168_v4 = vld [vmem:[%s416_s14 + $0x98] sm:$0xff] }
  0x15   : > { %v184_v17 = vadd.f32 %v183_v13, %v153_v8  ;;  %v253_v19 = vadd.f32 %v252_v15, %v222_v10  ;;  %v237_v6 = vmul.f32 %v167_v0, %v167_v0  ;;  %v169_v8 = vld [vmem:[%s416_s14 + $0xa0] sm:$0xff]  ;;  %v238_v10 = vmul.f32 %v168_v4, %v168_v4 }
  0x17   : > { %v185_v21 = vadd.f32 %v184_v17, %v154_v12  ;;  %v254_v23 = vadd.f32 %v253_v19, %v223_v14  ;;  %v170_v12 = vld [vmem:[%s416_s14 + $0xa8] sm:$0xff]  ;;  %v239_v14 = vmul.f32 %v169_v8, %v169_v8 }
  0x19   : > { %v186_v25 = vadd.f32 %v185_v21, %v155_v16  ;;  %v255_v27 = vadd.f32 %v254_v23, %v224_v18  ;;  %v171_v16 = vld [vmem:[%s416_s14 + $0xb0] sm:$0xff]  ;;  %v240_v18 = vmul.f32 %v170_v12, %v170_v12 }
  0x1b   : > { %v187_v29 = vadd.f32 %v186_v25, %v156_v20  ;;  %v256_v31 = vadd.f32 %v255_v27, %v225_v22  ;;  %v172_v20 = vld [vmem:[%s416_s14 + $0xb8] sm:$0xff]  ;;  %v241_v22 = vmul.f32 %v171_v16, %v171_v16 }
  0x1d   : > { %v188_v33 = vadd.f32 %v187_v29, %v157_v24  ;;  %v257_v35 = vadd.f32 %v256_v31, %v226_v26  ;;  %v173_v24 = vld [vmem:[%s416_s14 + $0xc0] sm:$0xff]  ;;  %v242_v26 = vmul.f32 %v172_v20, %v172_v20 }
  0x1f   : > { %v189_v37 = vadd.f32 %v188_v33, %v158_v28  ;;  %v258_v39 = vadd.f32 %v257_v35, %v227_v30  ;;  %v174_v28 = vld [vmem:[%s416_s14 + $0xc8] sm:$0xff]  ;;  %v243_v30 = vmul.f32 %v173_v24, %v173_v24 }
  0x21   : > { %v190_v41 = vadd.f32 %v189_v37, %v159_v32  ;;  %v259_v43 = vadd.f32 %v258_v39, %v228_v34  ;;  %v175_v32 = vld [vmem:[%s416_s14 + $0xd0] sm:$0xff]  ;;  %v244_v34 = vmul.f32 %v174_v28, %v174_v28 }
  0x23   : > { %v191_v45 = vadd.f32 %v190_v41, %v160_v36  ;;  %v260_v47 = vadd.f32 %v259_v43, %v229_v38  ;;  %v176_v36 = vld [vmem:[%s416_s14 + $0xd8] sm:$0xff]  ;;  %v245_v38 = vmul.f32 %v175_v32, %v175_v32 }
  0x25   : > { %v192_v49 = vadd.f32 %v191_v45, %v161_v40  ;;  %v261_v51 = vadd.f32 %v260_v47, %v230_v42  ;;  %v177_v40 = vld [vmem:[%s416_s14 + $0xe0] sm:$0xff]  ;;  %v246_v42 = vmul.f32 %v176_v36, %v176_v36 }
  0x27   : > { %v193_v53 = vadd.f32 %v192_v49, %v162_v44  ;;  %v262_v55 = vadd.f32 %v261_v51, %v231_v46  ;;  %v178_v44 = vld [vmem:[%s416_s14 + $0xe8] sm:$0xff]  ;;  %v247_v46 = vmul.f32 %v177_v40, %v177_v40 }
  0x29   : > { %v194_v57 = vadd.f32 %v193_v53, %v163_v48  ;;  %v263_v59 = vadd.f32 %v262_v55, %v232_v50  ;;  %v179_v48 = vld [vmem:[%s416_s14 + $0xf0] sm:$0xff]  ;;  %v248_v50 = vmul.f32 %v178_v44, %v178_v44 }
  0x2b   : > { %v195_v61 = vadd.f32 %v194_v57, %v164_v52  ;;  %v264_v63 = vadd.f32 %v263_v59, %v233_v54  ;;  %v180_v52 = vld [vmem:[%s416_s14 + $0xf8] sm:$0xff]  ;;  %v249_v54 = vmul.f32 %v179_v48, %v179_v48 }
  0x2c   : > { %v250_v57 = vmul.f32 %v180_v52, %v180_v52 }
  0x2d   : > { %v196_v1 = vadd.f32 %v195_v61, %v165_v56  ;;  %v265_v3 = vadd.f32 %v264_v63, %v234_v58 }
  0x2f   : > { %v197_v5 = vadd.f32 %v196_v1, %v166_v60  ;;  %v266_v7 = vadd.f32 %v265_v3, %v235_v62 }
  0x31   : > { %v198_v9 = vadd.f32 %v197_v5, %v167_v0  ;;  %v267_v11 = vadd.f32 %v266_v7, %v236_v2 }
  0x33   : > { %v199_v13 = vadd.f32 %v198_v9, %v168_v4  ;;  %v268_v15 = vadd.f32 %v267_v11, %v237_v6 }
  0x35   : > { %v200_v17 = vadd.f32 %v199_v13, %v169_v8  ;;  %v269_v19 = vadd.f32 %v268_v15, %v238_v10 }
  0x37   : > { %v201_v21 = vadd.f32 %v200_v17, %v170_v12  ;;  %v270_v23 = vadd.f32 %v269_v19, %v239_v14 }
  0x39   : > { %v202_v25 = vadd.f32 %v201_v21, %v171_v16  ;;  %v271_v27 = vadd.f32 %v270_v23, %v240_v18 }
  0x3b   : > { %v203_v29 = vadd.f32 %v202_v25, %v172_v20  ;;  %v272_v31 = vadd.f32 %v271_v27, %v241_v22 }
  0x3d   : > { %v204_v33 = vadd.f32 %v203_v29, %v173_v24  ;;  %v273_v35 = vadd.f32 %v272_v31, %v242_v26 }
  0x3f   : > { %v205_v37 = vadd.f32 %v204_v33, %v174_v28  ;;  %v274_v39 = vadd.f32 %v273_v35, %v243_v30 }
  0x41   : > { %v206_v41 = vadd.f32 %v205_v37, %v175_v32  ;;  %v275_v43 = vadd.f32 %v274_v39, %v244_v34 }
  0x43   : > { %v207_v45 = vadd.f32 %v206_v41, %v176_v36  ;;  %v276_v47 = vadd.f32 %v275_v43, %v245_v38 }
  0x45   : > { %v208_v49 = vadd.f32 %v207_v45, %v177_v40  ;;  %v277_v51 = vadd.f32 %v276_v47, %v246_v42 }
  0x47   : > { %v209_v53 = vadd.f32 %v208_v49, %v178_v44  ;;  %v278_v55 = vadd.f32 %v277_v51, %v247_v46 }
  0x49   : > { %v210_v56 = vadd.f32 %v209_v53, %v179_v48  ;;  %v279_v58 = vadd.f32 %v278_v55, %v248_v50 }
  0x4b   : > { %v211_v59 = vadd.f32 %v210_v56, %v180_v52  ;;  %v280_v60 = vadd.f32 %v279_v58, %v249_v54 }
  0x4d   : > { %v212_v61 = vrot.slane %v211_v59, 4  ;;  %v281_v62 = vadd.f32 %v280_v60, %v250_v57 }
  0x4f   : > { %v213_v63 = vadd.f32 %v212_v61, %v211_v59  ;;  %v282_v0 = vrot.slane %v281_v62, 4 }
  0x51   : > { %v214_v1 = vrot.slane %v213_v63, 2  ;;  %v283_v2 = vadd.f32 %v282_v0, %v281_v62 }
  0x53   : > { %v215_v3 = vadd.f32 %v214_v1, %v213_v63  ;;  %v284_v4 = vrot.slane %v283_v2, 2 }
  0x55   : > { %v216_v5 = vrot.slane %v215_v3, 1  ;;  %v285_v6 = vadd.f32 %v284_v4, %v283_v2 }
  0x57   : > { %v217_v7 = vadd.f32 %v216_v5, %v215_v3  ;;  %v286_v8 = vrot.slane %v285_v6, 1 }
  0x59   : > { %218 = vst [vmem:[%s145_s17] sm:$0x1] %v217_v7  ;;  %v287_v9 = vadd.f32 %v286_v8, %v285_v6 }
  0x5b   : > { %288 = vst [vmem:[%s148_s20] sm:$0x1] %v287_v9 }
  0x5c PF: > { %s13_s9 = sadd.s32 1, %s385_s9  }
  0x5d   : > { %p10_p4 = scmp.ge.s32.totalorder %s13_s9, 4  }
  0x5f   :  { %12 = sbr.rel (!%p10_p4) target bundleno = 1 (0x1), region = 66 }

// kernel: resblock_pallas_nhwc.3
= control target key start
LH: loop header
LB: loop body
LE: loop exit
PB: predicated region body
PF: predicated region fallthrough
CT: control target
= control target key end

     0   :  { %12 = vsyncpa [#allocation5], 0  ;;  %s4065_s0 = inlined_call_operand.hbm [shape: f32[2,16,16,128], index: 0, kind: input, shape index: {}, may-alias: {0,7}]   ;;  %s4066_s1 = inlined_call_operand.vmem [shape: f32[1,128], index: 1, kind: input, shape index: {}]   ;;  %s4067_s2 = inlined_call_operand.vmem [shape: f32[1,128], index: 2, kind: input, shape index: {}]   ;;  %s4068_s3 = inlined_call_operand.vmem [shape: f32[49,16,128], index: 3, kind: input, shape index: {}]   ;;  %s4069_s4 = inlined_call_operand.vmem [shape: f32[1,128], index: 4, kind: input, shape index: {}]   ;;  %s4070_s5 = inlined_call_operand.vmem [shape: bf16[128,128], index: 5, kind: input, shape index: {}]   ;;  %s4071_s6 = inlined_call_operand.vmem [shape: f32[1,128], index: 6, kind: input, shape index: {}]   ;;  %s4072_s7 = inlined_call_operand.hbm [shape: f32[2,16,16,128], index: 7, kind: output, shape index: {}, may-alias: {0,7}]  }
   0x1   :  { %14 = vsyncpa [#allocation5 + $0x1], 0 }
   0x2   :  { %15 = vsyncpa [#allocation6], 0 }
   0x3   :  { %17 = vsyncpa [#allocation6 + $0x1], 0  ;;  %s2807_s24 = smov 0   ;;  %s2809_s25 = smov 0  }
   0x4   :  { %s2811_s26 = smov 0   ;;  %s2813_s27 = smov 0  }
   0x5 LB: > { %s2828_s28 = sadd.s32 4294967295, %s2756_s27   ;;  %s2381_s29 = sadd.s32 4294967294, %s2756_s27   ;;  %s2756_s27 = sphi %s2813_s27, %s4084_s27   ;;  %s2752_s26 = sphi %s2811_s26, %s4083_s26   ;;  %s2748_s25 = sphi %s2809_s25, %s4082_s25   ;;  %s2744_s24 = sphi %s2807_s24, %s4081_s24  }
   0x6   : > { %s2832_s30 = sadd.s32 1, %s2756_s27   ;;  %s30_s8 = sadd.s32 1, %s2752_s26 }
   0x7   : > { %s27_s9 = ssub.s32 %s2756_s27, %s2832_s30  ;;  %p37_p0 = scmp.ne.s32.totalorder %s2752_s26, %s2748_s25 }
   0x8   : > { %p28_p1 = scmp.eq.s32.totalorder %s27_s9, 0  ;;  %p38_p2 = scmp.eq.s32.totalorder %s2756_s27, 0 }
   0x9   : > { %p43_p3 = scmp.ne.s32.totalorder %s2748_s25, %s2744_s24  ;;  %p44_p4 = scmp.eq.s32.totalorder %s2828_s28, 0 }
   0xa   : > { %s2844_s10 = scalar_select %p28_p1, %s2752_s26, %s30_s8  }
   0xb   : > { %p2846_p5 = por %p38_p2, %p37_p0  ;;  %p2850_p6 = por %p44_p4, %p43_p3 }
   0xc   : > { %4073 = sst [smem:[#allocation10_spill]] %s2844_s10  ;;  %p193_p7 = scmp.eq.s32.totalorder %s2828_s28, 1 }
   0xd   : > { %p199_p8 = scmp.eq.s32.totalorder %s2381_s29, 1  ;;  %p2601_p10 = scmp.lt.s32.totalorder %s2756_s27, 2 }
   0xe   : > { %p2857_p11 = por %p193_p7, %p37_p0  ;;  %s237_s15 = sand.u32 1, %s2752_s26  }
   0xf   : > { %p2861_p12 = por %p199_p8, %p43_p3  ;;  %s2555_s16 = sshll.u32 %s2756_s27, 8 }
  0x10   : > { %s2384_s17 = sshll.u32 %s237_s15, 8  ;;  %s246_s20 = scalar_lea.hbm %s4065_s0, %s2555_s16 }
  0x11   : > { %s247_s21 = sshll.u32 %s246_s20, 4  ;;  %s241_s22 = scalar_lea.vmem [#allocation4], %s2384_s17  ;;  %s248_s21 = int_to_ptr.hbm [resolvable:$true] %s247_s21 }
  0x12   : > { %s249_s23 = sshll.u32 %s241_s22, 4  ;;  %p2872_p13 = pnand %p2601_p10, %p2846_p5  ;;  %s250_s23 = int_to_ptr.vmem [resolvable:$true] %s249_s23 }
  0x13   : > { %p2387_p0 = scmp.ge.s32.totalorder %s2756_s27, 1  ;;  %p257_p1 = scmp.lt.s32.totalorder %s2756_s27, 3 }
  0x14   : > { %s238_s8 = scalar_lea.sflag [#allocation5], %s237_s15  ;;  %s2656_s9 = sshra.s32 %s248_s21, 4  ;;  %s2657_s9 = int_to_ptr.hbm [resolvable:$true] %s2656_s9 }
  0x15   : > { %s2658_s10 = scalar_lea.hbm %s2657_s9, 256  ;;  %p2660_p3 = pneg %p2872_p13 }
  0x16   : > { %p2659_p2 = scmp.ne.s32.totalorder %s2657_s9, %s2658_s10  ;;  %s2663_s11 = scalar_lea.hbm %s4065_s0, 512 }
  0x17   : > { %p2664_p5 = scmp.lt.s32.totalorder %s2657_s9, %s4065_s0  ;;  %p2665_p8 = scmp.lt.s32.totalorder %s2663_s11, %s2658_s10 }
  0x18   : > { %p2661_p4 = pnand %p2660_p3, %p2659_p2 }
  0x19   : > { %p2666_p10 = por %p2665_p8, %p2664_p5 }
  0x1a   : > { %p2662_p7 = pneg %p2661_p4 }
  0x1c   : > { %p2667_p9 = pnand %p2666_p10, %p2662_p7 }
  0x1e   : > { %2670 = shalt.err (!%p2667_p9)
}
  0x1f   : > { %s2762_s15 = smov 128   ;;  %s2763_s20 = smov 8  }
  0x20   : > { %2596 = dma.hbm_to_vmem [thread:$0]  (!%p2872_p13), %s248_s21, 4096, %s250_s23, %s238_s8, %s2762_s15, %s2762_s15, %s2763_s20  }
  0x21   : > { %p258_p2 = pnand %p2387_p0, %p257_p1 }
  0x22   : > { %s2893_s22 = sand.u32 (!%p258_p2), 1, %s2748_s25  }
  0x23   : > { %261 = sbr.rel (%p258_p2) target bundleno = 570 (0x23a), region = 48  ;;  %s2388_s10 = sshll.u32 (!%p258_p2), %s2893_s22, 8 }
  0x24   : > { %s264_s9 = scalar_lea.sflag (!%p258_p2), [#allocation5], %s2893_s22  ;;  %s2899_s16 = scalar_lea.vmem (!%p258_p2), [#allocation4], %s2388_s10 }
  0x28   : > { %2735 = dma.done.wait (%p2850_p6), %s264_s9, 4096  }
  0x29   : > { %2737 = vsyncadd (%p2850_p6), %s264_s9, 4294963200  ;;  %v2764_v0 = vmov 0.0   ;;  %v3009_v1 = vld [vmem:[%s4066_s1] ss:$0 sm:$0xff]  ;;  %v300_v3 = vld [vmem:[%s2899_s16 + $0x8] sm:$0xff]  ;;  %s3125_s8 = scalar_lea.vmem [#allocation7], %s2388_s10 }
  0x2a   : > { %403 = vst [vmem:[#allocation2] sm:$0xff] %v2764_v0  ;;  %v299_v2 = vld [vmem:[%s2899_s16] sm:$0xff]  ;;  %v301_v4 = vld [vmem:[%s2899_s16 + $0x10] sm:$0xff]  ;;  %v302_v7 = vld [vmem:[%s2899_s16 + $0x18] sm:$0xff]  ;;  %v336_v8 = vmul.f32 %v3009_v1, %v300_v3  ;;  %s3127_s17 = smov 0  }
  0x2b   : > { %404 = vst [vmem:[#allocation2 + $0x8] sm:$0xff] %v2764_v0  ;;  %v335_v5 = vmul.f32 %v3009_v1, %v299_v2  ;;  %v3022_v6 = vld [vmem:[%s4067_s2] ss:$0 sm:$0xff]  ;;  %v337_v10 = vmul.f32 %v3009_v1, %v301_v4  ;;  %v304_v11 = vld [vmem:[%s2899_s16 + $0x28] sm:$0xff]  ;;  %v338_v12 = vmul.f32 %v3009_v1, %v302_v7  ;;  %v305_v13 = vld [vmem:[%s2899_s16 + $0x30] sm:$0xff] }
  0x2c   : > { %405 = vst [vmem:[#allocation2 + $0x10] sm:$0xff] %v2764_v0  ;;  %v303_v9 = vld [vmem:[%s2899_s16 + $0x20] sm:$0xff]  ;;  %v306_v16 = vld [vmem:[%s2899_s16 + $0x38] sm:$0xff]  ;;  %v372_v17 = vadd.f32 %v3022_v6, %v336_v8  ;;  %v340_v18 = vmul.f32 %v3009_v1, %v304_v11  ;;  %v341_v21 = vmul.f32 %v3009_v1, %v305_v13  ;;  %v308_v22 = vld [vmem:[%s2899_s16 + $0x48] sm:$0xff] }
  0x2d   : > { %406 = vst [vmem:[#allocation2 + $0x18] sm:$0x7] %v2764_v0  ;;  %v371_v14 = vadd.f32 %v3022_v6, %v335_v5  ;;  %v339_v15 = vmul.f32 %v3009_v1, %v303_v9  ;;  %v307_v19 = vld [vmem:[%s2899_s16 + $0x40] sm:$0xff]  ;;  %v373_v20 = vadd.f32 %v3022_v6, %v337_v10  ;;  %v374_v23 = vadd.f32 %v3022_v6, %v338_v12  ;;  %v309_v25 = vld [vmem:[%s2899_s16 + $0x50] sm:$0xff]  ;;  %v310_v28 = vld [vmem:[%s2899_s16 + $0x58] sm:$0xff] }
  0x2e   : > { %407 = vst [vmem:[#allocation2 + $0x20] sm:$0xff] %v2764_v0  ;;  %v342_v24 = vmul.f32 %v3009_v1, %v306_v16  ;;  %v343_v27 = vmul.f32 %v3009_v1, %v307_v19  ;;  %v376_v29 = vadd.f32 %v3022_v6, %v340_v18  ;;  %v344_v30 = vmul.f32 %v3009_v1, %v308_v22  ;;  %v311_v31 = vld [vmem:[%s2899_s16 + $0x60] sm:$0xff]  ;;  %v312_v34 = vld [vmem:[%s2899_s16 + $0x68] sm:$0xff]  ;;  %v313_v37 = vld [vmem:[%s2899_s16 + $0x70] sm:$0xff] }
  0x2f   : > { %408 = vst [vmem:[#allocation2 + $0x28] sm:$0xff] %v2764_v0  ;;  %v375_v26 = vadd.f32 %v3022_v6, %v339_v15  ;;  %v377_v32 = vadd.f32 %v3022_v6, %v341_v21  ;;  %v345_v33 = vmul.f32 %v3009_v1, %v309_v25  ;;  %v346_v36 = vmul.f32 %v3009_v1, %v310_v28  ;;  %v314_v40 = vld [vmem:[%s2899_s16 + $0x78] sm:$0xff]  ;;  %v315_v43 = vld [vmem:[%s2899_s16 + $0x80] sm:$0xff]  ;;  %v316_v46 = vld [vmem:[%s2899_s16 + $0x88] sm:$0xff] }
  0x30   : > { %409 = vst [vmem:[#allocation2 + $0x30] sm:$0xff] %v2764_v0  ;;  %v378_v35 = vadd.f32 %v3022_v6, %v342_v24  ;;  %v379_v38 = vadd.f32 %v3022_v6, %v343_v27  ;;  %v347_v39 = vmul.f32 %v3009_v1, %v311_v31  ;;  %v380_v41 = vadd.f32 %v3022_v6, %v344_v30  ;;  %v317_v49 = vld [vmem:[%s2899_s16 + $0x90] sm:$0xff]  ;;  %v318_v52 = vld [vmem:[%s2899_s16 + $0x98] sm:$0xff]  ;;  %v319_v55 = vld [vmem:[%s2899_s16 + $0xa0] sm:$0xff] }
  0x31   : > { %410 = vst [vmem:[#allocation2 + $0x38] sm:$0x7] %v2764_v0  ;;  %v348_v42 = vmul.f32 %v3009_v1, %v312_v34  ;;  %v381_v44 = vadd.f32 %v3022_v6, %v345_v33  ;;  %v349_v45 = vmul.f32 %v3009_v1, %v313_v37  ;;  %v382_v47 = vadd.f32 %v3022_v6, %v346_v36  ;;  %v320_v58 = vld [vmem:[%s2899_s16 + $0xa8] sm:$0xff]  ;;  %v321_v61 = vld [vmem:[%s2899_s16 + $0xb0] sm:$0xff]  ;;  %v323_v4 = vld [vmem:[%s2899_s16 + $0xc0] sm:$0xff] }
  0x32   : > { %411 = vst [vmem:[#allocation2 + $0x40] sm:$0xff] %v2764_v0  ;;  %v350_v48 = vmul.f32 %v3009_v1, %v314_v40  ;;  %v383_v50 = vadd.f32 %v3022_v6, %v347_v39  ;;  %v351_v51 = vmul.f32 %v3009_v1, %v315_v43  ;;  %v352_v54 = vmul.f32 %v3009_v1, %v316_v46  ;;  %v324_v8 = vld [vmem:[%s2899_s16 + $0xc8] sm:$0xff]  ;;  %v325_v11 = vld [vmem:[%s2899_s16 + $0xd0] sm:$0xff] }
  0x33   : > { %412 = vst [vmem:[#allocation2 + $0x48] sm:$0xff] %v2764_v0  ;;  %v384_v53 = vadd.f32 %v3022_v6, %v348_v42  ;;  %v385_v56 = vadd.f32 %v3022_v6, %v349_v45  ;;  %v353_v57 = vmul.f32 %v3009_v1, %v317_v49  ;;  %v354_v60 = vmul.f32 %v3009_v1, %v318_v52 }
  0x34   : > { %413 = vst [vmem:[#allocation2 + $0x50] sm:$0xff] %v2764_v0  ;;  %v386_v59 = vadd.f32 %v3022_v6, %v350_v48  ;;  %v387_v62 = vadd.f32 %v3022_v6, %v351_v51  ;;  %v355_v63 = vmul.f32 %v3009_v1, %v319_v55  ;;  %v388_v2 = vadd.f32 %v3022_v6, %v352_v54 }
  0x35   : > { %414 = vst [vmem:[#allocation2 + $0x58] sm:$0x7] %v2764_v0  ;;  %v356_v3 = vmul.f32 %v3009_v1, %v320_v58  ;;  %v389_v5 = vadd.f32 %v3022_v6, %v353_v57  ;;  %v357_v7 = vmul.f32 %v3009_v1, %v321_v61  ;;  %v390_v9 = vadd.f32 %v3022_v6, %v354_v60 }
  0x36   : > { %416 = vst [vmem:[#allocation2 + $0x260] sm:$0xff] %v2764_v0  ;;  %v391_v12 = vadd.f32 %v3022_v6, %v355_v63  ;;  %v359_v13 = vmul.f32 %v3009_v1, %v323_v4  ;;  %v360_v16 = vmul.f32 %v3009_v1, %v324_v8  ;;  %v361_v19 = vmul.f32 %v3009_v1, %v325_v11 }
  0x37   : > { %417 = vst [vmem:[#allocation2 + $0x268] sm:$0xff] %v2764_v0  ;;  %v392_v15 = vadd.f32 %v3022_v6, %v356_v3  ;;  %v393_v18 = vadd.f32 %v3022_v6, %v357_v7 }
  0x38   : > { %418 = vst [vmem:[#allocation2 + $0x270] sm:$0xff] %v2764_v0  ;;  %v395_v24 = vadd.f32 %v3022_v6, %v359_v13  ;;  %v396_v27 = vadd.f32 %v3022_v6, %v360_v16 }
  0x39   : > { %419 = vst [vmem:[#allocation2 + $0x278] sm:$0x7] %v2764_v0 }
  0x3a   : > { %420 = vst [vmem:[#allocation2 + $0x280] sm:$0xff] %v2764_v0 }
  0x3b   : > { %421 = vst [vmem:[#allocation2 + $0x288] sm:$0xff] %v2764_v0 }
  0x3c   : > { %422 = vst [vmem:[#allocation2 + $0x290] sm:$0xff] %v2764_v0 }
  0x3d   : > { %423 = vst [vmem:[#allocation2 + $0x298] sm:$0x7] %v2764_v0 }
  0x3e   : > { %424 = vst [vmem:[#allocation2 + $0x2a0] sm:$0xff] %v2764_v0 }
  0x3f   : > { %425 = vst [vmem:[#allocation2 + $0x2a8] sm:$0xff] %v2764_v0 }
  0x40   : > { %426 = vst [vmem:[#allocation2 + $0x2b0] sm:$0xff] %v2764_v0 }
  0x41   : > { %427 = vst [vmem:[#allocation2 + $0x2b8] sm:$0x7] %v2764_v0 }
  0x42   : > { %429 = vst [vmem:[#allocation2 + $0x60] sm:$0xff] %v2764_v0 }
  0x43   : > { %430 = vst [vmem:[#allocation2 + $0x80] sm:$0xff] %v2764_v0 }
  0x44   : > { %431 = vst [vmem:[#allocation2 + $0xa0] sm:$0xff] %v2764_v0 }
  0x45   : > { %432 = vst [vmem:[#allocation2 + $0xc0] sm:$0xff] %v2764_v0 }
  0x46   : > { %433 = vst [vmem:[#allocation2 + $0xe0] sm:$0xff] %v2764_v0 }
  0x47   : > { %434 = vst [vmem:[#allocation2 + $0x100] sm:$0xff] %v2764_v0 }
  0x48   : > { %435 = vst [vmem:[#allocation2 + $0x120] sm:$0xff] %v2764_v0 }
  0x49   : > { %436 = vst [vmem:[#allocation2 + $0x140] sm:$0xff] %v2764_v0 }
  0x4a   : > { %437 = vst [vmem:[#allocation2 + $0x160] sm:$0xff] %v2764_v0 }
  0x4b   : > { %438 = vst [vmem:[#allocation2 + $0x180] sm:$0xff] %v2764_v0 }
  0x4c   : > { %439 = vst [vmem:[#allocation2 + $0x1a0] sm:$0xff] %v2764_v0 }
  0x4d   : > { %440 = vst [vmem:[#allocation2 + $0x1c0] sm:$0xff] %v2764_v0 }
  0x4e   : > { %441 = vst [vmem:[#allocation2 + $0x1e0] sm:$0xff] %v2764_v0 }
  0x4f   : > { %442 = vst [vmem:[#allocation2 + $0x200] sm:$0xff] %v2764_v0 }
  0x50   : > { %443 = vst [vmem:[#allocation2 + $0x220] sm:$0xff] %v2764_v0 }
  0x51   : > { %444 = vst [vmem:[#allocation2 + $0x240] sm:$0xff] %v2764_v0 }
  0x52   : > { %445 = vst [vmem:[#allocation2 + $0x78] sm:$0x7] %v2764_v0 }
  0x53   : > { %446 = vst [vmem:[#allocation2 + $0x98] sm:$0x7] %v2764_v0 }
  0x54   : > { %447 = vst [vmem:[#allocation2 + $0xb8] sm:$0x7] %v2764_v0 }
  0x55   : > { %448 = vst [vmem:[#allocation2 + $0xd8] sm:$0x7] %v2764_v0 }
  0x56   : > { %449 = vst [vmem:[#allocation2 + $0xf8] sm:$0x7] %v2764_v0 }
  0x57   : > { %450 = vst [vmem:[#allocation2 + $0x118] sm:$0x7] %v2764_v0 }
  0x58   : > { %451 = vst [vmem:[#allocation2 + $0x138] sm:$0x7] %v2764_v0 }
  0x59   : > { %452 = vst [vmem:[#allocation2 + $0x158] sm:$0x7] %v2764_v0 }
  0x5a   : > { %453 = vst [vmem:[#allocation2 + $0x178] sm:$0x7] %v2764_v0 }
  0x5b   : > { %454 = vst [vmem:[#allocation2 + $0x198] sm:$0x7] %v2764_v0 }
  0x5c   : > { %455 = vst [vmem:[#allocation2 + $0x1b8] sm:$0x7] %v2764_v0 }
  0x5d   : > { %456 = vst [vmem:[#allocation2 + $0x1d8] sm:$0x7] %v2764_v0 }
  0x5e   : > { %457 = vst [vmem:[#allocation2 + $0x1f8] sm:$0x7] %v2764_v0 }
  0x5f   : > { %458 = vst [vmem:[#allocation2 + $0x218] sm:$0x7] %v2764_v0 }
  0x60   : > { %459 = vst [vmem:[#allocation2 + $0x238] sm:$0x7] %v2764_v0 }
  0x61   : > { %460 = vst [vmem:[#allocation2 + $0x258] sm:$0x7] %v2764_v0 }
  0x62   : > { %493 = vst [vmem:[#allocation3] sm:$0xff] %v2764_v0 }
  0x63   : > { %494 = vst [vmem:[#allocation3 + $0x8] sm:$0xff] %v2764_v0 }
  0x64   : > { %495 = vst [vmem:[#allocation3 + $0x10] sm:$0xff] %v2764_v0 }
  0x65   : > { %496 = vst [vmem:[#allocation3 + $0x18] sm:$0xff] %v2764_v0 }
  0x66   : > { %497 = vst [vmem:[#allocation3 + $0x20] sm:$0xff] %v2764_v0 }
  0x67   : > { %498 = vst [vmem:[#allocation3 + $0x28] sm:$0xff] %v2764_v0 }
  0x68   : > { %499 = vst [vmem:[#allocation3 + $0x30] sm:$0xff] %v2764_v0 }
  0x69   : > { %500 = vst [vmem:[#allocation3 + $0x38] sm:$0xff] %v2764_v0 }
  0x6a   : > { %501 = vst [vmem:[#allocation3 + $0x40] sm:$0xff] %v2764_v0 }
  0x6b   : > { %502 = vst [vmem:[#allocation3 + $0x48] sm:$0xff] %v2764_v0 }
  0x6c   : > { %503 = vst [vmem:[#allocation3 + $0x50] sm:$0xff] %v2764_v0 }
  0x6d   : > { %504 = vst [vmem:[#allocation3 + $0x58] sm:$0xff] %v2764_v0 }
  0x6e   : > { %505 = vst [vmem:[#allocation3 + $0x60] sm:$0xff] %v2764_v0 }
  0x6f   : > { %506 = vst [vmem:[#allocation3 + $0x68] sm:$0xff] %v2764_v0 }
  0x70   : > { %507 = vst [vmem:[#allocation3 + $0x70] sm:$0xff] %v2764_v0 }
  0x71   : > { %508 = vst [vmem:[#allocation3 + $0x78] sm:$0xff] %v2764_v0 }
  0x72   : > { %509 = vst [vmem:[#allocation3 + $0x80] sm:$0xff] %v2764_v0 }
  0x73   : > { %510 = vst [vmem:[#allocation3 + $0x88] sm:$0xff] %v2764_v0 }
  0x74   : > { %511 = vst [vmem:[#allocation3 + $0x90] sm:$0xff] %v2764_v0 }
  0x75   : > { %512 = vst [vmem:[#allocation3 + $0x98] sm:$0xff] %v2764_v0 }
  0x76   : > { %513 = vst [vmem:[#allocation3 + $0xa0] sm:$0xff] %v2764_v0 }
  0x77   : > { %514 = vst [vmem:[#allocation3 + $0xa8] sm:$0xff] %v2764_v0 }
  0x78   : > { %515 = vst [vmem:[#allocation3 + $0xb0] sm:$0xff] %v2764_v0 }
  0x79   : > { %516 = vst [vmem:[#allocation3 + $0xb8] sm:$0xff] %v2764_v0 }
  0x7a   : > { %517 = vst [vmem:[#allocation3 + $0xc0] sm:$0xff] %v2764_v0 }
  0x7b   : > { %518 = vst [vmem:[#allocation3 + $0xc8] sm:$0xff] %v2764_v0 }
  0x7c   : > { %519 = vst [vmem:[#allocation3 + $0xd0] sm:$0xff] %v2764_v0 }
  0x7d   : > { %520 = vst [vmem:[#allocation3 + $0xd8] sm:$0xff] %v2764_v0 }
  0x7e   : > { %521 = vst [vmem:[#allocation3 + $0xe0] sm:$0xff] %v2764_v0 }
  0x7f   : > { %522 = vst [vmem:[#allocation3 + $0xe8] sm:$0xff] %v2764_v0 }
  0x80   : > { %523 = vst [vmem:[#allocation3 + $0xf0] sm:$0xff] %v2764_v0 }
  0x81   : > { %524 = vst [vmem:[#allocation3 + $0xf8] sm:$0xff] %v2764_v0 }
  0x82   : > { %525 = vst [vmem:[#allocation3 + $0x100] sm:$0xff] %v2764_v0 }
  0x83   : > { %526 = vst [vmem:[#allocation3 + $0x108] sm:$0xff] %v2764_v0 }
  0x84   : > { %527 = vst [vmem:[#allocation3 + $0x110] sm:$0xff] %v2764_v0 }
  0x85   : > { %528 = vst [vmem:[#allocation3 + $0x118] sm:$0xff] %v2764_v0 }
  0x86   : > { %529 = vst [vmem:[#allocation3 + $0x120] sm:$0xff] %v2764_v0 }
  0x87   : > { %530 = vst [vmem:[#allocation3 + $0x128] sm:$0xff] %v2764_v0 }
  0x88   : > { %531 = vst [vmem:[#allocation3 + $0x130] sm:$0xff] %v2764_v0 }
  0x89   : > { %532 = vst [vmem:[#allocation3 + $0x138] sm:$0xff] %v2764_v0 }
  0x8a   : > { %533 = vst [vmem:[#allocation3 + $0x140] sm:$0xff] %v2764_v0 }
  0x8b   : > { %534 = vst [vmem:[#allocation3 + $0x148] sm:$0xff] %v2764_v0 }
  0x8c   : > { %535 = vst [vmem:[#allocation3 + $0x150] sm:$0xff] %v2764_v0 }
  0x8d   : > { %536 = vst [vmem:[#allocation3 + $0x158] sm:$0xff] %v2764_v0 }
  0x8e   : > { %537 = vst [vmem:[#allocation3 + $0x160] sm:$0xff] %v2764_v0 }
  0x8f   : > { %538 = vst [vmem:[#allocation3 + $0x168] sm:$0xff] %v2764_v0 }
  0x90   : > { %539 = vst [vmem:[#allocation3 + $0x170] sm:$0xff] %v2764_v0 }
  0x91   : > { %540 = vst [vmem:[#allocation3 + $0x178] sm:$0xff] %v2764_v0 }
  0x92   : > { %541 = vst [vmem:[#allocation3 + $0x180] sm:$0xff] %v2764_v0 }
  0x93   : > { %542 = vst [vmem:[#allocation3 + $0x188] sm:$0xff] %v2764_v0 }
  0x94   : > { %543 = vst [vmem:[#allocation3 + $0x190] sm:$0xff] %v2764_v0 }
  0x95   : > { %544 = vst [vmem:[#allocation3 + $0x198] sm:$0xff] %v2764_v0 }
  0x96   : > { %545 = vst [vmem:[#allocation3 + $0x1a0] sm:$0xff] %v2764_v0 }
  0x97   : > { %546 = vst [vmem:[#allocation3 + $0x1a8] sm:$0xff] %v2764_v0 }
  0x98   : > { %547 = vst [vmem:[#allocation3 + $0x1b0] sm:$0xff] %v2764_v0 }
  0x99   : > { %548 = vst [vmem:[#allocation3 + $0x1b8] sm:$0xff] %v2764_v0  ;;  %v322_v0 = vld [vmem:[%s2899_s16 + $0xb8] sm:$0xff] }
  0x9a   : > { %461 = vst [vmem:[#allocation2 + $0x68] sm:$0xff] %v371_v14  ;;  %v358_v10 = vmul.f32 %v3009_v1, %v322_v0  ;;  %v326_v14 = vld [vmem:[%s2899_s16 + $0xd8] sm:$0xff] }
  0x9b   : > { %462 = vst [vmem:[#allocation2 + $0x70] sm:$0xff] %v372_v17  ;;  %v327_v17 = vld [vmem:[%s2899_s16 + $0xe0] sm:$0xff]  ;;  %v362_v22 = vmul.f32 %v3009_v1, %v326_v14 }
  0x9c   : > { %463 = vst [vmem:[#allocation2 + $0x88] sm:$0xff] %v373_v20  ;;  %v328_v20 = vld [vmem:[%s2899_s16 + $0xe8] sm:$0xff]  ;;  %v394_v21 = vadd.f32 %v3022_v6, %v358_v10  ;;  %v363_v25 = vmul.f32 %v3009_v1, %v327_v17 }
  0x9d   : > { %464 = vst [vmem:[#allocation2 + $0x90] sm:$0xff] %v374_v23  ;;  %v329_v23 = vld [vmem:[%s2899_s16 + $0xf0] sm:$0xff]  ;;  %v364_v28 = vmul.f32 %v3009_v1, %v328_v20  ;;  %v398_v31 = vadd.f32 %v3022_v6, %v362_v22 }
  0x9e   : > { %465 = vst [vmem:[#allocation2 + $0xa8] sm:$0xff] %v375_v26  ;;  %v330_v26 = vld [vmem:[%s2899_s16 + $0xf8] sm:$0xff]  ;;  %v365_v30 = vmul.f32 %v3009_v1, %v329_v23  ;;  %v399_v33 = vadd.f32 %v3022_v6, %v363_v25 }
  0x9f   : > { %466 = vst [vmem:[#allocation2 + $0xb0] sm:$0xff] %v376_v29  ;;  %v397_v29 = vadd.f32 %v3022_v6, %v361_v19  ;;  %v400_v34 = vadd.f32 %v3022_v6, %v364_v28 }
  0xa0   : > { %467 = vst [vmem:[#allocation2 + $0xc8] sm:$0xff] %v377_v32  ;;  %v366_v32 = vmul.f32 %v3009_v1, %v330_v26 }
  0xa1   : > { %468 = vst [vmem:[#allocation2 + $0xd0] sm:$0xff] %v378_v35  ;;  %v401_v35 = vadd.f32 %v3022_v6, %v365_v30 }
  0xa2   : > { %469 = vst [vmem:[#allocation2 + $0xe8] sm:$0xff] %v379_v38  ;;  %v402_v36 = vadd.f32 %v3022_v6, %v366_v32 }
  0xa3   : > { %470 = vst [vmem:[#allocation2 + $0xf0] sm:$0xff] %v380_v41 }
  0xa4   : > { %471 = vst [vmem:[#allocation2 + $0x108] sm:$0xff] %v381_v44 }
  0xa5   : > { %472 = vst [vmem:[#allocation2 + $0x110] sm:$0xff] %v382_v47 }
  0xa6   : > { %473 = vst [vmem:[#allocation2 + $0x128] sm:$0xff] %v383_v50 }
  0xa7   : > { %474 = vst [vmem:[#allocation2 + $0x130] sm:$0xff] %v384_v53 }
  0xa8   : > { %475 = vst [vmem:[#allocation2 + $0x148] sm:$0xff] %v385_v56 }
  0xa9   : > { %476 = vst [vmem:[#allocation2 + $0x150] sm:$0xff] %v386_v59 }
  0xaa   : > { %477 = vst [vmem:[#allocation2 + $0x168] sm:$0xff] %v387_v62 }
  0xab   : > { %478 = vst [vmem:[#allocation2 + $0x170] sm:$0xff] %v388_v2 }
  0xac   : > { %479 = vst [vmem:[#allocation2 + $0x188] sm:$0xff] %v389_v5 }
  0xad   : > { %480 = vst [vmem:[#allocation2 + $0x190] sm:$0xff] %v390_v9 }
  0xae   : > { %481 = vst [vmem:[#allocation2 + $0x1a8] sm:$0xff] %v391_v12 }
  0xaf   : > { %482 = vst [vmem:[#allocation2 + $0x1b0] sm:$0xff] %v392_v15 }
  0xb0   : > { %483 = vst [vmem:[#allocation2 + $0x1c8] sm:$0xff] %v393_v18 }
  0xb1   : > { %484 = vst [vmem:[#allocation2 + $0x1d0] sm:$0xff] %v394_v21 }
  0xb2   : > { %485 = vst [vmem:[#allocation2 + $0x1e8] sm:$0xff] %v395_v24 }
  0xb3   : > { %486 = vst [vmem:[#allocation2 + $0x1f0] sm:$0xff] %v396_v27 }
  0xb4   : > { %487 = vst [vmem:[#allocation2 + $0x208] sm:$0xff] %v397_v29 }
  0xb5   : > { %488 = vst [vmem:[#allocation2 + $0x210] sm:$0xff] %v398_v31 }
  0xb6   : > { %489 = vst [vmem:[#allocation2 + $0x228] sm:$0xff] %v399_v33 }
  0xb7   : > { %490 = vst [vmem:[#allocation2 + $0x230] sm:$0xff] %v400_v34 }
  0xb8   : > { %491 = vst [vmem:[#allocation2 + $0x248] sm:$0xff] %v401_v35 }
  0xb9   : > { %492 = vst [vmem:[#allocation2 + $0x250] sm:$0xff] %v402_v36 }
  0xba LB: >> { %v561_v1 = vld [vmem:[%s4068_s3] sm:$0xff]  ;;  %v3138_v6 = vld [vmem:[%s4068_s3 + $0x8] sm:$0xff]  ;;  %vm565_vm0 = vcmask 1044480   ;;  %v2391_v37 = vld [vmem:[%s4068_s3 + $0x10] sm:$0xff]  ;;  %vm580_vm1 = vcmask 1045504   ;;  %vm593_vm2 = vcmask 1046528   ;;  %s2760_s17 = sphi %s3127_s17, %s554_s17  }
  0xbb   : >> { %v566_v38 = vrot.slane %v561_v1, 3  ;;  %v567_v39 = vrot.slane %v3138_v6, 3  ;;  %v2392_v40 = vld [vmem:[%s4068_s3 + $0x18] sm:$0xff]  ;;  %v581_v41 = vrot.slane %v2391_v37, 2  ;;  %v2393_v42 = vld [vmem:[%s4068_s3 + $0x20] sm:$0xff]  ;;  %v2394_v43 = vld [vmem:[%s4068_s3 + $0x28] sm:$0xff] }
  0xbc   : >> { %s2390_s18 = sshll.u32 %s2760_s17, 5  ;;  %v582_v44 = vrot.slane %v2392_v40, 2  ;;  %v610_v45 = vrot.slane %v2393_v42, 1  ;;  %v611_v46 = vrot.slane %v2394_v43, 1  ;;  %v2395_v47 = vld [vmem:[%s4068_s3 + $0x30] sm:$0xff]  ;;  %v2396_v49 = vld [vmem:[%s4068_s3 + $0x38] sm:$0xff] }
  0xbd   : >> { %v568_v48 = vsel %vm565_vm0, %v566_v38, %v567_v39  ;;  %v2397_v50 = vld [vmem:[%s4068_s3 + $0x40] sm:$0xff]  ;;  %v3169_v51 = vld [vmem:[%s4068_s3 + $0x48] sm:$0xff]  ;;  %vm654_vm3 = vcmask 1040384   ;;  %s3171_s29 = scalar_lea.vmem [#allocation2], %s2390_s18  ;;  %vm667_vm4 = vcmask 1043456   ;;  %v2399_v17 = vld [vmem:[%s4068_s3 + $0x50] sm:$0xff] }
  0xbe   : >> { %v583_v55 = vsel %vm580_vm1, %v581_v41, %v582_v44  ;;  %v612_v56 = vsel %vm593_vm2, %v610_v45, %v611_v46  ;;  %v655_v57 = vrot.slane %v2397_v50, 7  ;;  %v656_v58 = vrot.slane %v3169_v51, 7  ;;  %v2400_v18 = vld [vmem:[%s4068_s3 + $0x58] sm:$0xff]  ;;  %v2401_v27 = vld [vmem:[%s4068_s3 + $0x60] sm:$0xff]  ;;  %v2402_v31 = vld [vmem:[%s4068_s3 + $0x68] sm:$0xff]  ;;  %s2403_s11 = sshll.u32 %s2760_s17, 4 }
  0xbf   : >> { %vm684_vm5 = vcmask 1041408   ;;  %v685_v29 = vrot.slane %v2399_v17, 6  ;;  %v686_v30 = vrot.slane %v2400_v18, 6  ;;  %vm697_vm6 = vcmask 1042432   ;;  %v2413_v17 = vld [vmem:[%s4068_s3 + $0x98] sm:$0xff]  ;;  %s3268_s19 = scalar_lea.vmem [#allocation3], %s2403_s11 }
  0xc0   : >> { %v3174_v52 = vld [vmem:[%s3171_s29] sm:$0xff]  ;;  %v3177_v53 = vld [vmem:[%s3171_s29 + $0x8] sm:$0xff]  ;;  %v3180_v54 = vld [vmem:[%s3171_s29 + $0x10] sm:$0xff]  ;;  %v657_v16 = vsel %vm654_vm3, %v655_v57, %v656_v58  ;;  %v714_v37 = vrot.slane %v2401_v27, 5  ;;  %v715_v43 = vrot.slane %v2402_v31, 5  ;;  %s554_s17 = sadd.s32 1, %s2760_s17  }
  0xc1   : >> { %v572_v59 = vmul.f32 %v566_v38, %v3174_v52  ;;  %v573_v60 = vmul.f32 %v568_v48, %v3177_v53  ;;  %v587_v61 = vmul.f32 %v581_v41, %v3174_v52  ;;  %v588_v62 = vmul.f32 %v583_v55, %v3177_v53  ;;  %v3224_v38 = vld [vmem:[%s3171_s29 + $0x18] sm:$0x7]  ;;  %p551_p6 = scmp.ge.s32.totalorder %s554_s17, 22  }
  0xc2   : >> { %v589_v63 = vmul.f32 %v582_v44, %v3180_v54  ;;  %v616_v0 = vmul.f32 %v610_v45, %v3174_v52  ;;  %v617_v2 = vmul.f32 %v612_v56, %v3177_v53  ;;  %v3193_v3 = vmul.f32 %v611_v46, %v3180_v54  ;;  %s2564_s12 = sshll.u32 (%p551_p6), %s2828_s28, 8  ;;  %s2277_s28 = sshll.u32 (%p551_p6), %s3125_s8, 4  ;;  %s2278_s28 = int_to_ptr.vmem [resolvable:$true] %s2277_s28 }
  0xc3   : >> { %v594_v4 = vrot.slane %v587_v61, 1  ;;  %v595_v5 = vrot.slane %v588_v62, 1  ;;  %v636_v7 = vmul.f32 %v2395_v47, %v3177_v53  ;;  %v3197_v8 = vmul.f32 %v2396_v49, %v3180_v54  ;;  %s2276_s18 = scalar_lea.hbm (%p551_p6), %s4072_s7, %s2564_s12  ;;  %s2265_s15 = scalar_lea.sflag (%p551_p6), [#allocation6], %s2893_s22 }
  0xc4   : >> { %v597_v9 = vrot.slane %v589_v63, 1  ;;  %v622_v10 = vrot.slane %v616_v0, 2  ;;  %v623_v11 = vrot.slane %v617_v2, 2  ;;  %v625_v12 = vrot.slane %v3193_v3, 2  ;;  %s2279_s11 = sshll.u32 (%p551_p6), %s2276_s18, 4  ;;  %s2280_s11 = int_to_ptr.hbm [resolvable:$true] %s2279_s11 }
  0xc5   : >> { %v596_v13 = vsel %vm593_vm2, %v594_v4, %v595_v5  ;;  %v640_v14 = vrot.slane %v636_v7, 3  ;;  %v641_v15 = vrot.slane %v3197_v8, 3  ;;  %v661_v25 = vmul.f32 %v655_v57, %v3177_v53  ;;  %s2700_s20 = sshra.s32 (%p551_p6), %s2280_s11, 4  ;;  %s2701_s20 = int_to_ptr.hbm [resolvable:$true] %s2700_s20 }
  0xc6   : >> { %v598_v19 = vsel %vm593_vm2, %v595_v5, %v597_v9  ;;  %v602_v20 = vadd.f32 %v596_v13, %v572_v59  ;;  %v624_v21 = vsel %vm580_vm1, %v622_v10, %v623_v11  ;;  %v626_v22 = vsel %vm580_vm1, %v623_v11, %v625_v12  ;;  %v2411_v10 = vld [vmem:[%s4068_s3 + $0x88] sm:$0xff]  ;;  %s2702_s10 = scalar_lea.hbm (%p551_p6), %s2701_s20, 256  ;;  %p2707_p1 = scmp.lt.s32.totalorder (%p551_p6), %s2701_s20, %s4072_s7 }
  0xc7   : >> { %v603_v23 = vadd.f32 %v598_v19, %v573_v60  ;;  %v642_v24 = vsel %vm565_vm0, %v640_v14, %v641_v15  ;;  %v662_v26 = vmul.f32 %v657_v16, %v3180_v54  ;;  %v668_v33 = vrot.slane %v661_v25, 4  ;;  %v2408_v60 = vld [vmem:[%s4068_s3 + $0x70] sm:$0xff]  ;;  %v2404_v25 = vld [vmem:[%s3268_s19 + $0x60] sm:$0xff]  ;;  %p2703_p9 = scmp.ne.s32.totalorder (%p551_p6), %s2701_s20, %s2702_s10 }
  0xc8   : >> { %v630_v28 = vadd.f32 %v624_v21, %v602_v20  ;;  %v687_v36 = vsel %vm684_vm5, %v685_v29, %v686_v30  ;;  %v691_v1 = vmul.f32 %v685_v29, %v3177_v53  ;;  %v720_v46 = vmul.f32 %v714_v37, %v3177_v53 }
  0xc9   : >> { %v631_v32 = vadd.f32 %v626_v22, %v603_v23  ;;  %v669_v34 = vrot.slane %v662_v26, 4  ;;  %v692_v42 = vmul.f32 %v687_v36, %v3180_v54  ;;  %v574_v47 = vmul.f32 %v567_v39, %v3180_v54  ;;  %p2704_p13 = pnand (%p551_p6), %p2703_p9, %p2857_p11 }
  0xca   : >> { %v646_v35 = vadd.f32 %v640_v14, %v630_v28  ;;  %v698_v45 = vrot.slane %v691_v1, 5  ;;  %v716_v50 = vsel %vm697_vm6, %v714_v37, %v715_v43  ;;  %v663_v51 = vmul.f32 %v656_v58, %v3224_v38  ;;  %v3245_v58 = vld [vmem:[%s4068_s3 + $0x78] sm:$0xff]  ;;  %v2414_v37 = vld [vmem:[%s4068_s3 + $0xa0] sm:$0xff] }
  0xcb   : >> { %v647_v40 = vadd.f32 %v642_v24, %v631_v32  ;;  %v670_v41 = vsel %vm667_vm4, %v668_v33, %v669_v34  ;;  %v699_v49 = vrot.slane %v692_v42, 5  ;;  %v721_v56 = vmul.f32 %v716_v50, %v3180_v54  ;;  %v2405_v50 = vld [vmem:[%s3268_s19 + $0x68] sm:$0xff]  ;;  %p2705_p0 = pneg (%p551_p6), %p2704_p13 }
  0xcc   : >> { %v676_v44 = vadd.f32 %v668_v33, %v646_v35  ;;  %v726_v57 = vrot.slane %v720_v46, 6  ;;  %v604_v59 = vadd.f32 %v597_v9, %v574_v47  ;;  %v671_v6 = vrot.slane %v663_v51, 4  ;;  %v2410_v9 = vld [vmem:[%s4068_s3 + $0x80] sm:$0xff] }
  0xcd   : >> { %v677_v48 = vadd.f32 %v670_v41, %v647_v40  ;;  %v700_v61 = vsel %vm697_vm6, %v698_v45, %v699_v49  ;;  %v693_v39 = vmul.f32 %v686_v30, %v3224_v38  ;;  %v722_v62 = vmul.f32 %v715_v43, %v3224_v38  ;;  %v2415_v40 = vld [vmem:[%s4068_s3 + $0xa8] sm:$0xff]  ;;  %v2416_v41 = vld [vmem:[%s4068_s3 + $0xb0] sm:$0xff] }
  0xce   : >> { %v706_v55 = vadd.f32 %v698_v45, %v676_v44  ;;  %v727_v0 = vrot.slane %v721_v56, 6  ;;  %v632_v3 = vadd.f32 %v625_v12, %v604_v59  ;;  %v672_v4 = vsel %vm667_vm4, %v669_v34, %v671_v6  ;;  %v2412_v12 = vld [vmem:[%s4068_s3 + $0x90] sm:$0xff] }
  0xcf   : >> { %v707_v63 = vadd.f32 %v700_v61, %v677_v48  ;;  %v701_v5 = vrot.slane %v693_v39, 5  ;;  %v729_v7 = vrot.slane %v722_v62, 6  ;;  %v761_v8 = vrot.slane %v2408_v60, 3  ;;  %v2417_v39 = vld [vmem:[%s4068_s3 + $0xb8] sm:$0xff] }
  0xd0   : >> { %v734_v2 = vadd.f32 %v726_v57, %v706_v55  ;;  %v728_v11 = vsel %vm684_vm5, %v726_v57, %v727_v0  ;;  %v648_v14 = vadd.f32 %v641_v15, %v632_v3  ;;  %v762_v16 = vrot.slane %v3245_v58, 3  ;;  %v2418_v3 = vld [vmem:[%s4068_s3 + $0xc0] sm:$0xff] }
  0xd1   : >> { %v735_v18 = vadd.f32 %v728_v11, %v707_v63  ;;  %v702_v19 = vsel %vm697_vm6, %v699_v49, %v701_v5  ;;  %v730_v20 = vsel %vm684_vm5, %v727_v0, %v729_v7  ;;  %v767_v21 = vmul.f32 %v761_v8, %v3174_v52  ;;  %v2420_v5 = vld [vmem:[%s4068_s3 + $0xd0] sm:$0xff]  ;;  %v2427_v58 = vld [vmem:[%s4068_s3 + $0xe0] sm:$0xff] }
  0xd2   : >> { %v745_v13 = vrot.slane %v734_v2, 5  ;;  %v678_v22 = vadd.f32 %v672_v4, %v648_v14  ;;  %v763_v15 = vsel %vm565_vm0, %v761_v8, %v762_v16  ;;  %v775_v23 = vrot.slane %v2410_v9, 2  ;;  %v2419_v4 = vld [vmem:[%s4068_s3 + $0xc8] sm:$0xff] }
  0xd3   : >> { %v776_v24 = vrot.slane %v2411_v10, 2  ;;  %v746_v26 = vrot.slane %v735_v18, 5  ;;  %v768_v27 = vmul.f32 %v763_v15, %v3177_v53  ;;  %v803_v28 = vrot.slane %v2412_v12, 1 }
  0xd4   : >> { %v804_v29 = vrot.slane %v2413_v17, 1  ;;  %v708_v30 = vadd.f32 %v702_v19, %v678_v22  ;;  %v781_v32 = vmul.f32 %v775_v23, %v3174_v52  ;;  %v829_v55 = vmul.f32 %v2414_v37, %v3177_v53  ;;  %v2421_v17 = vld [vmem:[%s4068_s3 + $0xd8] sm:$0xff] }
  0xd5   : >> { %v777_v31 = vsel %vm580_vm1, %v775_v23, %v776_v24  ;;  %v3275_v33 = vmul.f32 %v776_v24, %v3180_v54  ;;  %v747_v34 = vsel %vm697_vm6, %v745_v13, %v746_v26  ;;  %v809_v1 = vmul.f32 %v803_v28, %v3174_v52 }
  0xd6   : >> { %v782_v35 = vmul.f32 %v777_v31, %v3177_v53  ;;  %v805_v36 = vsel %vm593_vm2, %v803_v28, %v804_v29  ;;  %v752_v42 = vadd.f32 %v2404_v25, %v747_v34  ;;  %v736_v43 = vadd.f32 %v730_v20, %v708_v30 }
  0xd7   : >> { %v787_v44 = vrot.slane %v781_v32, 1  ;;  %v790_v45 = vrot.slane %v3275_v33, 1  ;;  %v810_v47 = vmul.f32 %v805_v36, %v3177_v53  ;;  %v3293_v48 = vmul.f32 %v804_v29, %v3180_v54 }
  0xd8   : >> { %v788_v46 = vrot.slane %v782_v35, 1  ;;  %v815_v49 = vrot.slane %v809_v1, 2  ;;  %2406 = vst [vmem:[%s3268_s19 + $0x60] sm:$0xff] %v752_v42  ;;  %v748_v51 = vrot.slane %v736_v43, 5  ;;  %v3299_v56 = vmul.f32 %v2415_v40, %v3180_v54 }
  0xd9   : >> { %v847_v57 = vrot.slane %v2416_v41, 7  ;;  %v816_v61 = vrot.slane %v810_v47, 2  ;;  %v818_v6 = vrot.slane %v3293_v48, 2  ;;  %v833_v2 = vrot.slane %v829_v55, 3 }
  0xda   : >> { %v789_v59 = vsel %vm593_vm2, %v787_v44, %v788_v46  ;;  %v791_v60 = vsel %vm593_vm2, %v788_v46, %v790_v45  ;;  %v749_v62 = vsel %vm697_vm6, %v746_v26, %v748_v51  ;;  %v834_v10 = vrot.slane %v3299_v56, 3 }
  0xdb   : >> { %v795_v63 = vadd.f32 %v789_v59, %v767_v21  ;;  %v796_v0 = vadd.f32 %v791_v60, %v768_v27  ;;  %v753_v7 = vadd.f32 %v2405_v50, %v749_v62  ;;  %v817_v8 = vsel %vm580_vm1, %v815_v49, %v816_v61  ;;  %v3347_v50 = vld [vmem:[%s4068_s3 + $0xe8] sm:$0xff]  ;;  %v2431_v62 = vld [vmem:[%s4068_s3 + $0x100] sm:$0xff] }
  0xdc   : >> { %v819_v9 = vsel %vm580_vm1, %v816_v61, %v818_v6  ;;  %v848_v14 = vrot.slane %v2417_v39, 7  ;;  %v853_v12 = vmul.f32 %v847_v57, %v3177_v53  ;;  %v835_v18 = vsel %vm565_vm0, %v833_v2, %v834_v10  ;;  %v2430_v39 = vld [vmem:[%s4068_s3 + $0xf8] sm:$0xff] }
  0xdd   : >> { %v823_v11 = vadd.f32 %v817_v8, %v795_v63  ;;  %v824_v13 = vadd.f32 %v819_v9, %v796_v0  ;;  %2407 = vst [vmem:[%s3268_s19 + $0x68] sm:$0xff] %v753_v7  ;;  %v875_v19 = vrot.slane %v2418_v3, 6  ;;  %v876_v20 = vrot.slane %v2419_v4, 6  ;;  %v2432_v9 = vld [vmem:[%s4068_s3 + $0x108] sm:$0xff] }
  0xde   : >> { %v903_v21 = vrot.slane %v2420_v5, 5  ;;  %v849_v23 = vsel %vm654_vm3, %v847_v57, %v848_v14  ;;  %v859_v24 = vrot.slane %v853_v12, 4  ;;  %v904_v28 = vrot.slane %v2421_v17, 5  ;;  %v2429_v57 = vld [vmem:[%s4068_s3 + $0xf0] sm:$0xff] }
  0xdf   : >> { %v839_v22 = vadd.f32 %v833_v2, %v823_v11  ;;  %v840_v15 = vadd.f32 %v835_v18, %v824_v13  ;;  %v854_v25 = vmul.f32 %v849_v23, %v3180_v54  ;;  %v877_v26 = vsel %vm684_vm5, %v875_v19, %v876_v20  ;;  %v2423_v12 = vld [vmem:[%s3268_s19 + $0x50] sm:$0xff] }
  0xe0   : >> { %v881_v27 = vmul.f32 %v875_v19, %v3177_v53  ;;  %v882_v30 = vmul.f32 %v877_v26, %v3180_v54  ;;  %v909_v31 = vmul.f32 %v903_v21, %v3177_v53  ;;  %v769_v32 = vmul.f32 %v762_v16, %v3180_v54 }
  0xe1   : >> { %v867_v29 = vadd.f32 %v859_v24, %v839_v22  ;;  %v860_v33 = vrot.slane %v854_v25, 4  ;;  %v905_v35 = vsel %vm697_vm6, %v903_v21, %v904_v28  ;;  %v855_v36 = vmul.f32 %v848_v14, %v3224_v38 }
  0xe2   : >> { %v887_v34 = vrot.slane %v881_v27, 5  ;;  %v888_v1 = vrot.slane %v882_v30, 5  ;;  %v910_v37 = vmul.f32 %v905_v35, %v3180_v54  ;;  %v915_v40 = vrot.slane %v909_v31, 6  ;;  %v2435_v30 = vld [vmem:[%s4068_s3 + $0x120] sm:$0xff]  ;;  %v2424_v35 = vld [vmem:[%s3268_s19 + $0x58] sm:$0xff] }
  0xe3   : >> { %v797_v41 = vadd.f32 %v790_v45, %v769_v32  ;;  %v861_v42 = vsel %vm667_vm4, %v859_v24, %v860_v33  ;;  %v862_v44 = vrot.slane %v855_v36, 4  ;;  %v883_v46 = vmul.f32 %v876_v20, %v3224_v38 }
  0xe4   : >> { %v895_v43 = vadd.f32 %v887_v34, %v867_v29  ;;  %v868_v16 = vadd.f32 %v861_v42, %v840_v15  ;;  %v889_v47 = vsel %vm697_vm6, %v887_v34, %v888_v1  ;;  %v916_v48 = vrot.slane %v910_v37, 6  ;;  %v2434_v29 = vld [vmem:[%s4068_s3 + $0x118] sm:$0xff] }
  0xe5   : >> { %v825_v49 = vadd.f32 %v818_v6, %v797_v41  ;;  %v863_v51 = vsel %vm667_vm4, %v860_v33, %v862_v44  ;;  %v890_v55 = vrot.slane %v883_v46, 5  ;;  %v911_v56 = vmul.f32 %v904_v28, %v3224_v38  ;;  %v2433_v28 = vld [vmem:[%s4068_s3 + $0x110] sm:$0xff]  ;;  %v2436_v44 = vld [vmem:[%s4068_s3 + $0x128] sm:$0xff] }
  0xe6   : >> { %v923_v45 = vadd.f32 %v915_v40, %v895_v43  ;;  %v896_v59 = vadd.f32 %v889_v47, %v868_v16  ;;  %v917_v60 = vsel %vm684_vm5, %v915_v40, %v916_v48  ;;  %v950_v6 = vrot.slane %v2427_v58, 3 }
  0xe7   : >> { %v841_v61 = vadd.f32 %v834_v10, %v825_v49  ;;  %v891_v0 = vsel %vm697_vm6, %v888_v1, %v890_v55  ;;  %v918_v2 = vrot.slane %v911_v56, 6  ;;  %v951_v3 = vrot.slane %v3347_v50, 3  ;;  %v2437_v49 = vld [vmem:[%s4068_s3 + $0x130] sm:$0xff] }
  0xe8   : >> { %v934_v63 = vrot.slane %v923_v45, 5  ;;  %v924_v4 = vadd.f32 %v917_v60, %v896_v59  ;;  %v956_v7 = vmul.f32 %v950_v6, %v3174_v52  ;;  %v964_v8 = vrot.slane %v2429_v57, 2  ;;  %v2438_v57 = vld [vmem:[%s4068_s3 + $0x138] sm:$0xff]  ;;  %v2439_v59 = vld [vmem:[%s4068_s3 + $0x140] sm:$0xff]  ;;  %v2446_v50 = vld [vmem:[%s4068_s3 + $0x150] sm:$0xff] }
  0xe9   : >> { %v869_v5 = vadd.f32 %v863_v51, %v841_v61  ;;  %v919_v10 = vsel %vm684_vm5, %v916_v48, %v918_v2  ;;  %v952_v11 = vsel %vm565_vm0, %v950_v6, %v951_v3  ;;  %v965_v13 = vrot.slane %v2430_v39, 2 }
  0xea   : >> { %v992_v14 = vrot.slane %v2431_v62, 1  ;;  %v935_v17 = vrot.slane %v924_v4, 5  ;;  %v957_v19 = vmul.f32 %v952_v11, %v3177_v53  ;;  %v970_v20 = vmul.f32 %v964_v8, %v3174_v52  ;;  %v2440_v4 = vld [vmem:[%s4068_s3 + $0x148] sm:$0xff] }
  0xeb   : >> { %v897_v18 = vadd.f32 %v891_v0, %v869_v5  ;;  %v966_v21 = vsel %vm580_vm1, %v964_v8, %v965_v13  ;;  %v3376_v22 = vmul.f32 %v965_v13, %v3180_v54  ;;  %v993_v15 = vrot.slane %v2432_v9, 1 }
  0xec   : >> { %v998_v23 = vmul.f32 %v992_v14, %v3174_v52  ;;  %v936_v24 = vsel %vm697_vm6, %v934_v63, %v935_v17  ;;  %v971_v26 = vmul.f32 %v966_v21, %v3177_v53  ;;  %v976_v27 = vrot.slane %v970_v20, 1 }
  0xed   : >> { %v925_v25 = vadd.f32 %v919_v10, %v897_v18  ;;  %v941_v31 = vadd.f32 %v2423_v12, %v936_v24  ;;  %v979_v32 = vrot.slane %v3376_v22, 1  ;;  %v994_v33 = vsel %vm593_vm2, %v992_v14, %v993_v15 }
  0xee   : >> { %v3393_v34 = vmul.f32 %v993_v15, %v3180_v54  ;;  %v977_v1 = vrot.slane %v971_v26, 1  ;;  %v999_v37 = vmul.f32 %v994_v33, %v3177_v53  ;;  %v1004_v40 = vrot.slane %v998_v23, 2 }
  0xef   : >> { %v937_v36 = vrot.slane %v925_v25, 5  ;;  %2425 = vst [vmem:[%s3268_s19 + $0x50] sm:$0xff] %v941_v31  ;;  %v1018_v42 = vmul.f32 %v2433_v28, %v3177_v53  ;;  %v3401_v43 = vmul.f32 %v2434_v29, %v3180_v54  ;;  %v1036_v46 = vrot.slane %v2435_v30, 7 }
  0xf0   : >> { %v1007_v41 = vrot.slane %v3393_v34, 2  ;;  %v978_v16 = vsel %vm593_vm2, %v976_v27, %v977_v1  ;;  %v980_v47 = vsel %vm593_vm2, %v977_v1, %v979_v32  ;;  %v1005_v48 = vrot.slane %v999_v37, 2 }
  0xf1   : >> { %v938_v58 = vsel %vm697_vm6, %v935_v17, %v937_v36  ;;  %v984_v51 = vadd.f32 %v978_v16, %v956_v7  ;;  %v985_v55 = vadd.f32 %v980_v47, %v957_v19  ;;  %v1022_v56 = vrot.slane %v1018_v42, 3 }
  0xf2   : >> { %v942_v45 = vadd.f32 %v2424_v35, %v938_v58  ;;  %v1006_v60 = vsel %vm580_vm1, %v1004_v40, %v1005_v48  ;;  %v1008_v61 = vsel %vm580_vm1, %v1005_v48, %v1007_v41  ;;  %v1023_v6 = vrot.slane %v3401_v43, 3  ;;  %v3449_v40 = vld [vmem:[%s4068_s3 + $0x158] sm:$0xff]  ;;  %v2449_v48 = vld [vmem:[%s4068_s3 + $0x168] sm:$0xff] }
  0xf3   : >> { %v1037_v39 = vrot.slane %v2436_v44, 7  ;;  %v1012_v62 = vadd.f32 %v1006_v60, %v984_v51  ;;  %v1013_v63 = vadd.f32 %v1008_v61, %v985_v55  ;;  %v1042_v0 = vmul.f32 %v1036_v46, %v3177_v53 }
  0xf4   : >> { %2426 = vst [vmem:[%s3268_s19 + $0x58] sm:$0xff] %v942_v45  ;;  %v1064_v2 = vrot.slane %v2437_v49, 6  ;;  %v1024_v5 = vsel %vm565_vm0, %v1022_v56, %v1023_v6  ;;  %v1065_v8 = vrot.slane %v2438_v57, 6  ;;  %v1092_v9 = vrot.slane %v2439_v59, 5  ;;  %v2450_v49 = vld [vmem:[%s4068_s3 + $0x170] sm:$0xff]  ;;  %v2451_v57 = vld [vmem:[%s4068_s3 + $0x178] sm:$0xff] }
  0xf5   : >> { %v1038_v7 = vsel %vm654_vm3, %v1036_v46, %v1037_v39  ;;  %v1028_v10 = vadd.f32 %v1022_v56, %v1012_v62  ;;  %v1029_v11 = vadd.f32 %v1024_v5, %v1013_v63  ;;  %v1048_v14 = vrot.slane %v1042_v0, 4  ;;  %v2448_v46 = vld [vmem:[%s4068_s3 + $0x160] sm:$0xff] }
  0xf6   : >> { %v1043_v13 = vmul.f32 %v1038_v7, %v3180_v54  ;;  %v1066_v12 = vsel %vm684_vm5, %v1064_v2, %v1065_v8  ;;  %v1070_v17 = vmul.f32 %v1064_v2, %v3177_v53  ;;  %v1093_v18 = vrot.slane %v2440_v4, 5 }
  0xf7   : >> { %v1098_v19 = vmul.f32 %v1092_v9, %v3177_v53  ;;  %v1056_v21 = vadd.f32 %v1048_v14, %v1028_v10  ;;  %v1071_v22 = vmul.f32 %v1066_v12, %v3180_v54  ;;  %v958_v15 = vmul.f32 %v951_v3, %v3180_v54 }
  0xf8   : >> { %v1049_v20 = vrot.slane %v1043_v13, 4  ;;  %v1076_v23 = vrot.slane %v1070_v17, 5  ;;  %v1094_v24 = vsel %vm697_vm6, %v1092_v9, %v1093_v18  ;;  %v1044_v26 = vmul.f32 %v1037_v39, %v3224_v38  ;;  %v2442_v39 = vld [vmem:[%s3268_s19 + $0x40] sm:$0xff] }
  0xf9   : >> { %v1104_v25 = vrot.slane %v1098_v19, 6  ;;  %v1077_v28 = vrot.slane %v1071_v22, 5  ;;  %v1099_v29 = vmul.f32 %v1094_v24, %v3180_v54  ;;  %v986_v30 = vadd.f32 %v979_v32, %v958_v15  ;;  %v2455_v22 = vld [vmem:[%s4068_s3 + $0x198] sm:$0xff] }
  0xfa   : >> { %v1050_v27 = vsel %vm667_vm4, %v1048_v14, %v1049_v20  ;;  %v1084_v33 = vadd.f32 %v1076_v23, %v1056_v21  ;;  %v1051_v34 = vrot.slane %v1044_v26, 4  ;;  %v1072_v35 = vmul.f32 %v1065_v8, %v3224_v38  ;;  %v2452_v14 = vld [vmem:[%s4068_s3 + $0x180] sm:$0xff]  ;;  %v2454_v21 = vld [vmem:[%s4068_s3 + $0x190] sm:$0xff]  ;;  %v2443_v26 = vld [vmem:[%s3268_s19 + $0x48] sm:$0xff] }
  0xfb   : >> { %v1057_v31 = vadd.f32 %v1050_v27, %v1029_v11  ;;  %v1078_v3 = vsel %vm697_vm6, %v1076_v23, %v1077_v28  ;;  %v1105_v36 = vrot.slane %v1099_v29, 6  ;;  %v1014_v1 = vadd.f32 %v1007_v41, %v986_v30 }
  0xfc   : >> { %v1100_v37 = vmul.f32 %v1093_v18, %v3224_v38  ;;  %v1112_v42 = vadd.f32 %v1104_v25, %v1084_v33  ;;  %v1052_v43 = vsel %vm667_vm4, %v1049_v20, %v1051_v34  ;;  %v1079_v44 = vrot.slane %v1072_v35, 5  ;;  %v2453_v20 = vld [vmem:[%s4068_s3 + $0x188] sm:$0xff] }
  0xfd   : >> { %v1085_v32 = vadd.f32 %v1078_v3, %v1057_v31  ;;  %v1106_v58 = vsel %vm684_vm5, %v1104_v25, %v1105_v36  ;;  %v1030_v41 = vadd.f32 %v1023_v6, %v1014_v1  ;;  %v1139_v47 = vrot.slane %v2446_v50, 3 }
  0xfe   : >> { %v1107_v16 = vrot.slane %v1100_v37, 6  ;;  %v1123_v51 = vrot.slane %v1112_v42, 5  ;;  %v1080_v55 = vsel %vm697_vm6, %v1077_v28, %v1079_v44  ;;  %v1140_v56 = vrot.slane %v3449_v40, 3  ;;  %v2456_v44 = vld [vmem:[%s4068_s3 + $0x1a0] sm:$0xff] }
  0xff   : >> { %v1113_v45 = vadd.f32 %v1106_v58, %v1085_v32  ;;  %v1058_v59 = vadd.f32 %v1052_v43, %v1030_v41  ;;  %v1145_v61 = vmul.f32 %v1139_v47, %v3174_v52  ;;  %v1153_v6 = vrot.slane %v2448_v46, 2  ;;  %v2457_v46 = vld [vmem:[%s4068_s3 + $0x1a8] sm:$0xff]  ;;  %v2458_v58 = vld [vmem:[%s4068_s3 + $0x1b0] sm:$0xff] }
 0x100   : >> { %v1108_v60 = vsel %vm684_vm5, %v1105_v36, %v1107_v16  ;;  %v1141_v63 = vsel %vm565_vm0, %v1139_v47, %v1140_v56  ;;  %v1154_v0 = vrot.slane %v2449_v48, 2  ;;  %v1181_v2 = vrot.slane %v2450_v49, 1 }
 0x101   : >> { %v1124_v62 = vrot.slane %v1113_v45, 5  ;;  %v1086_v4 = vadd.f32 %v1080_v55, %v1058_v59  ;;  %v1146_v5 = vmul.f32 %v1141_v63, %v3177_v53  ;;  %v1159_v7 = vmul.f32 %v1153_v6, %v3174_v52 }
 0x102   : >> { %v1182_v8 = vrot.slane %v2451_v57, 1  ;;  %v1155_v10 = vsel %vm580_vm1, %v1153_v6, %v1154_v0  ;;  %v3478_v11 = vmul.f32 %v1154_v0, %v3180_v54  ;;  %v1187_v13 = vmul.f32 %v1181_v2, %v3174_v52  ;;  %v2459_v57 = vld [vmem:[%s4068_s3 + $0x1b8] sm:$0xff] }
 0x103   : >> { %v1125_v9 = vsel %vm697_vm6, %v1123_v51, %v1124_v62  ;;  %v1114_v17 = vadd.f32 %v1108_v60, %v1086_v4  ;;  %v1160_v18 = vmul.f32 %v1155_v10, %v3177_v53  ;;  %v1165_v19 = vrot.slane %v1159_v7, 1 }
 0x104   : >> { %v1130_v12 = vadd.f32 %v2442_v39, %v1125_v9  ;;  %v1168_v15 = vrot.slane %v3478_v11, 1  ;;  %v1183_v23 = vsel %vm593_vm2, %v1181_v2, %v1182_v8  ;;  %v3497_v24 = vmul.f32 %v1182_v8, %v3180_v54 }
 0x105   : >> { %v1193_v25 = vrot.slane %v1187_v13, 2  ;;  %v1126_v27 = vrot.slane %v1114_v17, 5  ;;  %v1166_v28 = vrot.slane %v1160_v18, 1  ;;  %v1188_v29 = vmul.f32 %v1183_v23, %v3177_v53  ;;  %v2465_v13 = vld [vmem:[%s4068_s3 + $0x1c0] sm:$0xff] }
 0x106   : >> { %2444 = vst [vmem:[%s3268_s19 + $0x40] sm:$0xff] %v1130_v12  ;;  %v1207_v30 = vmul.f32 %v2452_v14, %v3177_v53  ;;  %v1196_v31 = vrot.slane %v3497_v24, 2  ;;  %v3505_v33 = vmul.f32 %v2453_v20, %v3180_v54  ;;  %v1225_v34 = vrot.slane %v2454_v21, 7 }
 0x107   : >> { %v1226_v35 = vrot.slane %v2455_v22, 7  ;;  %v1127_v50 = vsel %vm697_vm6, %v1124_v62, %v1126_v27  ;;  %v1167_v3 = vsel %vm593_vm2, %v1165_v19, %v1166_v28  ;;  %v1169_v36 = vsel %vm593_vm2, %v1166_v28, %v1168_v15 }
 0x108   : >> { %v1194_v1 = vrot.slane %v1188_v29, 2  ;;  %v1131_v37 = vadd.f32 %v2443_v26, %v1127_v50  ;;  %v1173_v32 = vadd.f32 %v1167_v3, %v1145_v61  ;;  %v1174_v42 = vadd.f32 %v1169_v36, %v1146_v5 }
 0x109   : >> { %v1211_v43 = vrot.slane %v1207_v30, 3  ;;  %v1212_v47 = vrot.slane %v3505_v33, 3  ;;  %v1227_v48 = vsel %vm654_vm3, %v1225_v34, %v1226_v35  ;;  %v1231_v51 = vmul.f32 %v1225_v34, %v3177_v53 }
 0x10a   : >> { %v1195_v41 = vsel %vm580_vm1, %v1193_v25, %v1194_v1  ;;  %v1197_v16 = vsel %vm580_vm1, %v1194_v1, %v1196_v31  ;;  %2445 = vst [vmem:[%s3268_s19 + $0x48] sm:$0xff] %v1131_v37  ;;  %v1232_v55 = vmul.f32 %v1227_v48, %v3180_v54  ;;  %v1253_v60 = vrot.slane %v2456_v44, 6  ;;  %v2469_v37 = vld [vmem:[%s4068_s3 + $0x1e0] sm:$0xff] }
 0x10b   : >> { %v1201_v49 = vadd.f32 %v1195_v41, %v1173_v32  ;;  %v1202_v45 = vadd.f32 %v1197_v16, %v1174_v42  ;;  %v1213_v59 = vsel %vm565_vm0, %v1211_v43, %v1212_v47  ;;  %v1254_v61 = vrot.slane %v2457_v46, 6  ;;  %v2470_v46 = vld [vmem:[%s4068_s3 + $0x1e8] sm:$0xff] }
 0x10c   : >> { %v1281_v6 = vrot.slane %v2458_v58, 5  ;;  %v1237_v63 = vrot.slane %v1231_v51, 4  ;;  %v1238_v0 = vrot.slane %v1232_v55, 4  ;;  %v1259_v4 = vmul.f32 %v1253_v60, %v3177_v53  ;;  %v2471_v58 = vld [vmem:[%s4068_s3 + $0x1f0] sm:$0xff] }
 0x10d   : >> { %v1217_v39 = vadd.f32 %v1211_v43, %v1201_v49  ;;  %v1218_v62 = vadd.f32 %v1213_v59, %v1202_v45  ;;  %v1255_v2 = vsel %vm684_vm5, %v1253_v60, %v1254_v61  ;;  %v1282_v5 = vrot.slane %v2459_v57, 5  ;;  %v2461_v49 = vld [vmem:[%s3268_s19 + $0x30] sm:$0xff] }
 0x10e   : >> { %v1287_v7 = vmul.f32 %v1281_v6, %v3177_v53  ;;  %v1239_v8 = vsel %vm667_vm4, %v1237_v63, %v1238_v0  ;;  %v1260_v10 = vmul.f32 %v1255_v2, %v3180_v54  ;;  %v1147_v11 = vmul.f32 %v1140_v56, %v3180_v54  ;;  %v3549_v56 = vld [vmem:[%s4068_s3 + $0x1c8] sm:$0xff]  ;;  %v2472_v2 = vld [vmem:[%s4068_s3 + $0x1f8] sm:$0xff] }
 0x10f   : >> { %v1245_v9 = vadd.f32 %v1237_v63, %v1217_v39  ;;  %v1246_v14 = vadd.f32 %v1239_v8, %v1218_v62  ;;  %v1265_v12 = vrot.slane %v1259_v4, 5  ;;  %v1283_v17 = vsel %vm697_vm6, %v1281_v6, %v1282_v5 }
 0x110   : >> { %v1293_v18 = vrot.slane %v1287_v7, 6  ;;  %v1266_v19 = vrot.slane %v1260_v10, 5  ;;  %v1288_v20 = vmul.f32 %v1283_v17, %v3180_v54  ;;  %v1175_v21 = vadd.f32 %v1168_v15, %v1147_v11  ;;  %v2474_v10 = vld [vmem:[%s4068_s3 + $0x208] sm:$0xff] }
 0x111   : >> { %v1233_v22 = vmul.f32 %v1226_v35, %v3224_v38  ;;  %v1273_v23 = vadd.f32 %v1265_v12, %v1245_v9  ;;  %v1261_v24 = vmul.f32 %v1254_v61, %v3224_v38  ;;  %v1289_v40 = vmul.f32 %v1282_v5, %v3224_v38  ;;  %v2467_v35 = vld [vmem:[%s4068_s3 + $0x1d0] sm:$0xff]  ;;  %v2473_v9 = vld [vmem:[%s4068_s3 + $0x200] sm:$0xff] }
 0x112   : >> { %v1328_v25 = vrot.slane %v2465_v13, 3  ;;  %v1267_v26 = vsel %vm697_vm6, %v1265_v12, %v1266_v19  ;;  %v1294_v27 = vrot.slane %v1288_v20, 6  ;;  %v1203_v28 = vadd.f32 %v1196_v31, %v1175_v21  ;;  %v2468_v31 = vld [vmem:[%s4068_s3 + $0x1d8] sm:$0xff] }
 0x113   : >> { %v1240_v29 = vrot.slane %v1233_v22, 4  ;;  %v1274_v30 = vadd.f32 %v1267_v26, %v1246_v14  ;;  %v1301_v15 = vadd.f32 %v1293_v18, %v1273_v23  ;;  %v1268_v33 = vrot.slane %v1261_v24, 5  ;;  %v2462_v12 = vld [vmem:[%s3268_s19 + $0x38] sm:$0xff] }
 0x114   : >> { %v1296_v34 = vrot.slane %v1289_v40, 6  ;;  %v1295_v50 = vsel %vm684_vm5, %v1293_v18, %v1294_v27  ;;  %v1219_v3 = vadd.f32 %v1212_v47, %v1203_v28  ;;  %v1329_v1 = vrot.slane %v3549_v56, 3 }
 0x115   : >> { %v1241_v36 = vsel %vm667_vm4, %v1238_v0, %v1240_v29  ;;  %v1302_v32 = vadd.f32 %v1295_v50, %v1274_v30  ;;  %v1312_v42 = vrot.slane %v1301_v15, 5  ;;  %v1269_v43 = vsel %vm697_vm6, %v1266_v19, %v1268_v33  ;;  %v2475_v33 = vld [vmem:[%s4068_s3 + $0x210] sm:$0xff] }
 0x116   : >> { %v1297_v44 = vsel %vm684_vm5, %v1294_v27, %v1296_v34  ;;  %v1247_v41 = vadd.f32 %v1241_v36, %v1219_v3  ;;  %v1330_v16 = vsel %vm565_vm0, %v1328_v25, %v1329_v1  ;;  %v1334_v47 = vmul.f32 %v1328_v25, %v3174_v52  ;;  %v2476_v34 = vld [vmem:[%s4068_s3 + $0x218] sm:$0xff] }
 0x117   : >> { %v1342_v48 = vrot.slane %v2467_v35, 2  ;;  %v1313_v45 = vrot.slane %v1302_v32, 5  ;;  %v1335_v51 = vmul.f32 %v1330_v16, %v3177_v53  ;;  %v1343_v55 = vrot.slane %v2468_v31, 2  ;;  %v2477_v35 = vld [vmem:[%s4068_s3 + $0x220] sm:$0xff] }
 0x118   : >> { %v1370_v57 = vrot.slane %v2469_v37, 1  ;;  %v1275_v59 = vadd.f32 %v1269_v43, %v1247_v41  ;;  %v1371_v61 = vrot.slane %v2470_v46, 1  ;;  %v1396_v6 = vmul.f32 %v2471_v58, %v3177_v53  ;;  %v2478_v37 = vld [vmem:[%s4068_s3 + $0x228] sm:$0xff] }
 0x119   : >> { %v1348_v60 = vmul.f32 %v1342_v48, %v3174_v52  ;;  %v1314_v39 = vsel %vm697_vm6, %v1312_v42, %v1313_v45  ;;  %v1344_v62 = vsel %vm580_vm1, %v1342_v48, %v1343_v55  ;;  %v3583_v63 = vmul.f32 %v1343_v55, %v3180_v54 }
 0x11a   : >> { %v1376_v0 = vmul.f32 %v1370_v57, %v3174_v52  ;;  %v1319_v4 = vadd.f32 %v2461_v49, %v1314_v39  ;;  %v1303_v5 = vadd.f32 %v1297_v44, %v1275_v59  ;;  %v1349_v7 = vmul.f32 %v1344_v62, %v3177_v53  ;;  %v2484_v62 = vld [vmem:[%s4068_s3 + $0x230] sm:$0xff] }
 0x11b   : >> { %v1354_v8 = vrot.slane %v1348_v60, 1  ;;  %v1357_v11 = vrot.slane %v3583_v63, 1  ;;  %v1372_v52 = vsel %vm593_vm2, %v1370_v57, %v1371_v61  ;;  %v3599_v13 = vmul.f32 %v1371_v61, %v3180_v54 }
 0x11c   : >> { %v1382_v14 = vrot.slane %v1376_v0, 2  ;;  %2463 = vst [vmem:[%s3268_s19 + $0x30] sm:$0xff] %v1319_v4  ;;  %v1315_v17 = vrot.slane %v1303_v5, 5  ;;  %v1355_v18 = vrot.slane %v1349_v7, 1  ;;  %v1377_v19 = vmul.f32 %v1372_v52, %v3177_v53 }
 0x11d   : >> { %v3605_v20 = vmul.f32 %v2472_v2, %v3180_v54  ;;  %v1385_v21 = vrot.slane %v3599_v13, 2  ;;  %v1400_v22 = vrot.slane %v1396_v6, 3  ;;  %v1414_v23 = vrot.slane %v2473_v9, 7 }
 0x11e   : >> { %v1415_v24 = vrot.slane %v2474_v10, 7  ;;  %v1316_v40 = vsel %vm697_vm6, %v1313_v45, %v1315_v17  ;;  %v1356_v25 = vsel %vm593_vm2, %v1354_v8, %v1355_v18  ;;  %v1358_v26 = vsel %vm593_vm2, %v1355_v18, %v1357_v11  ;;  %v3650_v10 = vld [vmem:[%s4068_s3 + $0x238] sm:$0xff] }
 0x11f   : >> { %v1383_v27 = vrot.slane %v1377_v19, 2  ;;  %v1320_v28 = vadd.f32 %v2462_v12, %v1316_v40  ;;  %v1362_v29 = vadd.f32 %v1356_v25, %v1334_v47  ;;  %v1363_v30 = vadd.f32 %v1358_v26, %v1335_v51  ;;  %v2488_v40 = vld [vmem:[%s4068_s3 + $0x250] sm:$0xff]  ;;  %v2489_v25 = vld [vmem:[%s4068_s3 + $0x258] sm:$0xff] }
 0x120   : >> { %v1401_v15 = vrot.slane %v3605_v20, 3  ;;  %v1416_v36 = vsel %vm654_vm3, %v1414_v23, %v1415_v24  ;;  %v1420_v31 = vmul.f32 %v1414_v23, %v3177_v53  ;;  %v1442_v58 = vrot.slane %v2475_v33, 6  ;;  %v2487_v20 = vld [vmem:[%s4068_s3 + $0x248] sm:$0xff] }
 0x121   : >> { %v1384_v50 = vsel %vm580_vm1, %v1382_v14, %v1383_v27  ;;  %v1386_v3 = vsel %vm580_vm1, %v1383_v27, %v1385_v21  ;;  %2464 = vst [vmem:[%s3268_s19 + $0x38] sm:$0xff] %v1320_v28  ;;  %v1421_v44 = vmul.f32 %v1416_v36, %v3180_v54  ;;  %v1443_v41 = vrot.slane %v2476_v34, 6  ;;  %v3679_v36 = vld [vmem:[%s3171_s29 + $0x8] sm:$0xff] }
 0x122   : >> { %v1390_v32 = vadd.f32 %v1384_v50, %v1362_v29  ;;  %v1391_v42 = vadd.f32 %v1386_v3, %v1363_v30  ;;  %v1402_v43 = vsel %vm565_vm0, %v1400_v22, %v1401_v15  ;;  %v1426_v46 = vrot.slane %v1420_v31, 4  ;;  %v3671_v29 = vld [vmem:[%s3171_s29] sm:$0xff] }
 0x123   : >> { %v1470_v16 = vrot.slane %v2477_v35, 5  ;;  %v1427_v49 = vrot.slane %v1421_v44, 4  ;;  %v1471_v45 = vrot.slane %v2478_v37, 5  ;;  %v1444_v51 = vsel %vm684_vm5, %v1442_v58, %v1443_v41  ;;  %v2480_v50 = vld [vmem:[%s3268_s19 + $0x20] sm:$0xff] }
 0x124   : >> { %v1406_v47 = vadd.f32 %v1400_v22, %v1390_v32  ;;  %v1407_v48 = vadd.f32 %v1402_v43, %v1391_v42  ;;  %v1448_v55 = vmul.f32 %v1442_v58, %v3177_v53  ;;  %v1336_v59 = vmul.f32 %v1329_v1, %v3180_v54 }
 0x125   : >> { %v1476_v57 = vmul.f32 %v1470_v16, %v3177_v53  ;;  %v1428_v60 = vsel %vm667_vm4, %v1426_v46, %v1427_v49  ;;  %v1449_v6 = vmul.f32 %v1444_v51, %v3180_v54  ;;  %v1472_v39 = vsel %vm697_vm6, %v1470_v16, %v1471_v45  ;;  %v2492_v51 = vld [vmem:[%s4068_s3 + $0x270] sm:$0xff] }
 0x126   : >> { %v1434_v61 = vadd.f32 %v1426_v46, %v1406_v47  ;;  %v1435_v63 = vadd.f32 %v1428_v60, %v1407_v48  ;;  %v1454_v0 = vrot.slane %v1448_v55, 5  ;;  %v1477_v2 = vmul.f32 %v1472_v39, %v3180_v54  ;;  %v3685_v46 = vld [vmem:[%s3171_s29 + $0x10] sm:$0xff] }
 0x127   : >> { %v1482_v53 = vrot.slane %v1476_v57, 6  ;;  %v1455_v4 = vrot.slane %v1449_v6, 5  ;;  %v1364_v5 = vadd.f32 %v1357_v11, %v1336_v59  ;;  %v1422_v56 = vmul.f32 %v1415_v24, %v3224_v38 }
 0x128   : >> { %v1450_v1 = vmul.f32 %v1443_v41, %v3224_v38  ;;  %v1462_v7 = vadd.f32 %v1454_v0, %v1434_v61  ;;  %v1483_v8 = vrot.slane %v1477_v2, 6  ;;  %v1478_v9 = vmul.f32 %v1471_v45, %v3224_v38  ;;  %v2486_v38 = vld [vmem:[%s4068_s3 + $0x240] sm:$0xff]  ;;  %v2491_v45 = vld [vmem:[%s4068_s3 + $0x268] sm:$0xff] }
 0x129   : >> { %v1517_v52 = vrot.slane %v2484_v62, 3  ;;  %v1456_v13 = vsel %vm697_vm6, %v1454_v0, %v1455_v4  ;;  %v1392_v54 = vadd.f32 %v1385_v21, %v1364_v5  ;;  %v1429_v14 = vrot.slane %v1422_v56, 4 }
 0x12a   : >> { %v1457_v12 = vrot.slane %v1450_v1, 5  ;;  %v1463_v11 = vadd.f32 %v1456_v13, %v1435_v63  ;;  %v1484_v17 = vsel %vm684_vm5, %v1482_v53, %v1483_v8  ;;  %v1490_v18 = vadd.f32 %v1482_v53, %v1462_v7  ;;  %v2481_v63 = vld [vmem:[%s3268_s19 + $0x28] sm:$0xff] }
 0x12b   : >> { %v1485_v19 = vrot.slane %v1478_v9, 6  ;;  %v1408_v22 = vadd.f32 %v1401_v15, %v1392_v54  ;;  %v1430_v21 = vsel %vm667_vm4, %v1427_v49, %v1429_v14  ;;  %v1518_v24 = vrot.slane %v3650_v10, 3  ;;  %v2490_v49 = vld [vmem:[%s4068_s3 + $0x260] sm:$0xff] }
 0x12c   : >> { %v1458_v23 = vsel %vm697_vm6, %v1455_v4, %v1457_v12  ;;  %v1491_v26 = vadd.f32 %v1484_v17, %v1463_v11  ;;  %v1501_v27 = vrot.slane %v1490_v18, 5  ;;  %v1523_v30 = vmul.f32 %v3671_v29, %v1517_v52  ;;  %v2494_v14 = vld [vmem:[%s4068_s3 + $0x280] sm:$0xff]  ;;  %v2495_v12 = vld [vmem:[%s4068_s3 + $0x288] sm:$0xff]  ;;  %v2496_v11 = vld [vmem:[%s4068_s3 + $0x290] sm:$0xff] }
 0x12d   : >> { %v1486_v28 = vsel %vm684_vm5, %v1483_v8, %v1485_v19  ;;  %v1436_v15 = vadd.f32 %v1430_v21, %v1408_v22  ;;  %v1519_v33 = vsel %vm565_vm0, %v1517_v52, %v1518_v24  ;;  %v1531_v34 = vrot.slane %v2486_v38, 2  ;;  %v2493_v8 = vld [vmem:[%s4068_s3 + $0x278] sm:$0xff] }
 0x12e   : >> { %v1532_v35 = vrot.slane %v2487_v20, 2  ;;  %v1502_v3 = vrot.slane %v1491_v26, 5  ;;  %v1524_v31 = vmul.f32 %v3679_v36, %v1519_v33  ;;  %v1559_v37 = vrot.slane %v2488_v40, 1  ;;  %v2497_v40 = vld [vmem:[%s4068_s3 + $0x298] sm:$0xff] }
 0x12f   : >> { %v1560_v32 = vrot.slane %v2489_v25, 1  ;;  %v1464_v42 = vadd.f32 %v1458_v23, %v1436_v15  ;;  %v1537_v44 = vmul.f32 %v3671_v29, %v1531_v34  ;;  %v1585_v2 = vmul.f32 %v3679_v36, %v2490_v49 }
 0x130   : >> { %v1533_v43 = vsel %vm580_vm1, %v1531_v34, %v1532_v35  ;;  %v3688_v58 = vmul.f32 %v3685_v46, %v1532_v35  ;;  %v1503_v41 = vsel %vm697_vm6, %v1501_v27, %v1502_v3  ;;  %v1565_v48 = vmul.f32 %v3671_v29, %v1559_v37 }
 0x131   : >> { %v1538_v16 = vmul.f32 %v3679_v36, %v1533_v43  ;;  %v1561_v47 = vsel %vm593_vm2, %v1559_v37, %v1560_v32  ;;  %v1508_v55 = vadd.f32 %v2480_v50, %v1503_v41  ;;  %v1492_v57 = vadd.f32 %v1486_v28, %v1464_v42 }
 0x132   : >> { %v1543_v59 = vrot.slane %v1537_v44, 1  ;;  %v1546_v60 = vrot.slane %v3688_v58, 1  ;;  %v1566_v6 = vmul.f32 %v3679_v36, %v1561_v47  ;;  %v3706_v39 = vmul.f32 %v3685_v46, %v1560_v32 }
 0x133   : >> { %v1544_v61 = vrot.slane %v1538_v16, 1  ;;  %v1571_v62 = vrot.slane %v1565_v48, 2  ;;  %2482 = vst [vmem:[%s3268_s19 + $0x20] sm:$0xff] %v1508_v55  ;;  %v1504_v0 = vrot.slane %v1492_v57, 5  ;;  %v3712_v53 = vmul.f32 %v3685_v46, %v2491_v45  ;;  %v3750_v16 = vld [vmem:[%s3171_s29 + $0x18] sm:$0x7] }
 0x134   : >> { %v1603_v4 = vrot.slane %v2492_v51, 7  ;;  %v1572_v1 = vrot.slane %v1566_v6, 2  ;;  %v1574_v7 = vrot.slane %v3706_v39, 2  ;;  %v1589_v54 = vrot.slane %v1585_v2, 3  ;;  %s2706_s29 = scalar_lea.hbm (%p551_p6), %s4072_s7, 512 }
 0x135   : >> { %v1545_v5 = vsel %vm593_vm2, %v1543_v59, %v1544_v61  ;;  %v1547_v56 = vsel %vm593_vm2, %v1544_v61, %v1546_v60  ;;  %v1505_v9 = vsel %vm697_vm6, %v1502_v3, %v1504_v0  ;;  %v1590_v38 = vrot.slane %v3712_v53, 3  ;;  %p2708_p3 = scmp.lt.s32.totalorder (%p551_p6), %s2706_s29, %s2702_s10 }
 0x136   : >> { %v1551_v52 = vadd.f32 %v1545_v5, %v1523_v30  ;;  %v1552_v13 = vadd.f32 %v1547_v56, %v1524_v31  ;;  %v1509_v17 = vadd.f32 %v2481_v63, %v1505_v9  ;;  %v1573_v18 = vsel %vm580_vm1, %v1571_v62, %v1572_v1  ;;  %v3763_v63 = vld [vmem:[%s4068_s3 + $0x2a8] sm:$0xff]  ;;  %v2507_v9 = vld [vmem:[%s4068_s3 + $0x2c0] sm:$0xff] }
 0x137   : >> { %v1575_v19 = vsel %vm580_vm1, %v1572_v1, %v1574_v7  ;;  %v1604_v21 = vrot.slane %v2493_v8, 7  ;;  %v1609_v23 = vmul.f32 %v3679_v36, %v1603_v4  ;;  %v1591_v25 = vsel %vm565_vm0, %v1589_v54, %v1590_v38  ;;  %v2506_v8 = vld [vmem:[%s4068_s3 + $0x2b8] sm:$0xff]  ;;  %p2709_p4 = por (%p551_p6), %p2708_p3, %p2707_p1 }
 0x138   : >> { %v1579_v20 = vadd.f32 %v1573_v18, %v1551_v52  ;;  %v1580_v22 = vadd.f32 %v1575_v19, %v1552_v13  ;;  %2483 = vst [vmem:[%s3268_s19 + $0x28] sm:$0xff] %v1509_v17  ;;  %v1631_v26 = vrot.slane %v2494_v14, 6  ;;  %v1632_v27 = vrot.slane %v2495_v12, 6  ;;  %v2508_v19 = vld [vmem:[%s4068_s3 + $0x2c8] sm:$0xff] }
 0x139   : >> { %v1659_v28 = vrot.slane %v2496_v11, 5  ;;  %v1605_v33 = vsel %vm654_vm3, %v1603_v4, %v1604_v21  ;;  %v1615_v34 = vrot.slane %v1609_v23, 4  ;;  %v1660_v31 = vrot.slane %v2497_v40, 5  ;;  %v2505_v4 = vld [vmem:[%s4068_s3 + $0x2b0] sm:$0xff]  ;;  %p2710_p7 = pnand (%p551_p6), %p2709_p4, %p2705_p0 }
 0x13a   : >> { %v1595_v30 = vadd.f32 %v1589_v54, %v1579_v20  ;;  %v1596_v15 = vadd.f32 %v1591_v25, %v1580_v22  ;;  %v1610_v35 = vmul.f32 %v3685_v46, %v1605_v33  ;;  %v1633_v50 = vsel %vm684_vm5, %v1631_v26, %v1632_v27  ;;  %v2499_v23 = vld [vmem:[%s3268_s19 + $0x10] sm:$0xff] }
 0x13b   : >> { %v1637_v3 = vmul.f32 %v3679_v36, %v1631_v26  ;;  %v1638_v32 = vmul.f32 %v3685_v46, %v1633_v50  ;;  %v1665_v42 = vmul.f32 %v3679_v36, %v1659_v28  ;;  %v1525_v43 = vmul.f32 %v3685_v46, %v1518_v24  ;;  %v2503_v24 = vld [vmem:[%s4068_s3 + $0x2a0] sm:$0xff] }
 0x13c   : >> { %v1623_v37 = vadd.f32 %v1615_v34, %v1595_v30  ;;  %v1616_v44 = vrot.slane %v1610_v35, 4  ;;  %v1661_v41 = vsel %vm697_vm6, %v1659_v28, %v1660_v31  ;;  %v1611_v47 = vmul.f32 %v3750_v16, %v1604_v21 }
 0x13d   : >> { %v1643_v58 = vrot.slane %v1637_v3, 5  ;;  %v1644_v48 = vrot.slane %v1638_v32, 5  ;;  %v1666_v49 = vmul.f32 %v3685_v46, %v1661_v41  ;;  %v1671_v45 = vrot.slane %v1665_v42, 6  ;;  %v2511_v32 = vld [vmem:[%s4068_s3 + $0x2e0] sm:$0xff] }
 0x13e   : >> { %v1553_v51 = vadd.f32 %v1546_v60, %v1525_v43  ;;  %v1617_v55 = vsel %vm667_vm4, %v1615_v34, %v1616_v44  ;;  %v1618_v59 = vrot.slane %v1611_v47, 4  ;;  %v1639_v10 = vmul.f32 %v3750_v16, %v1632_v27 }
 0x13f   : >> { %v1651_v57 = vadd.f32 %v1643_v58, %v1623_v37  ;;  %v1624_v61 = vadd.f32 %v1617_v55, %v1596_v15  ;;  %v1645_v6 = vsel %vm697_vm6, %v1643_v58, %v1644_v48  ;;  %v1672_v39 = vrot.slane %v1666_v49, 6  ;;  %v2510_v37 = vld [vmem:[%s4068_s3 + $0x2d8] sm:$0xff] }
 0x140   : >> { %v1581_v62 = vadd.f32 %v1574_v7, %v1553_v51  ;;  %v1619_v0 = vsel %vm667_vm4, %v1616_v44, %v1618_v59  ;;  %v1646_v2 = vrot.slane %v1639_v10, 5  ;;  %v1667_v53 = vmul.f32 %v3750_v16, %v1660_v31  ;;  %v2509_v31 = vld [vmem:[%s4068_s3 + $0x2d0] sm:$0xff]  ;;  %v2500_v58 = vld [vmem:[%s3268_s19 + $0x18] sm:$0xff] }
 0x141   : >> { %v1679_v60 = vadd.f32 %v1671_v45, %v1651_v57  ;;  %v1652_v5 = vadd.f32 %v1645_v6, %v1624_v61  ;;  %v1673_v56 = vsel %vm684_vm5, %v1671_v45, %v1672_v39  ;;  %v1706_v7 = vrot.slane %v2503_v24, 3  ;;  %v2512_v57 = vld [vmem:[%s4068_s3 + $0x2e8] sm:$0xff] }
 0x142   : >> { %v1597_v1 = vadd.f32 %v1590_v38, %v1581_v62  ;;  %v1647_v13 = vsel %vm697_vm6, %v1644_v48, %v1646_v2  ;;  %v1674_v54 = vrot.slane %v1667_v53, 6  ;;  %v1707_v14 = vrot.slane %v3763_v63, 3  ;;  %v2514_v53 = vld [vmem:[%s4068_s3 + $0x2f8] sm:$0xff] }
 0x143   : >> { %v1690_v52 = vrot.slane %v1679_v60, 5  ;;  %v1680_v12 = vadd.f32 %v1673_v56, %v1652_v5  ;;  %v1712_v17 = vmul.f32 %v3671_v29, %v1706_v7  ;;  %v1720_v18 = vrot.slane %v2505_v4, 2  ;;  %v2515_v4 = vld [vmem:[%s4068_s3 + $0x300] sm:$0xff] }
 0x144   : >> { %v1625_v11 = vadd.f32 %v1619_v0, %v1597_v1  ;;  %v1675_v38 = vsel %vm684_vm5, %v1672_v39, %v1674_v54  ;;  %v1708_v20 = vsel %vm565_vm0, %v1706_v7, %v1707_v14  ;;  %v1721_v22 = vrot.slane %v2506_v8, 2  ;;  %v2513_v39 = vld [vmem:[%s4068_s3 + $0x2f0] sm:$0xff]  ;;  %v2516_v54 = vld [vmem:[%s4068_s3 + $0x308] sm:$0xff] }
 0x145   : >> { %v1748_v21 = vrot.slane %v2507_v9, 1  ;;  %v1691_v40 = vrot.slane %v1680_v12, 5  ;;  %v1713_v26 = vmul.f32 %v3679_v36, %v1708_v20  ;;  %v1726_v27 = vmul.f32 %v3671_v29, %v1720_v18 }
 0x146   : >> { %v1653_v25 = vadd.f32 %v1647_v13, %v1625_v11  ;;  %v1722_v28 = vsel %vm580_vm1, %v1720_v18, %v1721_v22  ;;  %v3792_v30 = vmul.f32 %v3685_v46, %v1721_v22  ;;  %v1749_v15 = vrot.slane %v2508_v19, 1 }
 0x147   : >> { %v1754_v33 = vmul.f32 %v3671_v29, %v1748_v21  ;;  %v1692_v34 = vsel %vm697_vm6, %v1690_v52, %v1691_v40  ;;  %v1727_v50 = vmul.f32 %v3679_v36, %v1722_v28  ;;  %v1732_v3 = vrot.slane %v1726_v27, 1 }
 0x148   : >> { %v1681_v35 = vadd.f32 %v1675_v38, %v1653_v25  ;;  %v1697_v29 = vadd.f32 %v2499_v23, %v1692_v34  ;;  %v1735_v42 = vrot.slane %v3792_v30, 1  ;;  %v1750_v43 = vsel %vm593_vm2, %v1748_v21, %v1749_v15 }
 0x149   : >> { %v3809_v44 = vmul.f32 %v3685_v46, %v1749_v15  ;;  %v1733_v47 = vrot.slane %v1727_v50, 1  ;;  %v1755_v48 = vmul.f32 %v3679_v36, %v1750_v43  ;;  %v1760_v49 = vrot.slane %v1754_v33, 2 }
 0x14a   : >> { %v1693_v41 = vrot.slane %v1681_v35, 5  ;;  %2501 = vst [vmem:[%s3268_s19 + $0x10] sm:$0xff] %v1697_v29  ;;  %v1774_v51 = vmul.f32 %v3679_v36, %v2509_v31  ;;  %v1775_v55 = vmul.f32 %v3685_v46, %v2510_v37  ;;  %v1792_v59 = vrot.slane %v2511_v32, 7 }
 0x14b   : >> { %v1763_v45 = vrot.slane %v3809_v44, 2  ;;  %v1734_v24 = vsel %vm593_vm2, %v1732_v3, %v1733_v47  ;;  %v1736_v61 = vsel %vm593_vm2, %v1733_v47, %v1735_v42  ;;  %v1761_v6 = vrot.slane %v1755_v48, 2 }
 0x14c   : >> { %v1694_v10 = vsel %vm697_vm6, %v1691_v40, %v1693_v41  ;;  %v1740_v60 = vadd.f32 %v1734_v24, %v1712_v17  ;;  %v1741_v0 = vadd.f32 %v1736_v61, %v1713_v26  ;;  %v1778_v2 = vrot.slane %v1774_v51, 3 }
 0x14d   : >> { %v1698_v62 = vadd.f32 %v2500_v58, %v1694_v10  ;;  %v1762_v5 = vsel %vm580_vm1, %v1760_v49, %v1761_v6  ;;  %v1764_v56 = vsel %vm580_vm1, %v1761_v6, %v1763_v45  ;;  %v1779_v1 = vrot.slane %v1775_v55, 3 }
 0x14e   : >> { %v1793_v7 = vrot.slane %v2512_v57, 7  ;;  %v1768_v8 = vadd.f32 %v1762_v5, %v1740_v60  ;;  %v1769_v9 = vadd.f32 %v1764_v56, %v1741_v0  ;;  %v1798_v52 = vmul.f32 %v3679_v36, %v1792_v59  ;;  %v1874_v60 = vld [vmem:[%s3268_s19 + $0x8] sm:$0xff]  ;;  %v2562_v5 = vld [vmem:[%s4070_s5 + $0x30] sm:$0xff] (%p551_p6) }
 0x14f   : >> { %2502 = vst [vmem:[%s3268_s19 + $0x18] sm:$0xff] %v1698_v62  ;;  %v1820_v13 = vrot.slane %v2513_v39, 6  ;;  %v1780_v12 = vsel %vm565_vm0, %v1778_v2, %v1779_v1  ;;  %v1821_v17 = vrot.slane %v2514_v53, 6  ;;  %v1848_v18 = vrot.slane %v2515_v4, 5  ;;  %v2563_v4 = vld [vmem:[%s4070_s5 + $0x38] sm:$0xff] (%p551_p6)  ;;  %v2561_v56 = vld [vmem:[%s4070_s5 + $0x28] sm:$0xff] (%p551_p6) }
 0x150   : >> { %v1794_v11 = vsel %vm654_vm3, %v1792_v59, %v1793_v7  ;;  %v1784_v19 = vadd.f32 %v1778_v2, %v1768_v8  ;;  %v1785_v38 = vadd.f32 %v1780_v12, %v1769_v9  ;;  %v1804_v22 = vrot.slane %v1798_v52, 4  ;;  %2076 = vmatpush.bf16.msra.mxu0 (%p551_p6), %v2563_v4  ;;  %2565 = vmatpush.bf16.msra.mxu1 (%p551_p6), %v2563_v4  ;;  %v3887_v8 = vld [vmem:[%s4069_s4] ss:$0 sm:$0xff] (%p551_p6)  ;;  %v2558_v9 = vld [vmem:[%s4070_s5 + $0x10] sm:$0xff] (%p551_p6) }
 0x151   : >> { %v1799_v20 = vmul.f32 %v3685_v46, %v1794_v11  ;;  %v1822_v21 = vsel %vm684_vm5, %v1820_v13, %v1821_v17  ;;  %v1826_v23 = vmul.f32 %v3679_v36, %v1820_v13  ;;  %v1849_v40 = vrot.slane %v2516_v54, 5  ;;  %2566 = vmatpush.bf16.msra.mxu2 (%p551_p6), %v2563_v4  ;;  %2567 = vmatpush.bf16.msra.mxu3 (%p551_p6), %v2563_v4 }
 0x152   : >> { %v1854_v25 = vmul.f32 %v3679_v36, %v1848_v18  ;;  %v1812_v27 = vadd.f32 %v1804_v22, %v1784_v19  ;;  %v1827_v28 = vmul.f32 %v3685_v46, %v1822_v21  ;;  %v1714_v30 = vmul.f32 %v3685_v46, %v1707_v14 }
 0x153   : >> { %v1805_v26 = vrot.slane %v1799_v20, 4  ;;  %v1832_v15 = vrot.slane %v1826_v23, 5  ;;  %v1850_v33 = vsel %vm697_vm6, %v1848_v18, %v1849_v40  ;;  %v1800_v35 = vmul.f32 %v3750_v16, %v1793_v7  ;;  %v2559_v7 = vld [vmem:[%s4070_s5 + $0x18] sm:$0xff] (%p551_p6) }
 0x154   : >> { %v1860_v34 = vrot.slane %v1854_v25, 6  ;;  %v1833_v3 = vrot.slane %v1827_v28, 5  ;;  %v1855_v31 = vmul.f32 %v3685_v46, %v1850_v33  ;;  %v1742_v36 = vadd.f32 %v1735_v42, %v1714_v30  ;;  %2077 = vmatpush.bf16.msra.mxu0 (%p551_p6), %v2562_v5  ;;  %2568 = vmatpush.bf16.msra.mxu1 (%p551_p6), %v2562_v5 }
 0x155   : >> { %v1806_v50 = vsel %vm667_vm4, %v1804_v22, %v1805_v26  ;;  %v1840_v32 = vadd.f32 %v1832_v15, %v1812_v27  ;;  %v1807_v29 = vrot.slane %v1800_v35, 4  ;;  %v1828_v43 = vmul.f32 %v3750_v16, %v1821_v17  ;;  %2569 = vmatpush.bf16.msra.mxu2 (%p551_p6), %v2562_v5  ;;  %2570 = vmatpush.bf16.msra.mxu3 (%p551_p6), %v2562_v5 }
 0x156   : >> { %v1813_v37 = vadd.f32 %v1806_v50, %v1785_v38  ;;  %v1834_v63 = vsel %vm697_vm6, %v1832_v15, %v1833_v3  ;;  %v1861_v14 = vrot.slane %v1855_v31, 6  ;;  %v1770_v44 = vadd.f32 %v1763_v45, %v1742_v36  ;;  %v1873_v45 = vld [vmem:[%s3268_s19] sm:$0xff] }
 0x157   : >> { %v1856_v58 = vmul.f32 %v3750_v16, %v1849_v40  ;;  %v1868_v47 = vadd.f32 %v1860_v34, %v1840_v32  ;;  %v1808_v48 = vsel %vm667_vm4, %v1805_v26, %v1807_v29  ;;  %v1835_v49 = vrot.slane %v1828_v43, 5  ;;  %v2557_v40 = vld [vmem:[%s4070_s5 + $0x8] sm:$0xff] (%p551_p6) }
 0x158   : >> { %v1841_v41 = vadd.f32 %v1834_v63, %v1813_v37  ;;  %v1862_v46 = vsel %vm684_vm5, %v1860_v34, %v1861_v14  ;;  %v1786_v42 = vadd.f32 %v1779_v1, %v1770_v44  ;;  %2078 = vmatpush.bf16.msra.mxu0 (%p551_p6), %v2561_v56  ;;  %2571 = vmatpush.bf16.msra.mxu1 (%p551_p6), %v2561_v56  ;;  %v2560_v1 = vld [vmem:[%s4070_s5 + $0x20] sm:$0xff] (%p551_p6) }
 0x159   : >> { %v1863_v51 = vrot.slane %v1856_v58, 6  ;;  %v1878_v57 = vrot.slane %v1868_v47, 5  ;;  %v1836_v59 = vsel %vm697_vm6, %v1833_v3, %v1835_v49  ;;  %2572 = vmatpush.bf16.msra.mxu2 (%p551_p6), %v2561_v56  ;;  %2573 = vmatpush.bf16.msra.mxu3 (%p551_p6), %v2561_v56  ;;  %v2556_v34 = vld [vmem:[%s4070_s5] sm:$0xff] (%p551_p6) }
 0x15a   : >> { %v1869_v55 = vadd.f32 %v1862_v46, %v1841_v41  ;;  %v1814_v10 = vadd.f32 %v1808_v48, %v1786_v42 }
 0x15b   : >> { %v1864_v16 = vsel %vm684_vm5, %v1861_v14, %v1863_v51 }
 0x15c   : >> { %v1879_v24 = vrot.slane %v1869_v55, 5  ;;  %v1842_v61 = vadd.f32 %v1836_v59, %v1814_v10  ;;  %2079 = vmatpush.bf16.msra.mxu0 (%p551_p6), %v2560_v1  ;;  %2574 = vmatpush.bf16.msra.mxu1 (%p551_p6), %v2560_v1 }
 0x15d   : > { %2575 = vmatpush.bf16.msra.mxu2 (%p551_p6), %v2560_v1  ;;  %2576 = vmatpush.bf16.msra.mxu3 (%p551_p6), %v2560_v1 }
 0x15e   : >> { %v1880_v6 = vsel %vm697_vm6, %v1878_v57, %v1879_v24  ;;  %v1870_v62 = vadd.f32 %v1864_v16, %v1842_v61 }
 0x15f   : >> { %v1885_v39 = vadd.f32 %v1880_v6, %v1873_v45 }
 0x160   : >> { %v1881_v0 = vrot.slane %v1870_v62, 5  ;;  %2080 = vmatpush.bf16.msra.mxu0 (%p551_p6), %v2559_v7  ;;  %2577 = vmatpush.bf16.msra.mxu1 (%p551_p6), %v2559_v7 }
 0x161   : >> { %1887 = vst [vmem:[%s3268_s19] sm:$0xff] %v1885_v39  ;;  %553 = sbr.rel (!%p551_p6) target bundleno = 186 (0xba), region = 161  ;;  %2578 = vmatpush.bf16.msra.mxu2 (%p551_p6), %v2559_v7  ;;  %2579 = vmatpush.bf16.msra.mxu3 (%p551_p6), %v2559_v7 }
 0x162   : >> { %v1882_v2 = vsel %vm697_vm6, %v1879_v24, %v1881_v0 }
 0x163   : >> { %v1886_v53 = vadd.f32 %v1882_v2, %v1874_v60 }
 0x164   : > { %2081 = vmatpush.bf16.msra.mxu0 (%p551_p6), %v2558_v9  ;;  %2580 = vmatpush.bf16.msra.mxu1 (%p551_p6), %v2558_v9 }
 0x165   : >> { %1888 = vst [vmem:[%s3268_s19 + $0x8] sm:$0xff] %v1886_v53  ;;  %2581 = vmatpush.bf16.msra.mxu2 (%p551_p6), %v2558_v9  ;;  %2582 = vmatpush.bf16.msra.mxu3 (%p551_p6), %v2558_v9 }
 0x168   : > { %2082 = vmatpush.bf16.msra.mxu0 %v2557_v40  ;;  %2583 = vmatpush.bf16.msra.mxu1 %v2557_v40 }
 0x169   : > { %2584 = vmatpush.bf16.msra.mxu2 %v2557_v40  ;;  %2585 = vmatpush.bf16.msra.mxu3 %v2557_v40 }
 0x16c   : > { %v1910_v52 = vld [vmem:[#allocation3 + $0x60] sm:$0xff]  ;;  %v1911_v13 = vld [vmem:[#allocation3 + $0x68] sm:$0xff]  ;;  %2083 = vmatpush.bf16.msra.mxu0 %v2556_v34  ;;  %2586 = vmatpush.bf16.msra.mxu1 %v2556_v34  ;;  %v1912_v43 = vld [vmem:[#allocation3 + $0x70] sm:$0xff] }
 0x16d   : > { %v1918_v54 = vld [vmem:[#allocation3 + $0xa0] sm:$0xff]  ;;  %v1919_v12 = vld [vmem:[#allocation3 + $0xa8] sm:$0xff]  ;;  %v1945_v38 = vadd.f32 %v3887_v8, %v1910_v52  ;;  %v1946_v20 = vadd.f32 %v3887_v8, %v1911_v13  ;;  %2587 = vmatpush.bf16.msra.mxu2 %v2556_v34  ;;  %2588 = vmatpush.bf16.msra.mxu3 %v2556_v34  ;;  %v1913_v63 = vld [vmem:[#allocation3 + $0x78] sm:$0xff]  ;;  %v1947_v49 = vadd.f32 %v3887_v8, %v1912_v43 }
 0x16e   : > { %v1926_v11 = vld [vmem:[#allocation3 + $0xe0] sm:$0xff]  ;;  %v1927_v17 = vld [vmem:[#allocation3 + $0xe8] sm:$0xff]  ;;  %v1953_v22 = vadd.f32 %v3887_v8, %v1918_v54  ;;  %v1954_v21 = vadd.f32 %v3887_v8, %v1919_v12  ;;  %v1920_v14 = vld [vmem:[#allocation3 + $0xb0] sm:$0xff]  ;;  %v1948_v46 = vadd.f32 %v3887_v8, %v1913_v63 }
 0x16f   : > { %v1934_v18 = vld [vmem:[#allocation3 + $0x120] sm:$0xff]  ;;  %v1935_v19 = vld [vmem:[#allocation3 + $0x128] sm:$0xff]  ;;  %v1961_v23 = vadd.f32 %v3887_v8, %v1926_v11  ;;  %v1962_v25 = vadd.f32 %v3887_v8, %v1927_v17  ;;  %v1977_v28 = vmax.f32 %v1945_v38, 0.0  ;;  %v1978_v30 = vmax.f32 %v1946_v20, 0.0  ;;  %v1921_v44 = vld [vmem:[#allocation3 + $0xb8] sm:$0xff] }
 0x170   : > { %v1969_v26 = vadd.f32 %v3887_v8, %v1934_v18  ;;  %v1970_v27 = vadd.f32 %v3887_v8, %v1935_v19  ;;  %v1985_v15 = vmax.f32 %v1953_v22, 0.0  ;;  %v1986_v33 = vmax.f32 %v1954_v21, 0.0  ;;  %v1928_v58 = vld [vmem:[#allocation3 + $0xf0] sm:$0xff]  ;;  %v1929_v41 = vld [vmem:[#allocation3 + $0xf8] sm:$0xff]  ;;  %v1914_v5 = vld [vmem:[#allocation3 + $0x80] sm:$0xff] }
 0x171   : > { %v1993_v35 = vmax.f32 %v1961_v23, 0.0  ;;  %v1994_v50 = vmax.f32 %v1962_v25, 0.0  ;;  %v2009_v36 = vpack.c.bf16 %v1978_v30, %v1977_v28  ;;  %v1936_v47 = vld [vmem:[#allocation3 + $0x130] sm:$0xff]  ;;  %v1937_v48 = vld [vmem:[#allocation3 + $0x138] sm:$0xff]  ;;  %v1955_v42 = vadd.f32 %v3887_v8, %v1920_v14  ;;  %v1915_v56 = vld [vmem:[#allocation3 + $0x88] sm:$0xff] }
 0x172   : > { %v2001_v3 = vmax.f32 %v1969_v26, 0.0  ;;  %v2002_v31 = vmax.f32 %v1970_v27, 0.0  ;;  %v2013_v37 = vpack.c.bf16 %v1986_v33, %v1985_v15  ;;  %v1956_v51 = vadd.f32 %v3887_v8, %v1921_v44  ;;  %v1922_v1 = vld [vmem:[#allocation3 + $0xc0] sm:$0xff]  ;;  %v1923_v7 = vld [vmem:[#allocation3 + $0xc8] sm:$0xff]  ;;  %v1941_v43 = vld [vmem:[#allocation3 + $0x158] sm:$0xff] }
 0x173   : > { %v2017_v32 = vpack.c.bf16 %v1994_v50, %v1993_v35  ;;  %2084 = vmatmul.bf16.vlgmr.msra.gmra.mxu0 %v2009_v36  ;;  %v1963_v55 = vadd.f32 %v3887_v8, %v1928_v58  ;;  %v1964_v57 = vadd.f32 %v3887_v8, %v1929_v41  ;;  %v1971_v59 = vadd.f32 %v3887_v8, %v1936_v47  ;;  %v1930_v9 = vld [vmem:[#allocation3 + $0x100] sm:$0xff]  ;;  %v1931_v52 = vld [vmem:[#allocation3 + $0x108] sm:$0xff]  ;;  %v1916_v50 = vld [vmem:[#allocation3 + $0x90] sm:$0xff] }
 0x174   : > { %v2021_v29 = vpack.c.bf16 %v2002_v31, %v2001_v3  ;;  %2104 = vmatmul.bf16.vlgmr.msra.gmra.mxu1 %v2013_v37  ;;  %v1972_v10 = vadd.f32 %v3887_v8, %v1937_v48  ;;  %v1979_v45 = vmax.f32 %v1947_v49, 0.0  ;;  %v1980_v24 = vmax.f32 %v1948_v46, 0.0  ;;  %v1938_v13 = vld [vmem:[#allocation3 + $0x140] sm:$0xff]  ;;  %v1939_v54 = vld [vmem:[#allocation3 + $0x148] sm:$0xff]  ;;  %v1917_v3 = vld [vmem:[#allocation3 + $0x98] sm:$0xff] }
 0x175   : > { %2124 = vmatmul.bf16.vlgmr.msra.gmra.mxu2 %v2017_v32  ;;  %v1987_v16 = vmax.f32 %v1955_v42, 0.0  ;;  %v1988_v61 = vmax.f32 %v1956_v51, 0.0  ;;  %v1995_v6 = vmax.f32 %v1963_v55, 0.0  ;;  %v1996_v39 = vmax.f32 %v1964_v57, 0.0  ;;  %v1924_v31 = vld [vmem:[#allocation3 + $0xd0] sm:$0xff]  ;;  %v1925_v36 = vld [vmem:[#allocation3 + $0xd8] sm:$0xff] }
 0x176   : > { %2144 = vmatmul.bf16.vlgmr.msra.gmra.mxu3 %v2021_v29  ;;  %v2003_v62 = vmax.f32 %v1971_v59, 0.0  ;;  %v2004_v60 = vmax.f32 %v1972_v10, 0.0  ;;  %v2010_v0 = vpack.c.bf16 %v1980_v24, %v1979_v45  ;;  %v1949_v12 = vadd.f32 %v3887_v8, %v1914_v5  ;;  %v1932_v37 = vld [vmem:[#allocation3 + $0x110] sm:$0xff]  ;;  %v1933_v32 = vld [vmem:[#allocation3 + $0x118] sm:$0xff] }
 0x177   : > { %v2014_v2 = vpack.c.bf16 %v1988_v61, %v1987_v16  ;;  %v2018_v53 = vpack.c.bf16 %v1996_v39, %v1995_v6  ;;  %v1950_v11 = vadd.f32 %v3887_v8, %v1915_v56  ;;  %v1957_v17 = vadd.f32 %v3887_v8, %v1922_v1  ;;  %v1940_v29 = vld [vmem:[#allocation3 + $0x150] sm:$0xff]  ;;  %v2183_v1 = vld [vmem:[%s2899_s16 + $0x80] sm:$0xff] }
 0x178   : > { %v2022_v4 = vpack.c.bf16 %v2004_v60, %v2003_v62  ;;  %v1958_v18 = vadd.f32 %v3887_v8, %v1923_v7  ;;  %v1965_v19 = vadd.f32 %v3887_v8, %v1930_v9  ;;  %v1966_v38 = vadd.f32 %v3887_v8, %v1931_v52  ;;  %v2167_v62 = vld [vmem:[%s2899_s16] sm:$0xff] }
 0x179   : > { %v1973_v20 = vadd.f32 %v3887_v8, %v1938_v13  ;;  %v1974_v22 = vadd.f32 %v3887_v8, %v1939_v54  ;;  %v1981_v21 = vmax.f32 %v1949_v12, 0.0  ;;  %v1982_v23 = vmax.f32 %v1950_v11, 0.0  ;;  %v2191_v9 = vld [vmem:[%s2899_s16 + $0xc0] sm:$0xff]  ;;  %v2168_v12 = vld [vmem:[%s2899_s16 + $0x8] sm:$0xff] }
 0x17a   : > { %v1989_v40 = vmax.f32 %v1957_v17, 0.0  ;;  %v1990_v25 = vmax.f32 %v1958_v18, 0.0  ;;  %v1997_v26 = vmax.f32 %v1965_v19, 0.0  ;;  %v1998_v27 = vmax.f32 %v1966_v38, 0.0  ;;  %v2176_v17 = vld [vmem:[%s2899_s16 + $0x48] sm:$0xff] }
 0x17b   : > { %v2005_v28 = vmax.f32 %v1973_v20, 0.0  ;;  %v2006_v30 = vmax.f32 %v1974_v22, 0.0  ;;  %v2011_v15 = vpack.c.bf16 %v1982_v23, %v1981_v21  ;;  %v1951_v63 = vadd.f32 %v3887_v8, %v1916_v50 }
 0x17c   : > { %v2015_v33 = vpack.c.bf16 %v1990_v25, %v1989_v40  ;;  %v2019_v34 = vpack.c.bf16 %v1998_v27, %v1997_v26  ;;  %v1952_v14 = vadd.f32 %v3887_v8, %v1917_v3  ;;  %v1959_v44 = vadd.f32 %v3887_v8, %v1924_v31  ;;  %v2184_v40 = vld [vmem:[%s2899_s16 + $0x88] sm:$0xff] }
 0x17d   : > { %v2023_v35 = vpack.c.bf16 %v2006_v30, %v2005_v28  ;;  %v1960_v58 = vadd.f32 %v3887_v8, %v1925_v36  ;;  %v1967_v41 = vadd.f32 %v3887_v8, %v1932_v37  ;;  %v1968_v47 = vadd.f32 %v3887_v8, %v1933_v32  ;;  %v2192_v26 = vld [vmem:[%s2899_s16 + $0xc8] sm:$0xff] }
 0x17e   : > { %v1975_v48 = vadd.f32 %v3887_v8, %v1940_v29  ;;  %v1976_v49 = vadd.f32 %v3887_v8, %v1941_v43  ;;  %v1983_v46 = vmax.f32 %v1951_v63, 0.0  ;;  %v1984_v42 = vmax.f32 %v1952_v14, 0.0  ;;  %v3933_v8 = vld [vmem:[%s4071_s6] ss:$0 sm:$0xff]  ;;  %v2185_v29 = vld [vmem:[%s2899_s16 + $0x90] sm:$0xff] }
 0x17f   : > { %v1991_v51 = vmax.f32 %v1959_v44, 0.0  ;;  %v1992_v55 = vmax.f32 %v1960_v58, 0.0  ;;  %v1999_v57 = vmax.f32 %v1967_v41, 0.0  ;;  %v2000_v59 = vmax.f32 %v1968_v47, 0.0  ;;  %v2193_v63 = vld [vmem:[%s2899_s16 + $0xd0] sm:$0xff]  ;;  %v2170_v41 = vld [vmem:[%s2899_s16 + $0x18] sm:$0xff] }
 0x180   : > { %v2007_v10 = vmax.f32 %v1975_v48, 0.0  ;;  %v2008_v45 = vmax.f32 %v1976_v49, 0.0  ;;  %v2012_v24 = vpack.c.bf16 %v1984_v42, %v1983_v46  ;;  %v2178_v48 = vld [vmem:[%s2899_s16 + $0x58] sm:$0xff] }
 0x181   : > { %v2016_v16 = vpack.c.bf16 %v1992_v55, %v1991_v51  ;;  %v2020_v61 = vpack.c.bf16 %v2000_v59, %v1999_v57 }
 0x182   : > { %v2024_v6 = vpack.c.bf16 %v2008_v45, %v2007_v10  ;;  %v2186_v10 = vld [vmem:[%s2899_s16 + $0x98] sm:$0xff] }
 0x183   : > { %2089 = vmatmul.bf16.gmra.mxu0 %v2010_v0  ;;  %v2175_v0 = vld [vmem:[%s2899_s16 + $0x40] sm:$0xff] }
 0x184   : > { %2109 = vmatmul.bf16.gmra.mxu1 %v2014_v2 }
 0x185   : > { %2129 = vmatmul.bf16.gmra.mxu2 %v2018_v53 }
 0x186   : > { %2149 = vmatmul.bf16.gmra.mxu3 %v2022_v4 }
 0x193   : > { %2094 = vmatmul.bf16.gmra.mxu0 %v2011_v15  ;;  %v2169_v15 = vld [vmem:[%s2899_s16 + $0x10] sm:$0xff] }
 0x194   : > { %2114 = vmatmul.bf16.gmra.mxu1 %v2015_v33 }
 0x195   : > { %2134 = vmatmul.bf16.gmra.mxu2 %v2019_v34  ;;  %v2177_v34 = vld [vmem:[%s2899_s16 + $0x50] sm:$0xff] }
 0x196   : > { %2154 = vmatmul.bf16.gmra.mxu3 %v2023_v35 }
 0x1a3   : > { %2099 = vmatmul.bf16.gmra.mxu0 %v2012_v24  ;;  %v2194_v24 = vld [vmem:[%s2899_s16 + $0xd8] sm:$0xff] }
 0x1a4   : > { %2119 = vmatmul.bf16.gmra.mxu1 %v2016_v16 }
 0x1a5   : > { %2139 = vmatmul.bf16.gmra.mxu2 %v2020_v61 }
 0x1a6   : > { %2159 = vmatmul.bf16.gmra.mxu3 %v2024_v6 }
 0x1f0   : > { %v2085_v39 = vpop.f32.mrf.mxu0 }
 0x1f1   : > { %v2105_v60 = vpop.f32.mrf.mxu1  ;;  %v2086_v2 = vadd.f32 %v3933_v8, %v2085_v39  ;;  %v2171_v39 = vld [vmem:[%s2899_s16 + $0x20] sm:$0xff] }
 0x1f2   : > { %v2106_v53 = vadd.f32 %v3933_v8, %v2105_v60  ;;  %v2179_v60 = vld [vmem:[%s2899_s16 + $0x60] sm:$0xff] }
 0x1f3   : > { %v2199_v4 = vadd.f32 %v2167_v62, %v2086_v2 }
 0x1f4   : > { %v2207_v5 = vadd.f32 %v2175_v0, %v2106_v53 }
 0x1f5   : > { %2232 = vst [vmem:[%s3125_s8] sm:$0xff] %v2199_v4 }
 0x1f6   : > { %2240 = vst [vmem:[%s3125_s8 + $0x40] sm:$0xff] %v2207_v5 }
 0x1f8   : > { %v2125_v56 = vpop.f32.mrf.mxu2  ;;  %v2087_v54 = vpop.f32.mrf.mxu0 }
 0x1f9   : > { %v2145_v7 = vpop.f32.mrf.mxu3  ;;  %v2126_v52 = vadd.f32 %v3933_v8, %v2125_v56  ;;  %v2107_v11 = vpop.f32.mrf.mxu1  ;;  %v2088_v18 = vadd.f32 %v3933_v8, %v2087_v54 }
 0x1fa   : > { %v2146_v13 = vadd.f32 %v3933_v8, %v2145_v7  ;;  %v2108_v19 = vadd.f32 %v3933_v8, %v2107_v11  ;;  %v2187_v7 = vld [vmem:[%s2899_s16 + $0xa0] sm:$0xff]  ;;  %v2172_v11 = vld [vmem:[%s2899_s16 + $0x28] sm:$0xff] }
 0x1fb   : > { %v2215_v38 = vadd.f32 %v2183_v1, %v2126_v52  ;;  %v2200_v22 = vadd.f32 %v2168_v12, %v2088_v18  ;;  %v2195_v52 = vld [vmem:[%s2899_s16 + $0xe0] sm:$0xff]  ;;  %v2180_v18 = vld [vmem:[%s2899_s16 + $0x68] sm:$0xff] }
 0x1fc   : > { %v2223_v20 = vadd.f32 %v2191_v9, %v2146_v13  ;;  %v2208_v21 = vadd.f32 %v2176_v17, %v2108_v19 }
 0x1fd   : > { %2248 = vst [vmem:[%s3125_s8 + $0x80] sm:$0xff] %v2215_v38 }
 0x1fe   : > { %2256 = vst [vmem:[%s3125_s8 + $0xc0] sm:$0xff] %v2223_v20 }
 0x1ff   : > { %2233 = vst [vmem:[%s3125_s8 + $0x8] sm:$0xff] %v2200_v22 }
 0x200   : > { %2241 = vst [vmem:[%s3125_s8 + $0x48] sm:$0xff] %v2208_v21  ;;  %v2127_v23 = vpop.f32.mrf.mxu2  ;;  %v2090_v30 = vpop.f32.mrf.mxu0 }
 0x201   : > { %v2147_v25 = vpop.f32.mrf.mxu3  ;;  %v2128_v27 = vadd.f32 %v3933_v8, %v2127_v23  ;;  %v2110_v33 = vpop.f32.mrf.mxu1  ;;  %v2091_v35 = vadd.f32 %v3933_v8, %v2090_v30 }
 0x202   : > { %v2148_v28 = vadd.f32 %v3933_v8, %v2147_v25  ;;  %v2111_v50 = vadd.f32 %v3933_v8, %v2110_v33  ;;  %v2188_v25 = vld [vmem:[%s2899_s16 + $0xa8] sm:$0xff]  ;;  %v2173_v33 = vld [vmem:[%s2899_s16 + $0x30] sm:$0xff] }
 0x203   : > { %v2216_v3 = vadd.f32 %v2184_v40, %v2128_v27  ;;  %v2201_v36 = vadd.f32 %v2169_v15, %v2091_v35  ;;  %v2196_v27 = vld [vmem:[%s2899_s16 + $0xe8] sm:$0xff]  ;;  %v2181_v35 = vld [vmem:[%s2899_s16 + $0x70] sm:$0xff] }
 0x204   : > { %v2224_v31 = vadd.f32 %v2192_v26, %v2148_v28  ;;  %v2209_v37 = vadd.f32 %v2177_v34, %v2111_v50 }
 0x205   : > { %2249 = vst [vmem:[%s3125_s8 + $0x88] sm:$0xff] %v2216_v3 }
 0x206   : > { %2257 = vst [vmem:[%s3125_s8 + $0xc8] sm:$0xff] %v2224_v31 }
 0x207   : > { %2234 = vst [vmem:[%s3125_s8 + $0x10] sm:$0xff] %v2201_v36 }
 0x208   : > { %2242 = vst [vmem:[%s3125_s8 + $0x50] sm:$0xff] %v2209_v37  ;;  %v2130_v32 = vpop.f32.mrf.mxu2  ;;  %v2092_v58 = vpop.f32.mrf.mxu0 }
 0x209   : > { %v2150_v43 = vpop.f32.mrf.mxu3  ;;  %v2131_v14 = vadd.f32 %v3933_v8, %v2130_v32  ;;  %v2112_v47 = vpop.f32.mrf.mxu1  ;;  %v2093_v49 = vadd.f32 %v3933_v8, %v2092_v58 }
 0x20a   : > { %v2151_v44 = vadd.f32 %v3933_v8, %v2150_v43  ;;  %v2113_v46 = vadd.f32 %v3933_v8, %v2112_v47  ;;  %v2189_v43 = vld [vmem:[%s2899_s16 + $0xb0] sm:$0xff]  ;;  %v2174_v47 = vld [vmem:[%s2899_s16 + $0x38] sm:$0xff] }
 0x20b   : > { %v2217_v42 = vadd.f32 %v2185_v29, %v2131_v14  ;;  %v2202_v55 = vadd.f32 %v2170_v41, %v2093_v49  ;;  %v2197_v14 = vld [vmem:[%s2899_s16 + $0xf0] sm:$0xff]  ;;  %v2182_v49 = vld [vmem:[%s2899_s16 + $0x78] sm:$0xff] }
 0x20c   : > { %v2225_v51 = vadd.f32 %v2193_v63, %v2151_v44  ;;  %v2210_v57 = vadd.f32 %v2178_v48, %v2113_v46 }
 0x20d   : > { %2250 = vst [vmem:[%s3125_s8 + $0x90] sm:$0xff] %v2217_v42 }
 0x20e   : > { %2258 = vst [vmem:[%s3125_s8 + $0xd0] sm:$0xff] %v2225_v51 }
 0x20f   : > { %2235 = vst [vmem:[%s3125_s8 + $0x18] sm:$0xff] %v2202_v55 }
 0x210   : > { %2243 = vst [vmem:[%s3125_s8 + $0x58] sm:$0xff] %v2210_v57  ;;  %v2132_v59 = vpop.f32.mrf.mxu2  ;;  %v2095_v6 = vpop.f32.mrf.mxu0 }
 0x211   : > { %v2152_v45 = vpop.f32.mrf.mxu3  ;;  %v2133_v16 = vadd.f32 %v3933_v8, %v2132_v59  ;;  %v2115_v62 = vpop.f32.mrf.mxu1  ;;  %v2096_v0 = vadd.f32 %v3933_v8, %v2095_v6 }
 0x212   : > { %v2153_v61 = vadd.f32 %v3933_v8, %v2152_v45  ;;  %v2116_v2 = vadd.f32 %v3933_v8, %v2115_v62  ;;  %v2190_v45 = vld [vmem:[%s2899_s16 + $0xb8] sm:$0xff] }
 0x213   : > { %v2218_v53 = vadd.f32 %v2186_v10, %v2133_v16  ;;  %v2203_v5 = vadd.f32 %v2171_v39, %v2096_v0  ;;  %v2198_v16 = vld [vmem:[%s2899_s16 + $0xf8] sm:$0xff] }
 0x214   : > { %v2226_v4 = vadd.f32 %v2194_v24, %v2153_v61  ;;  %v2211_v56 = vadd.f32 %v2179_v60, %v2116_v2 }
 0x215   : > { %2251 = vst [vmem:[%s3125_s8 + $0x98] sm:$0xff] %v2218_v53 }
 0x216   : > { %2259 = vst [vmem:[%s3125_s8 + $0xd8] sm:$0xff] %v2226_v4 }
 0x217   : > { %2236 = vst [vmem:[%s3125_s8 + $0x20] sm:$0xff] %v2203_v5 }
 0x218   : > { %2244 = vst [vmem:[%s3125_s8 + $0x60] sm:$0xff] %v2211_v56  ;;  %v2135_v1 = vpop.f32.mrf.mxu2  ;;  %v2097_v12 = vpop.f32.mrf.mxu0 }
 0x219   : > { %v2155_v9 = vpop.f32.mrf.mxu3  ;;  %v2136_v13 = vadd.f32 %v3933_v8, %v2135_v1  ;;  %v2117_v17 = vpop.f32.mrf.mxu1  ;;  %v2098_v19 = vadd.f32 %v3933_v8, %v2097_v12 }
 0x21a   : > { %v2156_v54 = vadd.f32 %v3933_v8, %v2155_v9  ;;  %v2118_v38 = vadd.f32 %v3933_v8, %v2117_v17 }
 0x21b   : > { %v2219_v20 = vadd.f32 %v2187_v7, %v2136_v13  ;;  %v2204_v21 = vadd.f32 %v2172_v11, %v2098_v19 }
 0x21c   : > { %v2227_v22 = vadd.f32 %v2195_v52, %v2156_v54  ;;  %v2212_v23 = vadd.f32 %v2180_v18, %v2118_v38 }
 0x21d   : > { %2252 = vst [vmem:[%s3125_s8 + $0xa0] sm:$0xff] %v2219_v20 }
 0x21e   : > { %2260 = vst [vmem:[%s3125_s8 + $0xe0] sm:$0xff] %v2227_v22 }
 0x21f   : > { %2237 = vst [vmem:[%s3125_s8 + $0x28] sm:$0xff] %v2204_v21 }
 0x220   : > { %2245 = vst [vmem:[%s3125_s8 + $0x68] sm:$0xff] %v2212_v23  ;;  %v2137_v40 = vpop.f32.mrf.mxu2  ;;  %v2100_v15 = vpop.f32.mrf.mxu0 }
 0x221   : > { %v2157_v26 = vpop.f32.mrf.mxu3  ;;  %v2138_v28 = vadd.f32 %v3933_v8, %v2137_v40  ;;  %v2120_v34 = vpop.f32.mrf.mxu1  ;;  %v2101_v50 = vadd.f32 %v3933_v8, %v2100_v15 }
 0x222   : > { %v2158_v30 = vadd.f32 %v3933_v8, %v2157_v26  ;;  %v2121_v3 = vadd.f32 %v3933_v8, %v2120_v34 }
 0x223   : > { %v2220_v31 = vadd.f32 %v2188_v25, %v2138_v28  ;;  %v2205_v37 = vadd.f32 %v2173_v33, %v2101_v50 }
 0x224   : > { %v2228_v36 = vadd.f32 %v2196_v27, %v2158_v30  ;;  %v2213_v32 = vadd.f32 %v2181_v35, %v2121_v3 }
 0x225   : > { %2253 = vst [vmem:[%s3125_s8 + $0xa8] sm:$0xff] %v2220_v31 }
 0x226   : > { %2261 = vst [vmem:[%s3125_s8 + $0xe8] sm:$0xff] %v2228_v36 }
 0x227   : > { %2238 = vst [vmem:[%s3125_s8 + $0x30] sm:$0xff] %v2205_v37 }
 0x228   : > { %2246 = vst [vmem:[%s3125_s8 + $0x70] sm:$0xff] %v2213_v32  ;;  %v2140_v29 = vpop.f32.mrf.mxu2  ;;  %v2102_v41 = vpop.f32.mrf.mxu0 }
 0x229   : > { %v2160_v63 = vpop.f32.mrf.mxu3  ;;  %v2141_v44 = vadd.f32 %v3933_v8, %v2140_v29  ;;  %v2122_v48 = vpop.f32.mrf.mxu1  ;;  %v2103_v46 = vadd.f32 %v3933_v8, %v2102_v41 }
 0x22a   : > { %v2161_v58 = vadd.f32 %v3933_v8, %v2160_v63  ;;  %v2123_v42 = vadd.f32 %v3933_v8, %v2122_v48 }
 0x22b   : > { %v2221_v51 = vadd.f32 %v2189_v43, %v2141_v44  ;;  %v2206_v57 = vadd.f32 %v2174_v47, %v2103_v46 }
 0x22c   : > { %v2229_v55 = vadd.f32 %v2197_v14, %v2161_v58  ;;  %v2214_v59 = vadd.f32 %v2182_v49, %v2123_v42 }
 0x22d   : > { %2254 = vst [vmem:[%s3125_s8 + $0xb0] sm:$0xff] %v2221_v51 }
 0x22e   : > { %2262 = vst [vmem:[%s3125_s8 + $0xf0] sm:$0xff] %v2229_v55 }
 0x22f   : > { %2239 = vst [vmem:[%s3125_s8 + $0x38] sm:$0xff] %v2206_v57 }
 0x230   : > { %2247 = vst [vmem:[%s3125_s8 + $0x78] sm:$0xff] %v2214_v59  ;;  %v2142_v10 = vpop.f32.mrf.mxu2 }
 0x231   : > { %v2162_v24 = vpop.f32.mrf.mxu3  ;;  %v2143_v61 = vadd.f32 %v3933_v8, %v2142_v10 }
 0x232   : > { %v2163_v6 = vadd.f32 %v3933_v8, %v2162_v24 }
 0x233   : > { %v2222_v39 = vadd.f32 %v2190_v45, %v2143_v61 }
 0x234   : > { %v2230_v62 = vadd.f32 %v2198_v16, %v2163_v6 }
 0x235   : > { %2255 = vst [vmem:[%s3125_s8 + $0xb8] sm:$0xff] %v2222_v39 }
 0x236   : > { %2263 = vst [vmem:[%s3125_s8 + $0xf8] sm:$0xff] %v2230_v62 }
 0x237   : > { %2713 = shalt.err (!%p2710_p7)
}
 0x238   : > { %s2765_s22 = smov 128   ;;  %s2766_s8 = smov 8  }
 0x239   : > { %2591 = dma.vmem_to_hbm [thread:$0]  (%p2857_p11), %s2278_s28, 4096, %s2280_s11, %s2265_s15, %s2765_s22, %s2765_s22, %s2766_s8  }
 0x23a PF: > { %s2294_s12 = sand.u32 1, %s2744_s24   ;;  %p4079_p5 = scmp.ge.s32.totalorder %s2756_s27, 2 }
 0x23b   : > { %s2295_s21 = scalar_lea.sflag [#allocation6], %s2294_s12 }
 0x23c   : > { %p2598_p8 = pnand %p4079_p5, %p2861_p12 }
 0x23e   : > { %p2599_p10 = pneg %p2598_p8 }
 0x240   : > { %2739 = dma.done.wait (%p2599_p10), %s2295_s21, 4096  }
 0x241   : > { %2741 = vsyncadd (%p2599_p10), %s2295_s21, 4294963200  ;;  %s4080_s23 = sld [smem:[#allocation10_spill]]  ;;  %p20_p2 = scmp.ge.s32.totalorder %s2832_s30, 4  }
 0x242   : > { %s4081_s24 = smov %s2748_s25  ;;  %s4082_s25 = smov %s2752_s26 }
 0x243   : > { %s4084_s27 = smov %s2832_s30  ;;  %22 = sbr.rel (!%p20_p2) target bundleno = 5 (0x5), region = 172 }
 0x247   : > { %s4083_s26 = smov %s4080_s23 }
 0x248   :  { %2301 = vsyncpa [#allocation5], 1 }
 0x249   :  { %2303 = vsyncpa [#allocation5 + $0x1], 1 }
 0x24a   :  { %2304 = vsyncpa [#allocation6], 1 }
 0x24b   :  { %2306 = vsyncpa [#allocation6 + $0x1], 1 }

</bundles_post_ra>
